<compile_context>
chip_gen: v7x
topology: tpu7x:2x2x1
jax: 0.10.0
libtpu: 0.0.40
codegen_flags: <defaults>
</compile_context>

<pallas_src>
import math

import jax
import jax.numpy as jnp
from jax import lax
from jax.experimental import pallas as pl
from jax.experimental.pallas import tpu as pltpu

IMAGE_SIZE = (1, 28, 28)
LATENT_DIM = 96
LATENT_PAD = 128                       # layer-1 K padded to a lane multiple
HIDDEN = [128, 256, 512, 1024]
OUT_DIM = int(math.prod(IMAGE_SIZE))   # 784
OUT_PAD = 896                          # 7 * 128 -> lane-dense output width
BN_EPS = 1e-5
INV_SQRT2 = 1.0 / math.sqrt(2.0)


# ---------------------------------------------------------------------------
# Packed layout for all small per-channel vectors (one DMA instead of 14).
# Per hidden layer: [gamma, beta, weight-scale]; then [out-bias, out-scale].
# All offsets and sizes are multiples of 128 -> lane-aligned static slices.
# ---------------------------------------------------------------------------
def _build_vec_layout():
    offs = {}
    off = 0
    for i, h in enumerate(HIDDEN):
        for kind in ("gamma", "beta", "scale"):
            offs[(i, kind)] = (off, h)
            off += h
    offs[("out", "bias")] = (off, OUT_PAD)
    off += OUT_PAD
    offs[("out", "scale")] = (off, OUT_PAD)
    off += OUT_PAD
    return offs, off


_VEC_OFFS, VEC_TOTAL = _build_vec_layout()   # VEC_TOTAL = 7552 = 59 * 128


# ---------------------------------------------------------------------------
# Fused kernel
# ---------------------------------------------------------------------------
def _vec(vec_ref, key):
    off, n = _VEC_OFFS[key]
    return vec_ref[:, off:off + n]           # static lane-aligned slice (1, n)


def _bn_gelu(y, gamma, beta):
    """Training-mode BatchNorm1d (batch stats, biased var) + exact GELU."""
    mean = jnp.mean(y, axis=0, keepdims=True)
    centered = y - mean
    var = jnp.mean(centered * centered, axis=0, keepdims=True)
    y_hat = centered * lax.rsqrt(var + BN_EPS)
    y_hat = y_hat * gamma + beta
    return 0.5 * y_hat * (1.0 + lax.erf(y_hat * INV_SQRT2))


def _generator_kernel(z_ref, w1_ref, w2_ref, w3_ref, w4_hbm, w5_hbm, vec_ref,
                      o_ref, w4_vmem, w5_vmem, dma_sem):
    """Full Generator forward: 4x(Linear+BN+GELU) -> Linear -> Sigmoid."""
    # Kick off the two big weight DMAs immediately; they overlap layers 1-3.
    cp4 = pltpu.make_async_copy(w4_hbm, w4_vmem, dma_sem.at[0])
    cp5 = pltpu.make_async_copy(w5_hbm, w5_vmem, dma_sem.at[1])
    cp4.start()
    cp5.start()

    x = z_ref[...]                            # (B, 128) f32, zero-padded latent

    hidden_w_refs = (w1_ref, w2_ref, w3_ref, w4_vmem)
    for i, w_ref in enumerate(hidden_w_refs):
        if i == 3:
            cp4.wait()                        # w4 needed only now
        # int8 weights dequantized on the fly (int8 values are exact in bf16);
        # per-output-channel scale folded into the f32 accumulator before BN.
        w_bf16 = w_ref[...].astype(jnp.bfloat16)
        y = jnp.dot(x.astype(jnp.bfloat16), w_bf16,
                    preferred_element_type=jnp.float32)
        y = y * _vec(vec_ref, (i, "scale"))
        x = _bn_gelu(y, _vec(vec_ref, (i, "gamma")), _vec(vec_ref, (i, "beta")))

    cp5.wait()
    w5_bf16 = w5_vmem[...].astype(jnp.bfloat16)
    y = jnp.dot(x.astype(jnp.bfloat16), w5_bf16,
                preferred_element_type=jnp.float32)
    y = y * _vec(vec_ref, ("out", "scale")) + _vec(vec_ref, ("out", "bias"))
    o_ref[...] = 1.0 / (1.0 + jnp.exp(-y))    # exact sigmoid (EUP slack is huge)


# ---------------------------------------------------------------------------
# Wrapper
# ---------------------------------------------------------------------------
def generator_pallas(z, params):
    B = z.shape[0]
    z_pad = jnp.pad(z.astype(jnp.float32),
                    ((0, 0), (0, LATENT_PAD - LATENT_DIM)))

    ws = params["w"]    # 5 int8 weight matrices (in, out) layout
    flat_inputs = [z_pad, ws[0], ws[1], ws[2], ws[3], ws[4], params["vec"]]

    vmem_spec = pl.BlockSpec(memory_space=pltpu.MemorySpace.VMEM)
    hbm_spec = pl.BlockSpec(memory_space=pl.ANY)       # manual-DMA inputs
    in_specs = [vmem_spec, vmem_spec, vmem_spec, vmem_spec,
                hbm_spec, hbm_spec, vmem_spec]

    # Advisory cost model for XLA scheduling around the custom call.
    dims = [LATENT_PAD] + HIDDEN + [OUT_PAD]
    flops = sum(2 * B * dims[i] * dims[i + 1] for i in range(len(dims) - 1))
    transcendentals = B * (sum(HIDDEN) + 2 * OUT_PAD)
    bytes_accessed = (sum(int(a.size) * a.dtype.itemsize for a in flat_inputs)
                      + B * OUT_PAD * 4)

    out = pl.pallas_call(
        _generator_kernel,
        out_shape=jax.ShapeDtypeStruct((B, OUT_PAD), jnp.float32),
        in_specs=in_specs,
        out_specs=vmem_spec,
        scratch_shapes=[
            pltpu.VMEM((HIDDEN[2], HIDDEN[3]), jnp.int8),   # w4 landing buffer
            pltpu.VMEM((HIDDEN[3], OUT_PAD), jnp.int8),     # w5 landing buffer
            pltpu.SemaphoreType.DMA((2,)),
        ],
        compiler_params=pltpu.CompilerParams(
            vmem_limit_bytes=32 * 1024 * 1024),
        cost_estimate=pl.CostEstimate(flops=flops,
                                      transcendentals=transcendentals,
                                      bytes_accessed=bytes_accessed),
    )(*flat_inputs)

    return out[:, :OUT_DIM].reshape(B, *IMAGE_SIZE)  # NCHW, like PyTorch


# ---------------------------------------------------------------------------
# Parameter init (PyTorch-Linear-style uniform bounds) + int8 quantization
# ---------------------------------------------------------------------------
def _quantize_per_channel_int8(w):
    """Symmetric per-output-channel (last axis) int8 quantization."""
    absmax = jnp.max(jnp.abs(w), axis=0)
    scale = jnp.maximum(absmax, 1e-12) / 127.0
    q = jnp.clip(jnp.round(w / scale), -127.0, 127.0).astype(jnp.int8)
    return q, scale.astype(jnp.float32)


def init_generator_params(key):
    dims_in = [LATENT_DIM] + HIDDEN
    dims_out = HIDDEN + [OUT_DIM]
    ws = []
    vec = jnp.zeros((1, VEC_TOTAL), jnp.float32)
    for i, (fan_in, fan_out) in enumerate(zip(dims_in, dims_out)):
        key, kw, kb = jax.random.split(key, 3)
        bound = 1.0 / math.sqrt(fan_in)
        w = jax.random.uniform(kw, (fan_in, fan_out), jnp.float32, -bound, bound)
        b = jax.random.uniform(kb, (fan_out,), jnp.float32, -bound, bound)
        if i == 0:
            # Zero-pad latent rows 96 -> 128 so layer-1 K is lane-aligned.
            w = jnp.zeros((LATENT_PAD, fan_out),
                          jnp.float32).at[:LATENT_DIM, :].set(w)
        if i < len(HIDDEN):
            # Hidden-layer Linear bias is exactly cancelled by the following
            # training-mode BatchNorm mean subtraction -> not stored or fed.
            del b
            q, scale = _quantize_per_channel_int8(w)
            ws.append(q)
            off, n = _VEC_OFFS[(i, "gamma")]
            vec = vec.at[0, off:off + n].set(jnp.ones((n,), jnp.float32))
            off, n = _VEC_OFFS[(i, "beta")]
            vec = vec.at[0, off:off + n].set(jnp.zeros((n,), jnp.float32))
            off, n = _VEC_OFFS[(i, "scale")]
            vec = vec.at[0, off:off + n].set(scale)
        else:
            # Pad final layer to lane-dense width (896 = 7*128).
            w_pad = jnp.zeros((fan_in, OUT_PAD),
                              jnp.float32).at[:, :OUT_DIM].set(w)
            b_pad = jnp.zeros((OUT_PAD,), jnp.float32).at[:OUT_DIM].set(b)
            q, scale = _quantize_per_channel_int8(w_pad)
            ws.append(q)
            off, n = _VEC_OFFS[("out", "bias")]
            vec = vec.at[0, off:off + n].set(b_pad)
            off, n = _VEC_OFFS[("out", "scale")]
            vec = vec.at[0, off:off + n].set(scale)
    return {"w": ws, "vec": vec}


@jax.jit
def generator_forward(z, params):
    return generator_pallas(z, params)


# ---------------------------------------------------------------------------
# Main
# ---------------------------------------------------------------------------
if __name__ == "__main__":
    key = jax.random.PRNGKey(0)
    k_params, k_z = jax.random.split(key)

    B = 8  # batch (BatchNorm1d training mode needs B > 1); sublane-aligned
    z = jax.random.normal(k_z, (B, LATENT_DIM), jnp.float32)
    params = init_generator_params(k_params)

    img = generator_forward(z, params)
    jax.block_until_ready(img)

    assert img.shape == (B, *IMAGE_SIZE), img.shape
    assert img.dtype == jnp.float32
    assert bool(jnp.all(jnp.isfinite(img)))
    assert bool(jnp.all((img >= 0.0) & (img <= 1.0)))  # sigmoid range

    print("KERNEL_OK")
</pallas_src>

<mosaic_0001>
module attributes {stable_mosaic.version = 11 : i64} {
  func.func @_generator_kernel(%arg0: memref<8x128xf32, #tpu.memory_space<vmem>>, %arg1: memref<128x128xi8, #tpu.memory_space<vmem>>, %arg2: memref<128x256xi8, #tpu.memory_space<vmem>>, %arg3: memref<256x512xi8, #tpu.memory_space<vmem>>, %arg4: memref<512x1024xi8, #tpu.memory_space<any>>, %arg5: memref<1024x896xi8, #tpu.memory_space<any>>, %arg6: memref<1x7552xf32, #tpu.memory_space<vmem>>, %arg7: memref<8x896xf32, #tpu.memory_space<vmem>>, %arg8: memref<512x1024xi8, #tpu.memory_space<vmem>>, %arg9: memref<1024x896xi8, #tpu.memory_space<vmem>>, %arg10: memref<2x!tpu.dma_semaphore, #tpu.memory_space<semaphore_mem>>) attributes {dimension_semantics = [], scalar_prefetch = 0 : i64, scratch_operands = 3 : i64, tpu.core_type = #tpu.core_type<tc>} {
    %c0_i32 = arith.constant 0 : i32
    %0 = tpu.memref_slice %arg10[%c0_i32] : memref<2x!tpu.dma_semaphore, #tpu.memory_space<semaphore_mem>> -> memref<1x!tpu.dma_semaphore, #tpu.memory_space<semaphore_mem>>
    %1 = tpu.memref_squeeze %0 : memref<1x!tpu.dma_semaphore, #tpu.memory_space<semaphore_mem>> -> memref<!tpu.dma_semaphore, #tpu.memory_space<semaphore_mem>>
    tpu.enqueue_dma source(%arg4 : memref<512x1024xi8, #tpu.memory_space<any>>) target(%arg8 : memref<512x1024xi8, #tpu.memory_space<vmem>>) target_semaphore(%1 : memref<!tpu.dma_semaphore, #tpu.memory_space<semaphore_mem>>)
    %c1_i32 = arith.constant 1 : i32
    %2 = tpu.memref_slice %arg10[%c1_i32] : memref<2x!tpu.dma_semaphore, #tpu.memory_space<semaphore_mem>> -> memref<1x!tpu.dma_semaphore, #tpu.memory_space<semaphore_mem>>
    %3 = tpu.memref_squeeze %2 : memref<1x!tpu.dma_semaphore, #tpu.memory_space<semaphore_mem>> -> memref<!tpu.dma_semaphore, #tpu.memory_space<semaphore_mem>>
    tpu.enqueue_dma source(%arg5 : memref<1024x896xi8, #tpu.memory_space<any>>) target(%arg9 : memref<1024x896xi8, #tpu.memory_space<vmem>>) target_semaphore(%3 : memref<!tpu.dma_semaphore, #tpu.memory_space<semaphore_mem>>)
    %c0 = arith.constant 0 : index
    %c0_0 = arith.constant 0 : index
    %4 = vector.load %arg0[%c0, %c0_0] : memref<8x128xf32, #tpu.memory_space<vmem>>, vector<8x128xf32>
    %c0_1 = arith.constant 0 : index
    %c0_2 = arith.constant 0 : index
    %5 = vector.load %arg1[%c0_1, %c0_2] : memref<128x128xi8, #tpu.memory_space<vmem>>, vector<128x128xi8>
    %6 = arith.sitofp %5 : vector<128x128xi8> to vector<128x128xbf16>
    %7 = arith.truncf %4 : vector<8x128xf32> to vector<8x128xbf16>
    %cst = arith.constant dense<0.000000e+00> : vector<8x128xf32>
    %8 = tpu.matmul %7, %6, %cst {dimension_numbers = #tpu.dot_dimension_numbers<[1], [0], [0], [1], [0, 0, 1, 1], [], []>} : vector<8x128xbf16>, vector<128x128xbf16>, vector<8x128xf32> -> vector<8x128xf32>
    %c0_3 = arith.constant 0 : index
    %c256 = arith.constant 256 : index
    %9 = vector.load %arg6[%c0_3, %c256] : memref<1x7552xf32, #tpu.memory_space<vmem>>, vector<1x128xf32>
    %10 = vector.broadcast %9 : vector<1x128xf32> to vector<8x128xf32>
    %11 = arith.mulf %8, %10 : vector<8x128xf32>
    %c0_4 = arith.constant 0 : index
    %c0_5 = arith.constant 0 : index
    %12 = vector.load %arg6[%c0_4, %c0_5] : memref<1x7552xf32, #tpu.memory_space<vmem>>, vector<1x128xf32>
    %c0_6 = arith.constant 0 : index
    %c128 = arith.constant 128 : index
    %13 = vector.load %arg6[%c0_6, %c128] : memref<1x7552xf32, #tpu.memory_space<vmem>>, vector<1x128xf32>
    %cst_7 = arith.constant dense<0.000000e+00> : vector<128xf32>
    %14 = vector.multi_reduction <add>, %11, %cst_7 [0] : vector<8x128xf32> to vector<128xf32>
    %15 = vector.shape_cast %14 : vector<128xf32> to vector<1x128xf32>
    %cst_8 = arith.constant 8.000000e+00 : f32
    %16 = vector.broadcast %cst_8 : f32 to vector<1x128xf32>
    %17 = arith.divf %15, %16 : vector<1x128xf32>
    %18 = vector.broadcast %17 : vector<1x128xf32> to vector<8x128xf32>
    %19 = arith.subf %11, %18 : vector<8x128xf32>
    %20 = arith.mulf %19, %19 : vector<8x128xf32>
    %cst_9 = arith.constant dense<0.000000e+00> : vector<128xf32>
    %21 = vector.multi_reduction <add>, %20, %cst_9 [0] : vector<8x128xf32> to vector<128xf32>
    %22 = vector.shape_cast %21 : vector<128xf32> to vector<1x128xf32>
    %cst_10 = arith.constant 8.000000e+00 : f32
    %23 = vector.broadcast %cst_10 : f32 to vector<1x128xf32>
    %24 = arith.divf %22, %23 : vector<1x128xf32>
    %cst_11 = arith.constant 9.99999974E-6 : f32
    %25 = vector.broadcast %cst_11 : f32 to vector<1x128xf32>
    %26 = arith.addf %24, %25 : vector<1x128xf32>
    %27 = math.rsqrt %26 : vector<1x128xf32>
    %28 = vector.broadcast %27 : vector<1x128xf32> to vector<8x128xf32>
    %29 = arith.mulf %19, %28 : vector<8x128xf32>
    %30 = vector.broadcast %12 : vector<1x128xf32> to vector<8x128xf32>
    %31 = arith.mulf %29, %30 : vector<8x128xf32>
    %32 = vector.broadcast %13 : vector<1x128xf32> to vector<8x128xf32>
    %33 = arith.addf %31, %32 : vector<8x128xf32>
    %cst_12 = arith.constant 5.000000e-01 : f32
    %34 = vector.broadcast %cst_12 : f32 to vector<8x128xf32>
    %35 = arith.mulf %34, %33 : vector<8x128xf32>
    %cst_13 = arith.constant 0.707106769 : f32
    %36 = vector.broadcast %cst_13 : f32 to vector<8x128xf32>
    %37 = arith.mulf %33, %36 : vector<8x128xf32>
    %38 = math.erf %37 : vector<8x128xf32>
    %cst_14 = arith.constant 1.000000e+00 : f32
    %39 = vector.broadcast %cst_14 : f32 to vector<8x128xf32>
    %40 = arith.addf %39, %38 : vector<8x128xf32>
    %41 = arith.mulf %35, %40 : vector<8x128xf32>
    %c0_15 = arith.constant 0 : index
    %c0_16 = arith.constant 0 : index
    %42 = vector.load %arg2[%c0_15, %c0_16] : memref<128x256xi8, #tpu.memory_space<vmem>>, vector<128x256xi8>
    %43 = arith.sitofp %42 : vector<128x256xi8> to vector<128x256xbf16>
    %44 = arith.truncf %41 : vector<8x128xf32> to vector<8x128xbf16>
    %cst_17 = arith.constant dense<0.000000e+00> : vector<8x256xf32>
    %45 = tpu.matmul %44, %43, %cst_17 {dimension_numbers = #tpu.dot_dimension_numbers<[1], [0], [0], [1], [0, 0, 1, 1], [], []>} : vector<8x128xbf16>, vector<128x256xbf16>, vector<8x256xf32> -> vector<8x256xf32>
    %c0_18 = arith.constant 0 : index
    %c896 = arith.constant 896 : index
    %46 = vector.load %arg6[%c0_18, %c896] : memref<1x7552xf32, #tpu.memory_space<vmem>>, vector<1x256xf32>
    %47 = vector.broadcast %46 : vector<1x256xf32> to vector<8x256xf32>
    %48 = arith.mulf %45, %47 : vector<8x256xf32>
    %c0_19 = arith.constant 0 : index
    %c384 = arith.constant 384 : index
    %49 = vector.load %arg6[%c0_19, %c384] : memref<1x7552xf32, #tpu.memory_space<vmem>>, vector<1x256xf32>
    %c0_20 = arith.constant 0 : index
    %c640 = arith.constant 640 : index
    %50 = vector.load %arg6[%c0_20, %c640] : memref<1x7552xf32, #tpu.memory_space<vmem>>, vector<1x256xf32>
    %cst_21 = arith.constant dense<0.000000e+00> : vector<256xf32>
    %51 = vector.multi_reduction <add>, %48, %cst_21 [0] : vector<8x256xf32> to vector<256xf32>
    %52 = vector.shape_cast %51 : vector<256xf32> to vector<1x256xf32>
    %cst_22 = arith.constant 8.000000e+00 : f32
    %53 = vector.broadcast %cst_22 : f32 to vector<1x256xf32>
    %54 = arith.divf %52, %53 : vector<1x256xf32>
    %55 = vector.broadcast %54 : vector<1x256xf32> to vector<8x256xf32>
    %56 = arith.subf %48, %55 : vector<8x256xf32>
    %57 = arith.mulf %56, %56 : vector<8x256xf32>
    %cst_23 = arith.constant dense<0.000000e+00> : vector<256xf32>
    %58 = vector.multi_reduction <add>, %57, %cst_23 [0] : vector<8x256xf32> to vector<256xf32>
    %59 = vector.shape_cast %58 : vector<256xf32> to vector<1x256xf32>
    %cst_24 = arith.constant 8.000000e+00 : f32
    %60 = vector.broadcast %cst_24 : f32 to vector<1x256xf32>
    %61 = arith.divf %59, %60 : vector<1x256xf32>
    %cst_25 = arith.constant 9.99999974E-6 : f32
    %62 = vector.broadcast %cst_25 : f32 to vector<1x256xf32>
    %63 = arith.addf %61, %62 : vector<1x256xf32>
    %64 = math.rsqrt %63 : vector<1x256xf32>
    %65 = vector.broadcast %64 : vector<1x256xf32> to vector<8x256xf32>
    %66 = arith.mulf %56, %65 : vector<8x256xf32>
    %67 = vector.broadcast %49 : vector<1x256xf32> to vector<8x256xf32>
    %68 = arith.mulf %66, %67 : vector<8x256xf32>
    %69 = vector.broadcast %50 : vector<1x256xf32> to vector<8x256xf32>
    %70 = arith.addf %68, %69 : vector<8x256xf32>
    %cst_26 = arith.constant 5.000000e-01 : f32
    %71 = vector.broadcast %cst_26 : f32 to vector<8x256xf32>
    %72 = arith.mulf %71, %70 : vector<8x256xf32>
    %cst_27 = arith.constant 0.707106769 : f32
    %73 = vector.broadcast %cst_27 : f32 to vector<8x256xf32>
    %74 = arith.mulf %70, %73 : vector<8x256xf32>
    %75 = math.erf %74 : vector<8x256xf32>
    %cst_28 = arith.constant 1.000000e+00 : f32
    %76 = vector.broadcast %cst_28 : f32 to vector<8x256xf32>
    %77 = arith.addf %76, %75 : vector<8x256xf32>
    %78 = arith.mulf %72, %77 : vector<8x256xf32>
    %c0_29 = arith.constant 0 : index
    %c0_30 = arith.constant 0 : index
    %79 = vector.load %arg3[%c0_29, %c0_30] : memref<256x512xi8, #tpu.memory_space<vmem>>, vector<256x512xi8>
    %80 = arith.sitofp %79 : vector<256x512xi8> to vector<256x512xbf16>
    %81 = arith.truncf %78 : vector<8x256xf32> to vector<8x256xbf16>
    %cst_31 = arith.constant dense<0.000000e+00> : vector<8x512xf32>
    %82 = tpu.matmul %81, %80, %cst_31 {dimension_numbers = #tpu.dot_dimension_numbers<[1], [0], [0], [1], [0, 0, 1, 1], [], []>} : vector<8x256xbf16>, vector<256x512xbf16>, vector<8x512xf32> -> vector<8x512xf32>
    %c0_32 = arith.constant 0 : index
    %c2176 = arith.constant 2176 : index
    %83 = vector.load %arg6[%c0_32, %c2176] : memref<1x7552xf32, #tpu.memory_space<vmem>>, vector<1x512xf32>
    %84 = vector.broadcast %83 : vector<1x512xf32> to vector<8x512xf32>
    %85 = arith.mulf %82, %84 : vector<8x512xf32>
    %c0_33 = arith.constant 0 : index
    %c1152 = arith.constant 1152 : index
    %86 = vector.load %arg6[%c0_33, %c1152] : memref<1x7552xf32, #tpu.memory_space<vmem>>, vector<1x512xf32>
    %c0_34 = arith.constant 0 : index
    %c1664 = arith.constant 1664 : index
    %87 = vector.load %arg6[%c0_34, %c1664] : memref<1x7552xf32, #tpu.memory_space<vmem>>, vector<1x512xf32>
    %cst_35 = arith.constant dense<0.000000e+00> : vector<512xf32>
    %88 = vector.multi_reduction <add>, %85, %cst_35 [0] : vector<8x512xf32> to vector<512xf32>
    %89 = vector.shape_cast %88 : vector<512xf32> to vector<1x512xf32>
    %cst_36 = arith.constant 8.000000e+00 : f32
    %90 = vector.broadcast %cst_36 : f32 to vector<1x512xf32>
    %91 = arith.divf %89, %90 : vector<1x512xf32>
    %92 = vector.broadcast %91 : vector<1x512xf32> to vector<8x512xf32>
    %93 = arith.subf %85, %92 : vector<8x512xf32>
    %94 = arith.mulf %93, %93 : vector<8x512xf32>
    %cst_37 = arith.constant dense<0.000000e+00> : vector<512xf32>
    %95 = vector.multi_reduction <add>, %94, %cst_37 [0] : vector<8x512xf32> to vector<512xf32>
    %96 = vector.shape_cast %95 : vector<512xf32> to vector<1x512xf32>
    %cst_38 = arith.constant 8.000000e+00 : f32
    %97 = vector.broadcast %cst_38 : f32 to vector<1x512xf32>
    %98 = arith.divf %96, %97 : vector<1x512xf32>
    %cst_39 = arith.constant 9.99999974E-6 : f32
    %99 = vector.broadcast %cst_39 : f32 to vector<1x512xf32>
    %100 = arith.addf %98, %99 : vector<1x512xf32>
    %101 = math.rsqrt %100 : vector<1x512xf32>
    %102 = vector.broadcast %101 : vector<1x512xf32> to vector<8x512xf32>
    %103 = arith.mulf %93, %102 : vector<8x512xf32>
    %104 = vector.broadcast %86 : vector<1x512xf32> to vector<8x512xf32>
    %105 = arith.mulf %103, %104 : vector<8x512xf32>
    %106 = vector.broadcast %87 : vector<1x512xf32> to vector<8x512xf32>
    %107 = arith.addf %105, %106 : vector<8x512xf32>
    %cst_40 = arith.constant 5.000000e-01 : f32
    %108 = vector.broadcast %cst_40 : f32 to vector<8x512xf32>
    %109 = arith.mulf %108, %107 : vector<8x512xf32>
    %cst_41 = arith.constant 0.707106769 : f32
    %110 = vector.broadcast %cst_41 : f32 to vector<8x512xf32>
    %111 = arith.mulf %107, %110 : vector<8x512xf32>
    %112 = math.erf %111 : vector<8x512xf32>
    %cst_42 = arith.constant 1.000000e+00 : f32
    %113 = vector.broadcast %cst_42 : f32 to vector<8x512xf32>
    %114 = arith.addf %113, %112 : vector<8x512xf32>
    %115 = arith.mulf %109, %114 : vector<8x512xf32>
    %c0_i32_43 = arith.constant 0 : i32
    %116 = tpu.memref_slice %arg10[%c0_i32_43] : memref<2x!tpu.dma_semaphore, #tpu.memory_space<semaphore_mem>> -> memref<1x!tpu.dma_semaphore, #tpu.memory_space<semaphore_mem>>
    %117 = tpu.memref_squeeze %116 : memref<1x!tpu.dma_semaphore, #tpu.memory_space<semaphore_mem>> -> memref<!tpu.dma_semaphore, #tpu.memory_space<semaphore_mem>>
    tpu.wait_dma2 semaphore(%117 : memref<!tpu.dma_semaphore, #tpu.memory_space<semaphore_mem>>) src(%arg4 : memref<512x1024xi8, #tpu.memory_space<any>>) dst(%arg8 : memref<512x1024xi8, #tpu.memory_space<vmem>>)
    %c0_44 = arith.constant 0 : index
    %c0_45 = arith.constant 0 : index
    %118 = vector.load %arg8[%c0_44, %c0_45] : memref<512x1024xi8, #tpu.memory_space<vmem>>, vector<512x1024xi8>
    %119 = arith.sitofp %118 : vector<512x1024xi8> to vector<512x1024xbf16>
    %120 = arith.truncf %115 : vector<8x512xf32> to vector<8x512xbf16>
    %cst_46 = arith.constant dense<0.000000e+00> : vector<8x1024xf32>
    %121 = tpu.matmul %120, %119, %cst_46 {dimension_numbers = #tpu.dot_dimension_numbers<[1], [0], [0], [1], [0, 0, 1, 1], [], []>} : vector<8x512xbf16>, vector<512x1024xbf16>, vector<8x1024xf32> -> vector<8x1024xf32>
    %c0_47 = arith.constant 0 : index
    %c4736 = arith.constant 4736 : index
    %122 = vector.load %arg6[%c0_47, %c4736] : memref<1x7552xf32, #tpu.memory_space<vmem>>, vector<1x1024xf32>
    %123 = vector.broadcast %122 : vector<1x1024xf32> to vector<8x1024xf32>
    %124 = arith.mulf %121, %123 : vector<8x1024xf32>
    %c0_48 = arith.constant 0 : index
    %c2688 = arith.constant 2688 : index
    %125 = vector.load %arg6[%c0_48, %c2688] : memref<1x7552xf32, #tpu.memory_space<vmem>>, vector<1x1024xf32>
    %c0_49 = arith.constant 0 : index
    %c3712 = arith.constant 3712 : index
    %126 = vector.load %arg6[%c0_49, %c3712] : memref<1x7552xf32, #tpu.memory_space<vmem>>, vector<1x1024xf32>
    %cst_50 = arith.constant dense<0.000000e+00> : vector<1024xf32>
    %127 = vector.multi_reduction <add>, %124, %cst_50 [0] : vector<8x1024xf32> to vector<1024xf32>
    %128 = vector.shape_cast %127 : vector<1024xf32> to vector<1x1024xf32>
    %cst_51 = arith.constant 8.000000e+00 : f32
    %129 = vector.broadcast %cst_51 : f32 to vector<1x1024xf32>
    %130 = arith.divf %128, %129 : vector<1x1024xf32>
    %131 = vector.broadcast %130 : vector<1x1024xf32> to vector<8x1024xf32>
    %132 = arith.subf %124, %131 : vector<8x1024xf32>
    %133 = arith.mulf %132, %132 : vector<8x1024xf32>
    %cst_52 = arith.constant dense<0.000000e+00> : vector<1024xf32>
    %134 = vector.multi_reduction <add>, %133, %cst_52 [0] : vector<8x1024xf32> to vector<1024xf32>
    %135 = vector.shape_cast %134 : vector<1024xf32> to vector<1x1024xf32>
    %cst_53 = arith.constant 8.000000e+00 : f32
    %136 = vector.broadcast %cst_53 : f32 to vector<1x1024xf32>
    %137 = arith.divf %135, %136 : vector<1x1024xf32>
    %cst_54 = arith.constant 9.99999974E-6 : f32
    %138 = vector.broadcast %cst_54 : f32 to vector<1x1024xf32>
    %139 = arith.addf %137, %138 : vector<1x1024xf32>
    %140 = math.rsqrt %139 : vector<1x1024xf32>
    %141 = vector.broadcast %140 : vector<1x1024xf32> to vector<8x1024xf32>
    %142 = arith.mulf %132, %141 : vector<8x1024xf32>
    %143 = vector.broadcast %125 : vector<1x1024xf32> to vector<8x1024xf32>
    %144 = arith.mulf %142, %143 : vector<8x1024xf32>
    %145 = vector.broadcast %126 : vector<1x1024xf32> to vector<8x1024xf32>
    %146 = arith.addf %144, %145 : vector<8x1024xf32>
    %cst_55 = arith.constant 5.000000e-01 : f32
    %147 = vector.broadcast %cst_55 : f32 to vector<8x1024xf32>
    %148 = arith.mulf %147, %146 : vector<8x1024xf32>
    %cst_56 = arith.constant 0.707106769 : f32
    %149 = vector.broadcast %cst_56 : f32 to vector<8x1024xf32>
    %150 = arith.mulf %146, %149 : vector<8x1024xf32>
    %151 = math.erf %150 : vector<8x1024xf32>
    %cst_57 = arith.constant 1.000000e+00 : f32
    %152 = vector.broadcast %cst_57 : f32 to vector<8x1024xf32>
    %153 = arith.addf %152, %151 : vector<8x1024xf32>
    %154 = arith.mulf %148, %153 : vector<8x1024xf32>
    %c1_i32_58 = arith.constant 1 : i32
    %155 = tpu.memref_slice %arg10[%c1_i32_58] : memref<2x!tpu.dma_semaphore, #tpu.memory_space<semaphore_mem>> -> memref<1x!tpu.dma_semaphore, #tpu.memory_space<semaphore_mem>>
    %156 = tpu.memref_squeeze %155 : memref<1x!tpu.dma_semaphore, #tpu.memory_space<semaphore_mem>> -> memref<!tpu.dma_semaphore, #tpu.memory_space<semaphore_mem>>
    tpu.wait_dma2 semaphore(%156 : memref<!tpu.dma_semaphore, #tpu.memory_space<semaphore_mem>>) src(%arg5 : memref<1024x896xi8, #tpu.memory_space<any>>) dst(%arg9 : memref<1024x896xi8, #tpu.memory_space<vmem>>)
    %c0_59 = arith.constant 0 : index
    %c0_60 = arith.constant 0 : index
    %157 = vector.load %arg9[%c0_59, %c0_60] : memref<1024x896xi8, #tpu.memory_space<vmem>>, vector<1024x896xi8>
    %158 = arith.sitofp %157 : vector<1024x896xi8> to vector<1024x896xbf16>
    %159 = arith.truncf %154 : vector<8x1024xf32> to vector<8x1024xbf16>
    %cst_61 = arith.constant dense<0.000000e+00> : vector<8x896xf32>
    %160 = tpu.matmul %159, %158, %cst_61 {dimension_numbers = #tpu.dot_dimension_numbers<[1], [0], [0], [1], [0, 0, 1, 1], [], []>} : vector<8x1024xbf16>, vector<1024x896xbf16>, vector<8x896xf32> -> vector<8x896xf32>
    %c0_62 = arith.constant 0 : index
    %c6656 = arith.constant 6656 : index
    %161 = vector.load %arg6[%c0_62, %c6656] : memref<1x7552xf32, #tpu.memory_space<vmem>>, vector<1x896xf32>
    %162 = vector.broadcast %161 : vector<1x896xf32> to vector<8x896xf32>
    %163 = arith.mulf %160, %162 : vector<8x896xf32>
    %c0_63 = arith.constant 0 : index
    %c5760 = arith.constant 5760 : index
    %164 = vector.load %arg6[%c0_63, %c5760] : memref<1x7552xf32, #tpu.memory_space<vmem>>, vector<1x896xf32>
    %165 = vector.broadcast %164 : vector<1x896xf32> to vector<8x896xf32>
    %166 = arith.addf %163, %165 : vector<8x896xf32>
    %cst_64 = arith.constant 0.000000e+00 : f32
    %167 = vector.broadcast %cst_64 : f32 to vector<8x896xf32>
    %168 = arith.subf %167, %166 : vector<8x896xf32>
    %169 = math.exp %168 : vector<8x896xf32>
    %cst_65 = arith.constant 1.000000e+00 : f32
    %170 = vector.broadcast %cst_65 : f32 to vector<8x896xf32>
    %171 = arith.addf %170, %169 : vector<8x896xf32>
    %cst_66 = arith.constant 1.000000e+00 : f32
    %172 = vector.broadcast %cst_66 : f32 to vector<8x896xf32>
    %173 = arith.divf %172, %171 : vector<8x896xf32>
    %c0_67 = arith.constant 0 : index
    %c0_68 = arith.constant 0 : index
    %174 = vector.load %arg7[%c0_67, %c0_68] : memref<8x896xf32, #tpu.memory_space<vmem>>, vector<8x896xf32>
    tpu.vector_store %arg7[%c0_67, %c0_68], %173 {strides = array<i32>} : memref<8x896xf32, #tpu.memory_space<vmem>>, vector<8x896xf32>,
    return
  }
}

</mosaic_0001>

<bundles_post_ra>
// kernel: generator_forward.1
= control target key start
LH: loop header
LB: loop body
LE: loop exit
PB: predicated region body
PF: predicated region fallthrough
CT: control target
= control target key end

     0   :  { %12 = vsyncpa [#allocation6], 0  ;;  %s4109_s0 = inlined_call_operand.vmem [shape: f32[8,128], index: 0, kind: input, shape index: {}]   ;;  %s4110_s1 = inlined_call_operand.hbm [shape: s8[128,128], index: 1, kind: input, shape index: {}]   ;;  %s4111_s2 = inlined_call_operand.hbm [shape: s8[128,256], index: 2, kind: input, shape index: {}]   ;;  %s4112_s3 = inlined_call_operand.hbm [shape: s8[256,512], index: 3, kind: input, shape index: {}]   ;;  %s4113_s4 = inlined_call_operand.hbm [shape: s8[512,1024], index: 4, kind: input, shape index: {}]   ;;  %s4114_s5 = inlined_call_operand.hbm [shape: s8[1024,896], index: 5, kind: input, shape index: {}]   ;;  %s4115_s6 = inlined_call_operand.hbm [shape: f32[1,7552], index: 6, kind: input, shape index: {}]   ;;  %s4116_s7 = inlined_call_operand.vmem [shape: f32[8,896], index: 7, kind: output, shape index: {}]  }
   0x1   :  { %13 = vsyncpa [#allocation8], 0 }
   0x2   :  { %14 = vsyncpa [#allocation11], 0  ;;  %s3686_s24 = smov [#allocation7]   ;;  %s3544_s28 = scalar_lea.hbm %s4111_s2, 1024 }
   0x3   :  { %s34_s25 = sshll.u32 %s3686_s24, 4  ;;  %p3545_p0 = scmp.ne.s32.totalorder %s4111_s2, %s3544_s28  ;;  %s35_s25 = int_to_ptr.vmem [resolvable:$true] %s34_s25 }
   0x4   :  { %p3548_p1 = scmp.lt.u32.totalorder %s3544_s28, %s4111_s2 }
   0x6   :  { %p3550_p2 = pnand %p3548_p1, %p3545_p0 }
   0x8   :  { %3553 = shalt.err (!%p3550_p2)
}
   0x9   :  { %s3554_s10 = scalar_lea.vmem %s35_s25, 1024  ;;  %p3559_p4 = scmp.lt.s32.totalorder %s35_s25, %s35_s25 }
   0xa   :  { %p3555_p3 = scmp.ne.s32.totalorder %s35_s25, %s3554_s10  ;;  %p3560_p5 = scmp.lt.s32.totalorder %s3554_s10, %s3554_s10 }
   0xc   :  { %p3561_p6 = por %p3560_p5, %p3559_p4 }
   0xe   :  { %p3562_p7 = pnand %p3561_p6, %p3555_p3 }
  0x10   :  { %3565 = shalt.err (!%p3562_p7)
}
  0x11   :  { %s3687_s11 = smov 256   ;;  %s3688_s12 = smov 16  }
  0x12   :  { %40 = dma.hbm_to_vmem [thread:$0]  %s4111_s2, 1024, %s35_s25, [#allocation8], %s3687_s11, %s3687_s11, %s3688_s12  }
  0x13   :  { %s3689_s15 = smov [#allocation5]   ;;  %s3566_s19 = scalar_lea.hbm %s4110_s1, 512 }
  0x14   :  { %s22_s16 = sshll.u32 %s3689_s15, 4  ;;  %p3567_p8 = scmp.ne.s32.totalorder %s4110_s1, %s3566_s19  ;;  %s23_s16 = int_to_ptr.vmem [resolvable:$true] %s22_s16 }
  0x15   :  { %p3570_p9 = scmp.lt.u32.totalorder %s3566_s19, %s4110_s1 }
  0x17   :  { %p3572_p10 = pnand %p3570_p9, %p3567_p8 }
  0x19   :  { %3575 = shalt.err (!%p3572_p10)
}
  0x1a   :  { %s3576_s24 = scalar_lea.vmem %s23_s16, 512  ;;  %p3581_p12 = scmp.lt.s32.totalorder %s23_s16, %s23_s16 }
  0x1b   :  { %p3577_p11 = scmp.ne.s32.totalorder %s23_s16, %s3576_s24  ;;  %p3582_p13 = scmp.lt.s32.totalorder %s3576_s24, %s3576_s24 }
  0x1d   :  { %p3583_p0 = por %p3582_p13, %p3581_p12 }
  0x1f   :  { %p3584_p1 = pnand %p3583_p0, %p3577_p11 }
  0x21   :  { %3587 = shalt.err (!%p3584_p1)
}
  0x22   :  { %s3690_s2 = smov 128   ;;  %s3691_s25 = smov 8  }
  0x23   :  { %28 = dma.hbm_to_vmem [thread:$0]  %s4110_s1, 512, %s23_s16, [#allocation6], %s3690_s2, %s3690_s2, %s3691_s25  }
  0x24   :  { %s3692_s28 = smov [#allocation9]   ;;  %s3588_s9 = scalar_lea.hbm %s4112_s3, 4096 }
  0x25   :  { %s46_s29 = sshll.u32 %s3692_s28, 4  ;;  %p3589_p2 = scmp.ne.s32.totalorder %s4112_s3, %s3588_s9  ;;  %s47_s29 = int_to_ptr.vmem [resolvable:$true] %s46_s29 }
  0x26   :  { %p3592_p3 = scmp.lt.u32.totalorder %s3588_s9, %s4112_s3 }
  0x28   :  { %p3594_p4 = pnand %p3592_p3, %p3589_p2 }
  0x2a   :  { %3597 = shalt.err (!%p3594_p4)
}
  0x2b   :  { %s3598_s14 = scalar_lea.vmem %s47_s29, 4096  ;;  %p3603_p6 = scmp.lt.s32.totalorder %s47_s29, %s47_s29 }
  0x2c   :  { %p3599_p5 = scmp.ne.s32.totalorder %s47_s29, %s3598_s14  ;;  %p3604_p7 = scmp.lt.s32.totalorder %s3598_s14, %s3598_s14 }
  0x2e   :  { %p3605_p8 = por %p3604_p7, %p3603_p6 }
  0x30   :  { %p3606_p9 = pnand %p3605_p8, %p3599_p5 }
  0x32   :  { %3609 = shalt.err (!%p3606_p9)
}
  0x33   :  { %s3693_s1 = smov 512   ;;  %s3694_s15 = smov 32  }
  0x34   :  { %52 = dma.hbm_to_vmem [thread:$0]  %s4112_s3, 4096, %s47_s29, [#allocation8], %s3693_s1, %s3693_s1, %s3694_s15  }
  0x35   :  { %s3695_s18 = smov [#allocation10]   ;;  %s3610_s22 = scalar_lea.hbm %s4115_s6, 944 }
  0x36   :  { %s59_s19 = sshll.u32 %s3695_s18, 4  ;;  %p3611_p10 = scmp.ne.s32.totalorder %s4115_s6, %s3610_s22  ;;  %s60_s19 = int_to_ptr.vmem [resolvable:$true] %s59_s19 }
  0x37   :  { %p3614_p11 = scmp.lt.u32.totalorder %s3610_s22, %s4115_s6 }
  0x39   :  { %p3616_p12 = pnand %p3614_p11, %p3611_p10 }
  0x3b   :  { %3619 = shalt.err (!%p3616_p12)
}
  0x3c   :  { %s3620_s26 = scalar_lea.vmem %s60_s19, 944  ;;  %s3624_s3 = scalar_lea.vmem %s60_s19, 960 }
  0x3d   :  { %p3621_p13 = scmp.ne.s32.totalorder %s60_s19, %s3620_s26  ;;  %p3625_p0 = scmp.lt.s32.totalorder %s60_s19, %s60_s19 }
  0x3e   :  { %p3626_p1 = scmp.lt.s32.totalorder %s3624_s3, %s3620_s26 }
  0x40   :  { %p3627_p2 = por %p3626_p1, %p3625_p0 }
  0x42   :  { %p3628_p3 = pnand %p3627_p2, %p3621_p13 }
  0x44   :  { %3631 = shalt.err (!%p3628_p3)
}
  0x45   :  { %62 = dma.hbm_to_vmem [thread:$0]  %s4115_s6, 944, %s60_s19, [#allocation11]  }
  0x46   :  { %3676 = dma.done.wait [#allocation6], 512  }
  0x47   :  { %3677 = vsyncadd [#allocation6], 4294966784 }
  0x48   :  { %3678 = dma.done.wait [#allocation8], 5120  }
  0x49   :  { %3679 = vsyncadd [#allocation8], 4294962176 }
  0x4a   :  { %3680 = dma.done.wait [#allocation11], 944  }
  0x4b   :  { %3681 = vsyncadd [#allocation11], 4294966352  ;;  %v3696_v0 = vmov 0.0   ;;  %vm3697_vm0 = vmmov 0   ;;  %v100_v1 = vld [vmem:[#allocation5] sm:$0xff]  ;;  %v101_v4 = vld [vmem:[#allocation5 + $0x8] sm:$0xff] }
  0x4c   :  { %3369 = vmatprep.subr.bf16.mxu0 %v3696_v0  ;;  %3385 = vmatprep.mubr.msk.bf16.mxu0 %vm3697_vm0, %v3696_v0  ;;  %v104_v2 = vunpack.c.l.s8.bf16 %v100_v1  ;;  %v105_v3 = vunpack.c.h.s8.bf16 %v100_v1  ;;  %v106_v5 = vunpack.c.l.s8.bf16 %v101_v4  ;;  %v107_v6 = vunpack.c.h.s8.bf16 %v101_v4  ;;  %v102_v7 = vld [vmem:[#allocation5 + $0x10] sm:$0xff]  ;;  %v103_v10 = vld [vmem:[#allocation5 + $0x18] sm:$0xff]  ;;  %v99_v13 = vld [vmem:[%s4109_s0] sm:$0xff]  ;;  %s3699_s0 = smov [#allocation2]   ;;  %s3700_s8 = smov [#allocation3]  }
  0x4d   :  { %v108_v8 = vunpack.c.l.s8.bf16 %v102_v7  ;;  %v109_v9 = vunpack.c.h.s8.bf16 %v102_v7  ;;  %v110_v11 = vunpack.c.l.s8.bf16 %v103_v10  ;;  %v111_v12 = vunpack.c.h.s8.bf16 %v103_v10  ;;  %v203_v15 = vld [vmem:[#allocation7 + $0x8] sm:$0xff]  ;;  %v202_v17 = vld [vmem:[#allocation7] sm:$0xff]  ;;  %v205_v21 = vld [vmem:[#allocation7 + $0x18] sm:$0xff]  ;;  %s83_s30 = sshll.u32 %s3699_s0, 4  ;;  %s95_s9 = sshll.u32 %s3700_s8, 4  ;;  %s84_s30 = int_to_ptr.vmem [resolvable:$true] %s83_s30  ;;  %s96_s9 = int_to_ptr.vmem [resolvable:$true] %s95_s9 }
  0x4e   :  { %3370 = vmatpush3.bf16.msra.mxu0 %v104_v2  ;;  %v112_v14 = vpack.c.bf16 %v99_v13, %v99_v13  ;;  %v211_v16 = vunpack.c.l.s8.bf16 %v203_v15  ;;  %v210_v18 = vunpack.c.l.s8.bf16 %v202_v17  ;;  %v213_v19 = vunpack.c.h.s8.bf16 %v203_v15  ;;  %v204_v23 = vld [vmem:[#allocation7 + $0x10] sm:$0xff]  ;;  %v207_v27 = vld [vmem:[#allocation7 + $0x28] sm:$0xff]  ;;  %v206_v29 = vld [vmem:[#allocation7 + $0x20] sm:$0xff]  ;;  %s3632_s12 = scalar_lea.hbm %s4113_s4, 16384 }
  0x4f   :  { %3371 = vmatprep.subr.bf16.mxu0 %v3696_v0  ;;  %v212_v20 = vunpack.c.h.s8.bf16 %v202_v17  ;;  %v215_v22 = vunpack.c.l.s8.bf16 %v205_v21  ;;  %v214_v24 = vunpack.c.l.s8.bf16 %v204_v23  ;;  %v217_v25 = vunpack.c.h.s8.bf16 %v205_v21  ;;  %v209_v33 = vld [vmem:[#allocation7 + $0x38] sm:$0xff]  ;;  %v208_v36 = vld [vmem:[#allocation7 + $0x30] sm:$0xff]  ;;  %v3267_v40 = vld [vmem:[#allocation10 + $0x2] ss:$0 sm:$0xff]  ;;  %p3633_p4 = scmp.ne.s32.totalorder %s4113_s4, %s3632_s12  ;;  %p3636_p5 = scmp.lt.u32.totalorder %s3632_s12, %s4113_s4 }
  0x50   :  { %227 = vmatprep.subr.bf16.mxu1 %v211_v16  ;;  %v216_v26 = vunpack.c.h.s8.bf16 %v204_v23  ;;  %v219_v28 = vunpack.c.l.s8.bf16 %v207_v27  ;;  %v3698_v30 = vmov 0   ;;  %v218_v31 = vunpack.c.l.s8.bf16 %v206_v29  ;;  %v3269_v2 = vld [vmem:[#allocation10 + $0x1] ss:$0 sm:$0xff]  ;;  %v363_v17 = vld [vmem:[#allocation9 + $0x28] sm:$0xff] }
  0x51   :  { %228 = vmatpush1.bf16.msra.mxu1 %v210_v18  ;;  %259 = vmatprep.mubr.bf16.mxu1 %v3698_v30  ;;  %v221_v32 = vunpack.c.h.s8.bf16 %v207_v27  ;;  %v220_v34 = vunpack.c.h.s8.bf16 %v206_v29  ;;  %v223_v35 = vunpack.c.l.s8.bf16 %v209_v33  ;;  %v222_v37 = vunpack.c.l.s8.bf16 %v208_v36  ;;  %v358_v13 = vld [vmem:[#allocation9] sm:$0xff]  ;;  %v367_v23 = vld [vmem:[#allocation9 + $0x48] sm:$0xff]  ;;  %p3638_p6 = pnand %p3636_p5, %p3633_p4 }
  0x52   :  { %3372 = vmatpush3.bf16.msra.mxu0 %v105_v3  ;;  %229 = vmatprep.subr.bf16.mxu1 %v213_v19  ;;  %v225_v38 = vunpack.c.h.s8.bf16 %v209_v33  ;;  %v224_v39 = vunpack.c.h.s8.bf16 %v208_v36  ;;  %v394_v16 = vunpack.c.h.s8.bf16 %v358_v13  ;;  %v399_v18 = vunpack.c.l.s8.bf16 %v363_v17  ;;  %v362_v19 = vld [vmem:[#allocation9 + $0x20] sm:$0xff]  ;;  %v371_v29 = vld [vmem:[#allocation9 + $0x68] sm:$0xff] }
  0x53   :  { %3373 = vmatprep.subr.bf16.mxu0 %v3696_v0  ;;  %v403_v21 = vunpack.c.h.s8.bf16 %v363_v17  ;;  %v411_v27 = vunpack.c.h.s8.bf16 %v367_v23  ;;  %v415_v30 = vunpack.c.l.s8.bf16 %v371_v29  ;;  %v419_v33 = vunpack.c.h.s8.bf16 %v371_v29 }
  0x55   :  { %230 = vmatpush1.bf16.msra.mxu1 %v212_v20  ;;  %v398_v20 = vunpack.c.l.s8.bf16 %v362_v19 }
  0x56   :  { %3374 = vmatpush3.bf16.msra.mxu0 %v106_v5  ;;  %231 = vmatprep.subr.bf16.mxu1 %v215_v22  ;;  %v402_v22 = vunpack.c.h.s8.bf16 %v362_v19 }
  0x57   :  { %3375 = vmatprep.subr.bf16.mxu0 %v3696_v0 }
  0x59   :  { %232 = vmatpush1.bf16.msra.mxu1 %v214_v24  ;;  %v407_v24 = vunpack.c.l.s8.bf16 %v367_v23 }
  0x5a   :  { %3376 = vmatpush3.bf16.msra.mxu0 %v107_v6  ;;  %233 = vmatprep.subr.bf16.mxu1 %v217_v25  ;;  %v366_v25 = vld [vmem:[#allocation9 + $0x40] sm:$0xff] }
  0x5b   :  { %3377 = vmatprep.subr.bf16.mxu0 %v3696_v0 }
  0x5d   :  { %234 = vmatpush1.bf16.msra.mxu1 %v216_v26  ;;  %v406_v26 = vunpack.c.l.s8.bf16 %v366_v25 }
  0x5e   :  { %3378 = vmatpush3.bf16.msra.mxu0 %v108_v8  ;;  %235 = vmatprep.subr.bf16.mxu1 %v219_v28  ;;  %v410_v28 = vunpack.c.h.s8.bf16 %v366_v25 }
  0x5f   :  { %3379 = vmatprep.subr.bf16.mxu0 %v3696_v0 }
  0x61   :  { %236 = vmatpush1.bf16.msra.mxu1 %v218_v31  ;;  %v370_v31 = vld [vmem:[#allocation9 + $0x60] sm:$0xff] }
  0x62   :  { %3380 = vmatpush3.bf16.msra.mxu0 %v109_v9  ;;  %237 = vmatprep.subr.bf16.mxu1 %v221_v32  ;;  %v414_v32 = vunpack.c.l.s8.bf16 %v370_v31 }
  0x63   :  { %3381 = vmatprep.subr.bf16.mxu0 %v3696_v0 }
  0x65   :  { %238 = vmatpush1.bf16.msra.mxu1 %v220_v34  ;;  %v418_v34 = vunpack.c.h.s8.bf16 %v370_v31 }
  0x66   :  { %3382 = vmatpush3.bf16.msra.mxu0 %v110_v11  ;;  %239 = vmatprep.subr.bf16.mxu1 %v223_v35  ;;  %v359_v11 = vld [vmem:[#allocation9 + $0x8] sm:$0xff] }
  0x67   :  { %3383 = vmatprep.subr.bf16.mxu0 %v3696_v0  ;;  %v3268_v0 = vld [vmem:[#allocation10] ss:$0 sm:$0xff]  ;;  %v395_v15 = vunpack.c.h.s8.bf16 %v359_v11  ;;  %v375_v35 = vld [vmem:[#allocation9 + $0x88] sm:$0xff] }
  0x68   :  { %v423_v36 = vunpack.c.l.s8.bf16 %v375_v35 }
  0x69   :  { %240 = vmatpush1.bf16.msra.mxu1 %v222_v37  ;;  %v374_v37 = vld [vmem:[#allocation9 + $0x80] sm:$0xff] }
  0x6a   :  { %3384 = vmatpush3.bf16.msra.mxu0 %v111_v12  ;;  %241 = vmatprep.subr.bf16.mxu1 %v225_v38  ;;  %v391_v12 = vunpack.c.l.s8.bf16 %v359_v11  ;;  %v422_v38 = vunpack.c.l.s8.bf16 %v374_v37 }
  0x6d   :  { %3386 = vmatmul.mubr.bf16.vlgmr.msra.gmra.mrb[0].mxu0 %v112_v14  ;;  %242 = vmatpush1.bf16.msra.mxu1 %v224_v39  ;;  %v390_v14 = vunpack.c.l.s8.bf16 %v358_v13  ;;  %v427_v39 = vunpack.c.h.s8.bf16 %v375_v35 }
  0x6e   :  { %456 = vmatprep.subr.bf16.mxu1 %v391_v12 }
 0x140   :  { %v147_v41 = vpop.f32.mrb[0].mxu0 }
 0x141   :  { %v160_v42 = vmul.f32 %v3267_v40, %v147_v41  ;;  %v3387_v43 = vpop.f32.mrb[1].mxu0  ;;  %v426_v40 = vunpack.c.h.s8.bf16 %v374_v37  ;;  %v379_v41 = vld [vmem:[#allocation9 + $0xa8] sm:$0xff] }
 0x142   :  { %v150_v44 = vpop.f32.mrb[2].mxu0  ;;  %v378_v43 = vld [vmem:[#allocation9 + $0xa0] sm:$0xff] }
 0x143   :  { %v163_v45 = vrot.slane %v160_v42, 4  ;;  %v3388_v46 = vpop.f32.mrb[3].mxu0  ;;  %v430_v44 = vunpack.c.l.s8.bf16 %v378_v43 }
 0x144   :  { %v434_v46 = vunpack.c.h.s8.bf16 %v378_v43 }
 0x145   :  { %v164_v47 = vadd.f32 %v163_v45, %v160_v42  ;;  %v435_v45 = vunpack.c.h.s8.bf16 %v379_v41 }
 0x147   :  { %v165_v48 = vrot.slane %v164_v47, 2 }
 0x149   :  { %v166_v49 = vadd.f32 %v165_v48, %v164_v47  ;;  %v383_v47 = vld [vmem:[#allocation9 + $0xc8] sm:$0xff]  ;;  %v382_v48 = vld [vmem:[#allocation9 + $0xc0] sm:$0xff] }
 0x14b   :  { %v167_v50 = vrot.slane %v166_v49, 1 }
 0x14d   :  { %v168_v51 = vadd.f32 %v167_v50, %v166_v49  ;;  %v439_v49 = vunpack.c.l.s8.bf16 %v383_v47  ;;  %v438_v50 = vunpack.c.l.s8.bf16 %v382_v48 }
 0x14f   :  { %v170_v52 = vmul.f32 0.125, %v168_v51  ;;  %v443_v51 = vunpack.c.h.s8.bf16 %v383_v47 }
 0x151   :  { %v171_v53 = vsub.f32 %v160_v42, %v170_v52  ;;  %v431_v42 = vunpack.c.l.s8.bf16 %v379_v41  ;;  %v387_v52 = vld [vmem:[#allocation9 + $0xe8] sm:$0xff] }
 0x153   :  { %v172_v54 = vmul.f32 %v171_v53, %v171_v53 }
 0x155   :  { %v173_v55 = vrot.slane %v172_v54, 4 }
 0x157   :  { %v174_v56 = vadd.f32 %v173_v55, %v172_v54  ;;  %v447_v54 = vunpack.c.l.s8.bf16 %v387_v52  ;;  %v386_v55 = vld [vmem:[#allocation9 + $0xe0] sm:$0xff] }
 0x159   :  { %v175_v57 = vrot.slane %v174_v56, 2 }
 0x15b   :  { %v176_v58 = vadd.f32 %v175_v57, %v174_v56  ;;  %v446_v56 = vunpack.c.l.s8.bf16 %v386_v55  ;;  %v451_v57 = vunpack.c.h.s8.bf16 %v387_v52 }
 0x15d   :  { %v177_v59 = vrot.slane %v176_v58, 1 }
 0x15f   :  { %v178_v60 = vadd.f32 %v177_v59, %v176_v58  ;;  %v450_v58 = vunpack.c.h.s8.bf16 %v386_v55  ;;  %v3792_v59 = vld [vmem:[#allocation9 + $0x18] sm:$0xff] }
 0x161   :  { %v179_v61 = vmul.f32 0.125, %v178_v60  ;;  %v393_v60 = vunpack.c.l.s8.bf16 %v3792_v59 }
 0x163   :  { %v180_v62 = vadd.f32 1e-05, %v179_v61  ;;  %v270_v61 = vlaneseq }
 0x165   :  { %3456 = vrsqrt.f32 %v180_v62  ;;  %v3795_v62 = vshrl.u32 %v270_v61, 7 }
 0x16f   :  { %v3457_v63 = vpop.eup %3456 }
 0x170   :  { %v182_v1 = vmul.f32 %v3457_v63, %v171_v53  ;;  %v442_v53 = vunpack.c.h.s8.bf16 %v382_v48  ;;  %v3798_v63 = vsub.s32 0, %v3795_v62 }
 0x172   :  { %v189_v3 = vmul.f32 %v3268_v0, %v182_v1  ;;  %v268_v0 = vld [vmem:[#allocation10 + $0x7] sm:$0x3]  ;;  %v3801_v1 = vsub.s32 1, %v3795_v62 }
 0x174   :  { %v196_v4 = vadd.f32 %v3269_v2, %v189_v3  ;;  %v273_v2 = vrot.slane %v268_v0, %v3798_v63  ;;  %v277_v3 = vrot.slane %v268_v0, %v3801_v1 }
 0x176   :  { %v198_v5 = vmul.f32 0.70710677, %v196_v4  ;;  %v197_v7 = vmul.f32 0.5, %v196_v4 }
 0x178   :  { %3458 = verf.f32 %v198_v5 }
 0x182   :  { %v3459_v6 = vpop.eup %3458 }
 0x183   :  { %v200_v8 = vadd.f32 1.0, %v3459_v6 }
 0x185   :  { %v201_v9 = vmul.f32 %v200_v8, %v197_v7 }
 0x187   :  { %v226_v10 = vpack.c.bf16 %v201_v9, %v201_v9 }
 0x189   :  { %260 = vmatmul.mubr.bf16.vlgmr.msra.gmra.mrb[0].mxu1 %v226_v10 }
 0x18a   :  { %457 = vmatpush1.bf16.msra.mxu1 %v390_v14 }
 0x18b   :  { %458 = vmatprep.subr.bf16.mxu1 %v395_v15 }
 0x18e   :  { %459 = vmatpush1.bf16.msra.mxu1 %v394_v16 }
 0x18f   :  { %460 = vmatprep.subr.bf16.mxu1 %v399_v18 }
 0x192   :  { %461 = vmatpush1.bf16.msra.mxu1 %v398_v20 }
 0x193   :  { %462 = vmatprep.subr.bf16.mxu1 %v403_v21 }
 0x196   :  { %463 = vmatpush1.bf16.msra.mxu1 %v402_v22 }
 0x197   :  { %464 = vmatprep.subr.bf16.mxu1 %v407_v24 }
 0x19a   :  { %465 = vmatpush1.bf16.msra.mxu1 %v406_v26 }
 0x19b   :  { %466 = vmatprep.subr.bf16.mxu1 %v411_v27 }
 0x19e   :  { %467 = vmatpush1.bf16.msra.mxu1 %v410_v28 }
 0x19f   :  { %468 = vmatprep.subr.bf16.mxu1 %v415_v30 }
 0x1a2   :  { %469 = vmatpush1.bf16.msra.mxu1 %v414_v32 }
 0x1a3   :  { %470 = vmatprep.subr.bf16.mxu1 %v419_v33 }
 0x1a6   :  { %471 = vmatpush1.bf16.msra.mxu1 %v418_v34 }
 0x1a7   :  { %472 = vmatprep.subr.bf16.mxu1 %v423_v36 }
 0x1aa   :  { %473 = vmatpush1.bf16.msra.mxu1 %v422_v38 }
 0x1ab   :  { %474 = vmatprep.subr.bf16.mxu1 %v427_v39 }
 0x1ae   :  { %475 = vmatpush1.bf16.msra.mxu1 %v426_v40 }
 0x1af   :  { %476 = vmatprep.subr.bf16.mxu1 %v431_v42 }
 0x1b2   :  { %477 = vmatpush1.bf16.msra.mxu1 %v430_v44  ;;  %v282_v44 = vld [vmem:[#allocation10 + $0x3] sm:$0x3] }
 0x1b3   :  { %478 = vmatprep.subr.bf16.mxu1 %v435_v45  ;;  %v283_v45 = vld [vmem:[#allocation10 + $0x5] sm:$0x3]  ;;  %v330_v48 = vrot.slane %v282_v44, %v3801_v1 }
 0x1b6   :  { %479 = vmatpush1.bf16.msra.mxu1 %v434_v46  ;;  %v326_v46 = vrot.slane %v282_v44, %v3798_v63 }
 0x1b7   :  { %480 = vmatprep.subr.bf16.mxu1 %v439_v49 }
 0x1ba   :  { %481 = vmatpush1.bf16.msra.mxu1 %v438_v50 }
 0x1bb   :  { %482 = vmatprep.subr.bf16.mxu1 %v443_v51  ;;  %v339_v51 = vrot.slane %v283_v45, %v3798_v63 }
 0x1be   :  { %483 = vmatpush1.bf16.msra.mxu1 %v442_v53  ;;  %v343_v53 = vrot.slane %v283_v45, %v3801_v1  ;;  %v384_v45 = vld [vmem:[#allocation9 + $0xd0] sm:$0xff] }
 0x1bf   :  { %484 = vmatprep.subr.bf16.mxu1 %v447_v54 }
 0x1c2   :  { %485 = vmatpush1.bf16.msra.mxu1 %v446_v56 }
 0x1c3   :  { %486 = vmatprep.subr.bf16.mxu1 %v451_v57 }
 0x1c6   :  { %487 = vmatpush1.bf16.msra.mxu1 %v450_v58 }
 0x1c7   :  { %497 = vmatprep.subr.bf16.mxu1 %v393_v60 }
 0x25c   :  { %v261_v4 = vpop.f32.mrb[0].mxu1 }
 0x25d   :  { %v280_v5 = vmul.f32 %v273_v2, %v261_v4  ;;  %v263_v6 = vpop.f32.mrb[1].mxu1 }
 0x25e   :  { %v281_v7 = vmul.f32 %v277_v3, %v263_v6  ;;  %v265_v8 = vpop.f32.mrb[2].mxu1 }
 0x25f   :  { %v284_v9 = vrot.slane %v280_v5, 4  ;;  %v266_v10 = vpop.f32.mrb[3].mxu1 }
 0x260   :  { %v290_v11 = vrot.slane %v281_v7, 4 }
 0x261   :  { %v285_v12 = vadd.f32 %v284_v9, %v280_v5 }
 0x262   :  { %v291_v13 = vadd.f32 %v290_v11, %v281_v7 }
 0x263   :  { %v286_v14 = vrot.slane %v285_v12, 2 }
 0x264   :  { %v292_v15 = vrot.slane %v291_v13, 2 }
 0x265   :  { %v287_v16 = vadd.f32 %v286_v14, %v285_v12  ;;  %v397_v12 = vunpack.c.h.s8.bf16 %v3792_v59  ;;  %v368_v59 = vld [vmem:[#allocation9 + $0x50] sm:$0xff] }
 0x266   :  { %v293_v17 = vadd.f32 %v292_v15, %v291_v13  ;;  %v365_v13 = vld [vmem:[#allocation9 + $0x38] sm:$0xff] }
 0x267   :  { %v288_v18 = vrot.slane %v287_v16, 1  ;;  %v401_v15 = vunpack.c.l.s8.bf16 %v365_v13 }
 0x268   :  { %v294_v19 = vrot.slane %v293_v17, 1 }
 0x269   :  { %v289_v20 = vadd.f32 %v288_v18, %v287_v16  ;;  %v364_v16 = vld [vmem:[#allocation9 + $0x30] sm:$0xff]  ;;  %v405_v18 = vunpack.c.h.s8.bf16 %v365_v13 }
 0x26a   :  { %v295_v21 = vadd.f32 %v294_v19, %v293_v17  ;;  %v400_v17 = vunpack.c.l.s8.bf16 %v364_v16  ;;  %v369_v19 = vld [vmem:[#allocation9 + $0x58] sm:$0xff] }
 0x26b   :  { %v296_v22 = vmul.f32 0.125, %v289_v20  ;;  %v404_v20 = vunpack.c.h.s8.bf16 %v364_v16 }
 0x26c   :  { %v297_v23 = vmul.f32 0.125, %v295_v21  ;;  %v409_v21 = vunpack.c.l.s8.bf16 %v369_v19 }
 0x26d   :  { %v298_v24 = vsub.f32 %v280_v5, %v296_v22  ;;  %v408_v22 = vunpack.c.l.s8.bf16 %v368_v59 }
 0x26e   :  { %v299_v25 = vsub.f32 %v281_v7, %v297_v23  ;;  %v360_v7 = vld [vmem:[#allocation9 + $0x10] sm:$0xff]  ;;  %v413_v23 = vunpack.c.h.s8.bf16 %v369_v19 }
 0x26f   :  { %v300_v26 = vmul.f32 %v298_v24, %v298_v24  ;;  %v392_v10 = vunpack.c.l.s8.bf16 %v360_v7  ;;  %v396_v14 = vunpack.c.h.s8.bf16 %v360_v7 }
 0x270   :  { %v301_v27 = vmul.f32 %v299_v25, %v299_v25 }
 0x271   :  { %v302_v28 = vrot.slane %v300_v26, 4 }
 0x272   :  { %v308_v29 = vrot.slane %v301_v27, 4 }
 0x273   :  { %v303_v30 = vadd.f32 %v302_v28, %v300_v26 }
 0x274   :  { %v309_v31 = vadd.f32 %v308_v29, %v301_v27  ;;  %v372_v27 = vld [vmem:[#allocation9 + $0x70] sm:$0xff] }
 0x275   :  { %v304_v32 = vrot.slane %v303_v30, 2  ;;  %v416_v28 = vunpack.c.l.s8.bf16 %v372_v27 }
 0x276   :  { %v310_v33 = vrot.slane %v309_v31, 2 }
 0x277   :  { %v305_v34 = vadd.f32 %v304_v32, %v303_v30  ;;  %v377_v30 = vld [vmem:[#allocation9 + $0x98] sm:$0xff] }
 0x278   :  { %v311_v35 = vadd.f32 %v310_v33, %v309_v31  ;;  %v420_v31 = vunpack.c.h.s8.bf16 %v372_v27  ;;  %v425_v32 = vunpack.c.l.s8.bf16 %v377_v30  ;;  %v376_v33 = vld [vmem:[#allocation9 + $0x90] sm:$0xff] }
 0x279   :  { %v306_v36 = vrot.slane %v305_v34, 1 }
 0x27a   :  { %v312_v37 = vrot.slane %v311_v35, 1 }
 0x27b   :  { %v307_v38 = vadd.f32 %v306_v36, %v305_v34  ;;  %v424_v34 = vunpack.c.l.s8.bf16 %v376_v33  ;;  %v381_v36 = vld [vmem:[#allocation9 + $0xb8] sm:$0xff] }
 0x27c   :  { %v313_v39 = vadd.f32 %v312_v37, %v311_v35  ;;  %v429_v35 = vunpack.c.h.s8.bf16 %v377_v30  ;;  %v428_v37 = vunpack.c.h.s8.bf16 %v376_v33 }
 0x27d   :  { %v314_v40 = vmul.f32 0.125, %v307_v38  ;;  %v433_v38 = vunpack.c.l.s8.bf16 %v381_v36 }
 0x27e   :  { %v315_v41 = vmul.f32 0.125, %v313_v39  ;;  %v380_v39 = vld [vmem:[#allocation9 + $0xb0] sm:$0xff] }
 0x27f   :  { %v316_v42 = vadd.f32 1e-05, %v314_v40  ;;  %v432_v40 = vunpack.c.l.s8.bf16 %v380_v39 }
 0x280   :  { %v317_v43 = vadd.f32 1e-05, %v315_v41  ;;  %v437_v41 = vunpack.c.h.s8.bf16 %v381_v36 }
 0x281   :  { %3460 = vrsqrt.f32 %v316_v42  ;;  %v385_v42 = vld [vmem:[#allocation9 + $0xd8] sm:$0xff] }
 0x282   :  { %3462 = vrsqrt.f32 %v317_v43  ;;  %v436_v43 = vunpack.c.h.s8.bf16 %v380_v39  ;;  %v441_v44 = vunpack.c.l.s8.bf16 %v385_v42 }
 0x28b   :  { %v3461_v47 = vpop.eup %3460 }
 0x28c   :  { %v3463_v49 = vpop.eup %3462  ;;  %v320_v50 = vmul.f32 %v3461_v47, %v298_v24  ;;  %v373_v24 = vld [vmem:[#allocation9 + $0x78] sm:$0xff]  ;;  %v445_v47 = vunpack.c.h.s8.bf16 %v385_v42 }
 0x28d   :  { %v321_v52 = vmul.f32 %v3463_v49, %v299_v25  ;;  %v412_v25 = vunpack.c.h.s8.bf16 %v368_v59  ;;  %v417_v26 = vunpack.c.l.s8.bf16 %v373_v24  ;;  %v421_v29 = vunpack.c.h.s8.bf16 %v373_v24 }
 0x28e   :  { %v333_v54 = vmul.f32 %v326_v46, %v320_v50  ;;  %v440_v46 = vunpack.c.l.s8.bf16 %v384_v45  ;;  %v444_v49 = vunpack.c.h.s8.bf16 %v384_v45 }
 0x28f   :  { %v334_v55 = vmul.f32 %v330_v48, %v321_v52  ;;  %v389_v48 = vld [vmem:[#allocation9 + $0xf8] sm:$0xff] }
 0x290   :  { %v346_v56 = vadd.f32 %v339_v51, %v333_v54  ;;  %v449_v50 = vunpack.c.l.s8.bf16 %v389_v48  ;;  %v388_v51 = vld [vmem:[#allocation9 + $0xf0] sm:$0xff] }
 0x291   :  { %v347_v57 = vadd.f32 %v343_v53, %v334_v55  ;;  %v448_v52 = vunpack.c.l.s8.bf16 %v388_v51  ;;  %v453_v53 = vunpack.c.h.s8.bf16 %v389_v48  ;;  %v452_v54 = vunpack.c.h.s8.bf16 %v388_v51  ;;  %v3814_v55 = vld [vmem:[#allocation10 + $0x11] sm:$0xf] }
 0x292   :  { %v350_v58 = vmul.f32 0.70710677, %v346_v56  ;;  %v348_v2 = vmul.f32 0.5, %v346_v56  ;;  %v543_v56 = vrot.slane %v3814_v55, %v3798_v63 }
 0x293   :  { %v351_v60 = vmul.f32 0.70710677, %v347_v57  ;;  %v349_v4 = vmul.f32 0.5, %v347_v57  ;;  %v547_v57 = vrot.slane %v3814_v55, %v3801_v1 }
 0x294   :  { %3464 = verf.f32 %v350_v58 }
 0x295   :  { %3466 = verf.f32 %v351_v60 }
 0x29e   :  { %v3465_v61 = vpop.eup %3464 }
 0x29f   :  { %v3467_v0 = vpop.eup %3466  ;;  %v354_v3 = vadd.f32 1.0, %v3465_v61 }
 0x2a0   :  { %v355_v5 = vadd.f32 1.0, %v3467_v0 }
 0x2a1   :  { %v356_v6 = vmul.f32 %v354_v3, %v348_v2 }
 0x2a2   :  { %v357_v8 = vmul.f32 %v355_v5, %v349_v4 }
 0x2a3   :  { %v3809_v11 = vpack.c.bf16 %v356_v6, %v356_v6 }
 0x2a4   :  { %v455_v9 = vpack.c.bf16 %v357_v8, %v357_v8 }
 0x2a6   :  { %488 = vmatprep.mubr.bf16.mxu1 %v455_v9 }
 0x2a7   :  { %489 = vmatmul.mubr.bf16.vlgmr.msra.gmra.mrb[4].mxu1 %v3809_v11 }
 0x2a8   :  { %498 = vmatpush1.bf16.msra.mxu1 %v392_v10  ;;  %529 = vmatprep.mubr.bf16.mxu1 %v455_v9 }
 0x2a9   :  { %499 = vmatprep.subr.bf16.mxu1 %v397_v12 }
 0x2ac   :  { %500 = vmatpush1.bf16.msra.mxu1 %v396_v14 }
 0x2ad   :  { %501 = vmatprep.subr.bf16.mxu1 %v401_v15 }
 0x2b0   :  { %502 = vmatpush1.bf16.msra.mxu1 %v400_v17 }
 0x2b1   :  { %503 = vmatprep.subr.bf16.mxu1 %v405_v18 }
 0x2b4   :  { %504 = vmatpush1.bf16.msra.mxu1 %v404_v20 }
 0x2b5   :  { %505 = vmatprep.subr.bf16.mxu1 %v409_v21 }
 0x2b8   :  { %506 = vmatpush1.bf16.msra.mxu1 %v408_v22 }
 0x2b9   :  { %507 = vmatprep.subr.bf16.mxu1 %v413_v23 }
 0x2bc   :  { %508 = vmatpush1.bf16.msra.mxu1 %v412_v25 }
 0x2bd   :  { %509 = vmatprep.subr.bf16.mxu1 %v417_v26 }
 0x2c0   :  { %510 = vmatpush1.bf16.msra.mxu1 %v416_v28 }
 0x2c1   :  { %511 = vmatprep.subr.bf16.mxu1 %v421_v29 }
 0x2c4   :  { %512 = vmatpush1.bf16.msra.mxu1 %v420_v31 }
 0x2c5   :  { %513 = vmatprep.subr.bf16.mxu1 %v425_v32 }
 0x2c8   :  { %514 = vmatpush1.bf16.msra.mxu1 %v424_v34 }
 0x2c9   :  { %515 = vmatprep.subr.bf16.mxu1 %v429_v35 }
 0x2cc   :  { %516 = vmatpush1.bf16.msra.mxu1 %v428_v37 }
 0x2cd   :  { %517 = vmatprep.subr.bf16.mxu1 %v433_v38 }
 0x2d0   :  { %518 = vmatpush1.bf16.msra.mxu1 %v432_v40 }
 0x2d1   :  { %519 = vmatprep.subr.bf16.mxu1 %v437_v41 }
 0x2d4   :  { %520 = vmatpush1.bf16.msra.mxu1 %v436_v43 }
 0x2d5   :  { %521 = vmatprep.subr.bf16.mxu1 %v441_v44 }
 0x2d8   :  { %522 = vmatpush1.bf16.msra.mxu1 %v440_v46 }
 0x2d9   :  { %523 = vmatprep.subr.bf16.mxu1 %v445_v47 }
 0x2dc   :  { %524 = vmatpush1.bf16.msra.mxu1 %v444_v49 }
 0x2dd   :  { %525 = vmatprep.subr.bf16.mxu1 %v449_v50 }
 0x2e0   :  { %526 = vmatpush1.bf16.msra.mxu1 %v448_v52 }
 0x2e1   :  { %527 = vmatprep.subr.bf16.mxu1 %v453_v53 }
 0x2e4   :  { %528 = vmatpush1.bf16.msra.mxu1 %v452_v54 }
 0x2e7   :  { %530 = vmatmul.mubr.bf16.vlgmr.msra.gmra.mrb[8].mxu1 %v3809_v11 }
 0x37a   :  { %v490_v58 = vpop.f32.mrb[4].mxu1 }
 0x37b   :  { %v560_v60 = vmul.f32 %v543_v56, %v490_v58  ;;  %v492_v61 = vpop.f32.mrb[5].mxu1 }
 0x37c   :  { %v561_v0 = vmul.f32 %v547_v57, %v492_v61  ;;  %v494_v2 = vpop.f32.mrb[6].mxu1 }
 0x37d   :  { %v566_v3 = vrot.slane %v560_v60, 4  ;;  %v495_v4 = vpop.f32.mrb[7].mxu1 }
 0x37e   :  { %v572_v5 = vrot.slane %v561_v0, 4 }
 0x37f   :  { %v567_v6 = vadd.f32 %v566_v3, %v560_v60 }
 0x380   :  { %3641 = shalt.err (!%p3638_p6)  }
 0x381   :  { %s3642_s16 = scalar_lea.vmem %s84_s30, 16384  ;;  %p3647_p8 = scmp.lt.s32.totalorder %s84_s30, %s84_s30 }
 0x382   :  { %p3643_p7 = scmp.ne.s32.totalorder %s84_s30, %s3642_s16  ;;  %p3648_p9 = scmp.lt.s32.totalorder %s3642_s16, %s3642_s16 }
 0x384   :  { %p3649_p10 = por %p3648_p9, %p3647_p8 }
 0x386   :  { %p3650_p11 = pnand %p3649_p10, %p3643_p7 }
 0x388   :  { %3653 = shalt.err (!%p3650_p11)  }
 0x389   :  { %86 = dma.hbm_to_vmem [thread:$0]  %s4113_s4, 16384, %s84_s30, [#allocation4]  ;;  %v573_v7 = vadd.f32 %v572_v5, %v561_v0  ;;  %v568_v8 = vrot.slane %v567_v6, 2 }
 0x38a   :  { %s3654_s21 = scalar_lea.hbm %s4114_s5, 28672 }
 0x38b   :  { %p3655_p12 = scmp.ne.s32.totalorder %s4114_s5, %s3654_s21  ;;  %p3658_p13 = scmp.lt.u32.totalorder %s3654_s21, %s4114_s5 }
 0x38d   :  { %p3660_p0 = pnand %p3658_p13, %p3655_p12 }
 0x38f   :  { %3663 = shalt.err (!%p3660_p0)  }
 0x390   :  { %s3664_s25 = scalar_lea.vmem %s96_s9, 28672  ;;  %p3669_p2 = scmp.lt.s32.totalorder %s96_s9, %s96_s9 }
 0x391   :  { %p3665_p1 = scmp.ne.s32.totalorder %s96_s9, %s3664_s25  ;;  %p3670_p3 = scmp.lt.s32.totalorder %s3664_s25, %s3664_s25 }
 0x393   :  { %p3671_p4 = por %p3670_p3, %p3669_p2 }
 0x395   :  { %p3672_p5 = pnand %p3671_p4, %p3665_p1 }
 0x397   :  { %3675 = shalt.err (!%p3672_p5)  }
 0x398   :  { %98 = dma.hbm_to_vmem [thread:$0]  %s4114_s5, 28672, %s96_s9, [#allocation4 + $0x1]  ;;  %v574_v9 = vrot.slane %v573_v7, 2  ;;  %v569_v10 = vadd.f32 %v568_v8, %v567_v6  ;;  %v3844_v37 = vld [vmem:[#allocation10 + $0x9] sm:$0xf]  ;;  %v3857_v53 = vsub.s32 2, %v3795_v62 }
 0x399   :  { %v3846_v38 = vld [vmem:[#allocation10 + $0xd] sm:$0xf]  ;;  %v646_v39 = vrot.slane %v3844_v37, %v3798_v63  ;;  %v650_v41 = vrot.slane %v3844_v37, %v3801_v1  ;;  %v3860_v54 = vsub.s32 3, %v3795_v62 }
 0x39a   :  { %v575_v11 = vadd.f32 %v574_v9, %v573_v7  ;;  %v570_v12 = vrot.slane %v569_v10, 1  ;;  %v671_v44 = vrot.slane %v3846_v38, %v3798_v63  ;;  %v675_v46 = vrot.slane %v3846_v38, %v3801_v1 }
 0x39b   :  { %v551_v56 = vrot.slane %v3814_v55, %v3857_v53  ;;  %v555_v57 = vrot.slane %v3814_v55, %v3860_v54 }
 0x39c   :  { %v576_v13 = vrot.slane %v575_v11, 1  ;;  %v571_v14 = vadd.f32 %v570_v12, %v569_v10 }
 0x39e   :  { %v577_v15 = vadd.f32 %v576_v13, %v575_v11  ;;  %v590_v16 = vmul.f32 0.125, %v571_v14 }
 0x3a0   :  { %v591_v17 = vmul.f32 0.125, %v577_v15  ;;  %v594_v18 = vsub.f32 %v560_v60, %v590_v16 }
 0x3a2   :  { %v595_v19 = vsub.f32 %v561_v0, %v591_v17  ;;  %v598_v20 = vmul.f32 %v594_v18, %v594_v18 }
 0x3a4   :  { %v599_v21 = vmul.f32 %v595_v19, %v595_v19  ;;  %v602_v59 = vrot.slane %v598_v20, 4 }
 0x3a6   :  { %v608_v22 = vrot.slane %v599_v21, 4  ;;  %v603_v23 = vadd.f32 %v602_v59, %v598_v20 }
 0x3a8   :  { %v609_v24 = vadd.f32 %v608_v22, %v599_v21  ;;  %v604_v25 = vrot.slane %v603_v23, 2 }
 0x3aa   :  { %v610_v26 = vrot.slane %v609_v24, 2  ;;  %v605_v27 = vadd.f32 %v604_v25, %v603_v23 }
 0x3ac   :  { %v611_v28 = vadd.f32 %v610_v26, %v609_v24  ;;  %v606_v29 = vrot.slane %v605_v27, 1 }
 0x3ae   :  { %v612_v30 = vrot.slane %v611_v28, 1  ;;  %v607_v31 = vadd.f32 %v606_v29, %v605_v27 }
 0x3b0   :  { %v613_v32 = vadd.f32 %v612_v30, %v611_v28  ;;  %v626_v33 = vmul.f32 0.125, %v607_v31 }
 0x3b2   :  { %v627_v34 = vmul.f32 0.125, %v613_v32  ;;  %v630_v35 = vadd.f32 1e-05, %v626_v33 }
 0x3b4   :  { %v631_v36 = vadd.f32 1e-05, %v627_v34  ;;  %3468 = vrsqrt.f32 %v630_v35 }
 0x3b6   :  { %3470 = vrsqrt.f32 %v631_v36 }
 0x3ba   :  { %v531_v58 = vpop.f32.mrb[8].mxu1 }
 0x3bb   :  { %v562_v60 = vmul.f32 %v551_v56, %v531_v58  ;;  %v533_v61 = vpop.f32.mrb[9].mxu1  ;;  %v683_v56 = vrot.slane %v3846_v38, %v3860_v54 }
 0x3bc   :  { %v563_v2 = vmul.f32 %v555_v57, %v533_v61  ;;  %v535_v3 = vpop.f32.mrb[10].mxu1 }
 0x3bd   :  { %v578_v7 = vrot.slane %v562_v60, 4  ;;  %v536_v8 = vpop.f32.mrb[11].mxu1 }
 0x3be   :  { %v3469_v40 = vpop.eup %3468  ;;  %v584_v11 = vrot.slane %v563_v2, 4 }
 0x3bf   :  { %v638_v43 = vmul.f32 %v3469_v40, %v594_v18  ;;  %v579_v13 = vadd.f32 %v578_v7, %v562_v60 }
 0x3c0   :  { %v3471_v42 = vpop.eup %3470  ;;  %v585_v15 = vadd.f32 %v584_v11, %v563_v2 }
 0x3c1   :  { %v639_v45 = vmul.f32 %v3471_v42, %v595_v19  ;;  %v663_v47 = vmul.f32 %v646_v39, %v638_v43  ;;  %v580_v55 = vrot.slane %v579_v13, 2 }
 0x3c2   :  { %v586_v16 = vrot.slane %v585_v15, 2 }
 0x3c3   :  { %v664_v48 = vmul.f32 %v650_v41, %v639_v45  ;;  %v688_v49 = vadd.f32 %v671_v44, %v663_v47  ;;  %v581_v17 = vadd.f32 %v580_v55, %v579_v13 }
 0x3c4   :  { %v587_v18 = vadd.f32 %v586_v16, %v585_v15 }
 0x3c5   :  { %v689_v50 = vadd.f32 %v675_v46, %v664_v48  ;;  %v696_v51 = vmul.f32 0.70710677, %v688_v49  ;;  %v692_v5 = vmul.f32 0.5, %v688_v49  ;;  %v582_v19 = vrot.slane %v581_v17, 1 }
 0x3c6   :  { %v588_v20 = vrot.slane %v587_v18, 1  ;;  %v654_v46 = vrot.slane %v3844_v37, %v3857_v53  ;;  %v658_v48 = vrot.slane %v3844_v37, %v3860_v54 }
 0x3c7   :  { %v697_v52 = vmul.f32 0.70710677, %v689_v50  ;;  %3472 = verf.f32 %v696_v51  ;;  %v693_v9 = vmul.f32 0.5, %v689_v50  ;;  %v583_v21 = vadd.f32 %v582_v19, %v581_v17 }
 0x3c8   :  { %v589_v59 = vadd.f32 %v588_v20, %v587_v18  ;;  %v679_v51 = vrot.slane %v3846_v38, %v3857_v53 }
 0x3c9   :  { %3474 = verf.f32 %v697_v52  ;;  %v592_v22 = vmul.f32 0.125, %v583_v21 }
 0x3ca   :  { %v593_v23 = vmul.f32 0.125, %v589_v59 }
 0x3cb   :  { %v596_v24 = vsub.f32 %v562_v60, %v592_v22 }
 0x3cc   :  { %v597_v25 = vsub.f32 %v563_v2, %v593_v23 }
 0x3cd   :  { %v600_v26 = vmul.f32 %v596_v24, %v596_v24 }
 0x3ce   :  { %v601_v27 = vmul.f32 %v597_v25, %v597_v25 }
 0x3cf   :  { %v614_v28 = vrot.slane %v600_v26, 4 }
 0x3d0   :  { %v620_v29 = vrot.slane %v601_v27, 4 }
 0x3d1   :  { %v3473_v0 = vpop.eup %3472  ;;  %v615_v30 = vadd.f32 %v614_v28, %v600_v26 }
 0x3d2   :  { %v704_v6 = vadd.f32 1.0, %v3473_v0  ;;  %v621_v31 = vadd.f32 %v620_v29, %v601_v27 }
 0x3d3   :  { %v3475_v4 = vpop.eup %3474  ;;  %v616_v32 = vrot.slane %v615_v30, 2 }
 0x3d4   :  { %v705_v10 = vadd.f32 1.0, %v3475_v4  ;;  %v3866_v12 = vmul.f32 %v704_v6, %v692_v5  ;;  %v622_v33 = vrot.slane %v621_v31, 2 }
 0x3d5   :  { %v617_v34 = vadd.f32 %v616_v32, %v615_v30 }
 0x3d6   :  { %v709_v14 = vmul.f32 %v705_v10, %v693_v9  ;;  %v623_v35 = vadd.f32 %v622_v33, %v621_v31 }
 0x3d7   :  { %v618_v36 = vrot.slane %v617_v34, 1 }
 0x3d8   :  { %v624_v39 = vrot.slane %v623_v35, 1 }
 0x3d9   :  { %v619_v40 = vadd.f32 %v618_v36, %v617_v34 }
 0x3da   :  { %v625_v41 = vadd.f32 %v624_v39, %v623_v35 }
 0x3db   :  { %v628_v42 = vmul.f32 0.125, %v619_v40 }
 0x3dc   :  { %v629_v43 = vmul.f32 0.125, %v625_v41 }
 0x3dd   :  { %v632_v44 = vadd.f32 1e-05, %v628_v42 }
 0x3de   :  { %v633_v45 = vadd.f32 1e-05, %v629_v43 }
 0x3df   :  { %3476 = vrsqrt.f32 %v632_v44 }
 0x3e0   :  { %3478 = vrsqrt.f32 %v633_v45 }
 0x3e9   :  { %v3477_v47 = vpop.eup %3476 }
 0x3ea   :  { %v3479_v49 = vpop.eup %3478  ;;  %v640_v50 = vmul.f32 %v3477_v47, %v596_v24 }
 0x3eb   :  { %v641_v52 = vmul.f32 %v3479_v49, %v597_v25 }
 0x3ec   :  { %v665_v57 = vmul.f32 %v654_v46, %v640_v50 }
 0x3ed   :  { %v666_v58 = vmul.f32 %v658_v48, %v641_v52 }
 0x3ee   :  { %v690_v60 = vadd.f32 %v679_v51, %v665_v57 }
 0x3ef   :  { %v691_v61 = vadd.f32 %v683_v56, %v666_v58 }
 0x3f0   :  { %v698_v0 = vmul.f32 0.70710677, %v690_v60  ;;  %v694_v37 = vmul.f32 0.5, %v690_v60 }
 0x3f1   :  { %v699_v2 = vmul.f32 0.70710677, %v691_v61  ;;  %v695_v6 = vmul.f32 0.5, %v691_v61 }
 0x3f2   :  { %3480 = verf.f32 %v698_v0 }
 0x3f3   :  { %3482 = verf.f32 %v699_v2 }
 0x3fc   :  { %v3481_v3 = vpop.eup %3480 }
 0x3fd   :  { %v3483_v4 = vpop.eup %3482  ;;  %v706_v5 = vadd.f32 1.0, %v3481_v3 }
 0x3fe   :  { %v707_v7 = vadd.f32 1.0, %v3483_v4 }
 0x3ff   :  { %v3876_v8 = vmul.f32 %v706_v5, %v694_v37 }
 0x400   :  { %v3878_v9 = vmul.f32 %v707_v7, %v695_v6 }
 0x401   :  { %3682 = dma.done.wait [#allocation4], 16384 }
 0x402   :  { %3683 = vsyncadd [#allocation4], 4294950912  ;;  %v3880_v38 = vpack.c.bf16 %v709_v14, %v709_v14  ;;  %v717_v10 = vld [vmem:[#allocation2 + $0x8] sm:$0xff]  ;;  %v719_v11 = vld [vmem:[#allocation2 + $0x18] sm:$0xff] }
 0x403   :  { %v716_v13 = vld [vmem:[#allocation2] sm:$0xff]  ;;  %v845_v15 = vunpack.c.l.s8.bf16 %v717_v10  ;;  %v853_v55 = vunpack.c.h.s8.bf16 %v717_v10  ;;  %v847_v16 = vunpack.c.l.s8.bf16 %v719_v11  ;;  %v855_v17 = vunpack.c.h.s8.bf16 %v719_v11  ;;  %v718_v18 = vld [vmem:[#allocation2 + $0x10] sm:$0xff]  ;;  %v725_v21 = vld [vmem:[#allocation2 + $0x48] sm:$0xff] }
 0x404   :  { %1136 = vmatprep.mubr.bf16.mxu0 %v3880_v38  ;;  %1218 = vmatprep.mubr.bf16.mxu1 %v3880_v38  ;;  %v844_v19 = vunpack.c.l.s8.bf16 %v716_v13  ;;  %v846_v20 = vunpack.c.l.s8.bf16 %v718_v18  ;;  %v727_v59 = vld [vmem:[#allocation2 + $0x58] sm:$0xff]  ;;  %v852_v14 = vunpack.c.h.s8.bf16 %v716_v13  ;;  %v854_v22 = vunpack.c.h.s8.bf16 %v718_v18  ;;  %v724_v25 = vld [vmem:[#allocation2 + $0x40] sm:$0xff]  ;;  %v726_v26 = vld [vmem:[#allocation2 + $0x50] sm:$0xff] }
 0x405   :  { %1104 = vmatprep.subr.bf16.mxu0 %v845_v15  ;;  %1186 = vmatprep.subr.bf16.mxu1 %v847_v16  ;;  %v861_v23 = vunpack.c.l.s8.bf16 %v725_v21  ;;  %v863_v24 = vunpack.c.l.s8.bf16 %v727_v59  ;;  %v860_v27 = vunpack.c.l.s8.bf16 %v724_v25  ;;  %v862_v28 = vunpack.c.l.s8.bf16 %v726_v26  ;;  %v733_v31 = vld [vmem:[#allocation2 + $0x88] sm:$0xff]  ;;  %v735_v32 = vld [vmem:[#allocation2 + $0x98] sm:$0xff]  ;;  %v732_v39 = vld [vmem:[#allocation2 + $0x80] sm:$0xff] }
 0x406   :  { %1105 = vmatpush1.bf16.msra.mxu0 %v844_v19  ;;  %1187 = vmatpush1.bf16.msra.mxu1 %v846_v20  ;;  %v869_v29 = vunpack.c.h.s8.bf16 %v725_v21  ;;  %v871_v30 = vunpack.c.h.s8.bf16 %v727_v59  ;;  %v868_v33 = vunpack.c.h.s8.bf16 %v724_v25  ;;  %v870_v34 = vunpack.c.h.s8.bf16 %v726_v26  ;;  %v734_v40 = vld [vmem:[#allocation2 + $0x90] sm:$0xff]  ;;  %v741_v45 = vld [vmem:[#allocation2 + $0xc8] sm:$0xff]  ;;  %v743_v46 = vld [vmem:[#allocation2 + $0xd8] sm:$0xff] }
 0x407   :  { %1106 = vmatprep.subr.bf16.mxu0 %v853_v55  ;;  %1188 = vmatprep.subr.bf16.mxu1 %v855_v17  ;;  %v877_v35 = vunpack.c.l.s8.bf16 %v733_v31  ;;  %v879_v36 = vunpack.c.l.s8.bf16 %v735_v32  ;;  %v876_v41 = vunpack.c.l.s8.bf16 %v732_v39  ;;  %v878_v42 = vunpack.c.l.s8.bf16 %v734_v40  ;;  %v740_v51 = vld [vmem:[#allocation2 + $0xc0] sm:$0xff]  ;;  %v742_v52 = vld [vmem:[#allocation2 + $0xd0] sm:$0xff]  ;;  %v749_v61 = vld [vmem:[#allocation2 + $0x108] sm:$0xff] }
 0x408   :  { %v885_v43 = vunpack.c.h.s8.bf16 %v733_v31  ;;  %v887_v44 = vunpack.c.h.s8.bf16 %v735_v32  ;;  %v884_v47 = vunpack.c.h.s8.bf16 %v732_v39  ;;  %v886_v48 = vunpack.c.h.s8.bf16 %v734_v40  ;;  %v751_v0 = vld [vmem:[#allocation2 + $0x118] sm:$0xff]  ;;  %v748_v5 = vld [vmem:[#allocation2 + $0x100] sm:$0xff]  ;;  %v750_v6 = vld [vmem:[#allocation2 + $0x110] sm:$0xff] }
 0x409   :  { %v893_v49 = vunpack.c.l.s8.bf16 %v741_v45  ;;  %v895_v50 = vunpack.c.l.s8.bf16 %v743_v46  ;;  %v892_v56 = vunpack.c.l.s8.bf16 %v740_v51  ;;  %v894_v57 = vunpack.c.l.s8.bf16 %v742_v52  ;;  %v757_v15 = vld [vmem:[#allocation2 + $0x148] sm:$0xff]  ;;  %v759_v55 = vld [vmem:[#allocation2 + $0x158] sm:$0xff]  ;;  %v756_v20 = vld [vmem:[#allocation2 + $0x140] sm:$0xff] }
 0x40a   :  { %1107 = vmatpush1.bf16.msra.mxu0 %v852_v14  ;;  %1189 = vmatpush1.bf16.msra.mxu1 %v854_v22  ;;  %v901_v58 = vunpack.c.h.s8.bf16 %v741_v45  ;;  %v903_v60 = vunpack.c.h.s8.bf16 %v743_v46  ;;  %v900_v2 = vunpack.c.h.s8.bf16 %v740_v51  ;;  %v902_v3 = vunpack.c.h.s8.bf16 %v742_v52  ;;  %v758_v21 = vld [vmem:[#allocation2 + $0x150] sm:$0xff]  ;;  %v767_v25 = vld [vmem:[#allocation2 + $0x198] sm:$0xff] }
 0x40b   :  { %1108 = vmatprep.subr.bf16.mxu0 %v861_v23  ;;  %1190 = vmatprep.subr.bf16.mxu1 %v863_v24  ;;  %v909_v4 = vunpack.c.l.s8.bf16 %v749_v61  ;;  %v911_v37 = vunpack.c.l.s8.bf16 %v751_v0  ;;  %v908_v7 = vunpack.c.l.s8.bf16 %v748_v5  ;;  %v910_v10 = vunpack.c.l.s8.bf16 %v750_v6  ;;  %v765_v24 = vld [vmem:[#allocation2 + $0x188] sm:$0xff]  ;;  %v766_v31 = vld [vmem:[#allocation2 + $0x190] sm:$0xff]  ;;  %v775_v39 = vld [vmem:[#allocation2 + $0x1d8] sm:$0xff] }
 0x40c   :  { %v917_v11 = vunpack.c.h.s8.bf16 %v749_v61  ;;  %v919_v13 = vunpack.c.h.s8.bf16 %v751_v0  ;;  %v916_v16 = vunpack.c.h.s8.bf16 %v748_v5  ;;  %v918_v17 = vunpack.c.h.s8.bf16 %v750_v6  ;;  %v774_v45 = vld [vmem:[#allocation2 + $0x1d0] sm:$0xff]  ;;  %v783_v51 = vld [vmem:[#allocation2 + $0x218] sm:$0xff]  ;;  %v789_v5 = vld [vmem:[#allocation2 + $0x248] sm:$0xff] }
 0x40d   :  { %v925_v18 = vunpack.c.l.s8.bf16 %v757_v15  ;;  %v927_v19 = vunpack.c.l.s8.bf16 %v759_v55  ;;  %v924_v59 = vunpack.c.l.s8.bf16 %v756_v20  ;;  %v926_v14 = vunpack.c.l.s8.bf16 %v758_v21  ;;  %v782_v61 = vld [vmem:[#allocation2 + $0x210] sm:$0xff]  ;;  %v791_v6 = vld [vmem:[#allocation2 + $0x258] sm:$0xff] }
 0x40e   :  { %1109 = vmatpush1.bf16.msra.mxu0 %v860_v27  ;;  %1191 = vmatpush1.bf16.msra.mxu1 %v862_v28  ;;  %v933_v22 = vunpack.c.h.s8.bf16 %v757_v15  ;;  %v935_v23 = vunpack.c.h.s8.bf16 %v759_v55  ;;  %v932_v26 = vunpack.c.h.s8.bf16 %v756_v20  ;;  %v934_v27 = vunpack.c.h.s8.bf16 %v758_v21  ;;  %v788_v15 = vld [vmem:[#allocation2 + $0x240] sm:$0xff]  ;;  %v790_v55 = vld [vmem:[#allocation2 + $0x250] sm:$0xff]  ;;  %v799_v20 = vld [vmem:[#allocation2 + $0x298] sm:$0xff] }
 0x40f   :  { %1110 = vmatprep.subr.bf16.mxu0 %v869_v29  ;;  %1192 = vmatprep.subr.bf16.mxu1 %v871_v30  ;;  %v941_v28 = vunpack.c.l.s8.bf16 %v765_v24  ;;  %v943_v29 = vunpack.c.l.s8.bf16 %v767_v25  ;;  %v764_v30 = vld [vmem:[#allocation2 + $0x180] sm:$0xff]  ;;  %v3886_v0 = vpack.c.bf16 %v3866_v12, %v3866_v12  ;;  %v996_v21 = vunpack.c.h.s8.bf16 %v788_v15 }
 0x410   :  { %v940_v32 = vunpack.c.l.s8.bf16 %v764_v30  ;;  %v948_v40 = vunpack.c.h.s8.bf16 %v764_v30  ;;  %v807_v30 = vld [vmem:[#allocation2 + $0x2d8] sm:$0xff] }
 0x412   :  { %1111 = vmatpush1.bf16.msra.mxu0 %v868_v33  ;;  %1193 = vmatpush1.bf16.msra.mxu1 %v870_v34  ;;  %v942_v33 = vunpack.c.l.s8.bf16 %v766_v31  ;;  %v949_v34 = vunpack.c.h.s8.bf16 %v765_v24  ;;  %v798_v24 = vld [vmem:[#allocation2 + $0x290] sm:$0xff] }
 0x413   :  { %1112 = vmatprep.subr.bf16.mxu0 %v877_v35  ;;  %1194 = vmatprep.subr.bf16.mxu1 %v879_v36  ;;  %v951_v35 = vunpack.c.h.s8.bf16 %v767_v25  ;;  %v773_v36 = vld [vmem:[#allocation2 + $0x1c8] sm:$0xff] }
 0x416   :  { %1113 = vmatpush1.bf16.msra.mxu0 %v876_v41  ;;  %1195 = vmatpush1.bf16.msra.mxu1 %v878_v42  ;;  %v950_v41 = vunpack.c.h.s8.bf16 %v766_v31  ;;  %v957_v42 = vunpack.c.l.s8.bf16 %v773_v36 }
 0x417   :  { %1114 = vmatprep.subr.bf16.mxu0 %v885_v43  ;;  %1196 = vmatprep.subr.bf16.mxu1 %v887_v44  ;;  %v959_v43 = vunpack.c.l.s8.bf16 %v775_v39  ;;  %v772_v44 = vld [vmem:[#allocation2 + $0x1c0] sm:$0xff] }
 0x418   :  { %v956_v46 = vunpack.c.l.s8.bf16 %v772_v44  ;;  %v964_v52 = vunpack.c.h.s8.bf16 %v772_v44  ;;  %v815_v44 = vld [vmem:[#allocation2 + $0x318] sm:$0xff] }
 0x41a   :  { %1115 = vmatpush1.bf16.msra.mxu0 %v884_v47  ;;  %1197 = vmatpush1.bf16.msra.mxu1 %v886_v48  ;;  %v958_v47 = vunpack.c.l.s8.bf16 %v774_v45  ;;  %v965_v48 = vunpack.c.h.s8.bf16 %v773_v36  ;;  %v806_v36 = vld [vmem:[#allocation2 + $0x2d0] sm:$0xff] }
 0x41b   :  { %1116 = vmatprep.subr.bf16.mxu0 %v893_v49  ;;  %1198 = vmatprep.subr.bf16.mxu1 %v895_v50  ;;  %v967_v49 = vunpack.c.h.s8.bf16 %v775_v39  ;;  %v781_v50 = vld [vmem:[#allocation2 + $0x208] sm:$0xff] }
 0x41e   :  { %1117 = vmatpush1.bf16.msra.mxu0 %v892_v56  ;;  %1199 = vmatpush1.bf16.msra.mxu1 %v894_v57  ;;  %v966_v56 = vunpack.c.h.s8.bf16 %v774_v45  ;;  %v973_v57 = vunpack.c.l.s8.bf16 %v781_v50 }
 0x41f   :  { %1118 = vmatprep.subr.bf16.mxu0 %v901_v58  ;;  %1200 = vmatprep.subr.bf16.mxu1 %v903_v60  ;;  %v975_v58 = vunpack.c.l.s8.bf16 %v783_v51  ;;  %v780_v60 = vld [vmem:[#allocation2 + $0x200] sm:$0xff] }
 0x420   :  { %v980_v12 = vunpack.c.h.s8.bf16 %v780_v60 }
 0x422   :  { %1119 = vmatpush1.bf16.msra.mxu0 %v900_v2  ;;  %1201 = vmatpush1.bf16.msra.mxu1 %v902_v3  ;;  %v972_v2 = vunpack.c.l.s8.bf16 %v780_v60  ;;  %v974_v3 = vunpack.c.l.s8.bf16 %v782_v61  ;;  %v823_v60 = vld [vmem:[#allocation2 + $0x358] sm:$0xff] }
 0x423   :  { %1120 = vmatprep.subr.bf16.mxu0 %v909_v4  ;;  %1202 = vmatprep.subr.bf16.mxu1 %v911_v37  ;;  %v981_v4 = vunpack.c.h.s8.bf16 %v781_v50  ;;  %v983_v37 = vunpack.c.h.s8.bf16 %v783_v51  ;;  %v814_v50 = vld [vmem:[#allocation2 + $0x310] sm:$0xff] }
 0x426   :  { %1121 = vmatpush1.bf16.msra.mxu0 %v908_v7  ;;  %1203 = vmatpush1.bf16.msra.mxu1 %v910_v10  ;;  %v3890_v7 = vpack.c.bf16 %v3878_v9, %v3878_v9  ;;  %v982_v10 = vunpack.c.h.s8.bf16 %v782_v61  ;;  %v988_v9 = vunpack.c.l.s8.bf16 %v788_v15  ;;  %v831_v15 = vld [vmem:[#allocation2 + $0x398] sm:$0xff] }
 0x427   :  { %1122 = vmatprep.subr.bf16.mxu0 %v917_v11  ;;  %1204 = vmatprep.subr.bf16.mxu1 %v919_v13  ;;  %v989_v11 = vunpack.c.l.s8.bf16 %v789_v5  ;;  %v991_v13 = vunpack.c.l.s8.bf16 %v791_v6 }
 0x42a   :  { %1123 = vmatpush1.bf16.msra.mxu0 %v916_v16  ;;  %1205 = vmatpush1.bf16.msra.mxu1 %v918_v17  ;;  %v990_v16 = vunpack.c.l.s8.bf16 %v790_v55  ;;  %v997_v17 = vunpack.c.h.s8.bf16 %v789_v5  ;;  %v822_v5 = vld [vmem:[#allocation2 + $0x350] sm:$0xff] }
 0x42b   :  { %1124 = vmatprep.subr.bf16.mxu0 %v925_v18  ;;  %1206 = vmatprep.subr.bf16.mxu1 %v927_v19  ;;  %v999_v18 = vunpack.c.h.s8.bf16 %v791_v6  ;;  %v797_v19 = vld [vmem:[#allocation2 + $0x288] sm:$0xff] }
 0x42e   :  { %1125 = vmatpush1.bf16.msra.mxu0 %v924_v59  ;;  %1207 = vmatpush1.bf16.msra.mxu1 %v926_v14  ;;  %v998_v59 = vunpack.c.h.s8.bf16 %v790_v55  ;;  %v1005_v14 = vunpack.c.l.s8.bf16 %v797_v19 }
 0x42f   :  { %1126 = vmatprep.subr.bf16.mxu0 %v933_v22  ;;  %1208 = vmatprep.subr.bf16.mxu1 %v935_v23  ;;  %v1007_v22 = vunpack.c.l.s8.bf16 %v799_v20  ;;  %v796_v23 = vld [vmem:[#allocation2 + $0x280] sm:$0xff] }
 0x430   :  { %v1004_v25 = vunpack.c.l.s8.bf16 %v796_v23  ;;  %v1012_v31 = vunpack.c.h.s8.bf16 %v796_v23  ;;  %v839_v23 = vld [vmem:[#allocation2 + $0x3d8] sm:$0xff] }
 0x432   :  { %1127 = vmatpush1.bf16.msra.mxu0 %v932_v26  ;;  %1209 = vmatpush1.bf16.msra.mxu1 %v934_v27  ;;  %v1006_v26 = vunpack.c.l.s8.bf16 %v798_v24  ;;  %v1013_v27 = vunpack.c.h.s8.bf16 %v797_v19  ;;  %v830_v19 = vld [vmem:[#allocation2 + $0x390] sm:$0xff] }
 0x433   :  { %1128 = vmatprep.subr.bf16.mxu0 %v941_v28  ;;  %1210 = vmatprep.subr.bf16.mxu1 %v943_v29  ;;  %v1015_v28 = vunpack.c.h.s8.bf16 %v799_v20  ;;  %v805_v29 = vld [vmem:[#allocation2 + $0x2c8] sm:$0xff] }
 0x436   :  { %1129 = vmatpush1.bf16.msra.mxu0 %v940_v32  ;;  %1211 = vmatpush1.bf16.msra.mxu1 %v942_v33  ;;  %v1014_v32 = vunpack.c.h.s8.bf16 %v798_v24  ;;  %v1021_v33 = vunpack.c.l.s8.bf16 %v805_v29 }
 0x437   :  { %1130 = vmatprep.subr.bf16.mxu0 %v949_v34  ;;  %1212 = vmatprep.subr.bf16.mxu1 %v951_v35  ;;  %v1023_v34 = vunpack.c.l.s8.bf16 %v807_v30  ;;  %v804_v35 = vld [vmem:[#allocation2 + $0x2c0] sm:$0xff] }
 0x438   :  { %v1020_v39 = vunpack.c.l.s8.bf16 %v804_v35  ;;  %v1028_v45 = vunpack.c.h.s8.bf16 %v804_v35  ;;  %v723_v35 = vld [vmem:[#allocation2 + $0x38] sm:$0xff] }
 0x43a   :  { %1131 = vmatpush1.bf16.msra.mxu0 %v948_v40  ;;  %1213 = vmatpush1.bf16.msra.mxu1 %v950_v41  ;;  %v1022_v40 = vunpack.c.l.s8.bf16 %v806_v36  ;;  %v1029_v41 = vunpack.c.h.s8.bf16 %v805_v29  ;;  %v838_v29 = vld [vmem:[#allocation2 + $0x3d0] sm:$0xff] }
 0x43b   :  { %1132 = vmatprep.subr.bf16.mxu0 %v957_v42  ;;  %1214 = vmatprep.subr.bf16.mxu1 %v959_v43  ;;  %v1031_v42 = vunpack.c.h.s8.bf16 %v807_v30  ;;  %v813_v43 = vld [vmem:[#allocation2 + $0x308] sm:$0xff] }
 0x43e   :  { %1133 = vmatpush1.bf16.msra.mxu0 %v956_v46  ;;  %1215 = vmatpush1.bf16.msra.mxu1 %v958_v47  ;;  %v1030_v46 = vunpack.c.h.s8.bf16 %v806_v36  ;;  %v1037_v47 = vunpack.c.l.s8.bf16 %v813_v43 }
 0x43f   :  { %1134 = vmatprep.subr.bf16.mxu0 %v965_v48  ;;  %1216 = vmatprep.subr.bf16.mxu1 %v967_v49  ;;  %v1039_v48 = vunpack.c.l.s8.bf16 %v815_v44  ;;  %v812_v49 = vld [vmem:[#allocation2 + $0x300] sm:$0xff] }
 0x440   :  { %v1036_v51 = vunpack.c.l.s8.bf16 %v812_v49  ;;  %v1044_v61 = vunpack.c.h.s8.bf16 %v812_v49  ;;  %v729_v49 = vld [vmem:[#allocation2 + $0x68] sm:$0xff] }
 0x442   :  { %1135 = vmatpush1.bf16.msra.mxu0 %v964_v52  ;;  %1217 = vmatpush1.bf16.msra.mxu1 %v966_v56  ;;  %v1038_v52 = vunpack.c.l.s8.bf16 %v814_v50  ;;  %v1045_v56 = vunpack.c.h.s8.bf16 %v813_v43  ;;  %v722_v43 = vld [vmem:[#allocation2 + $0x30] sm:$0xff] }
 0x443   :  { %1145 = vmatprep.subr.bf16.mxu0 %v973_v57  ;;  %1227 = vmatprep.subr.bf16.mxu1 %v975_v58  ;;  %v1047_v57 = vunpack.c.h.s8.bf16 %v815_v44  ;;  %v821_v58 = vld [vmem:[#allocation2 + $0x348] sm:$0xff]  ;;  %v3898_v44 = vpack.c.bf16 %v3876_v8, %v3876_v8  ;;  %v865_v8 = vunpack.c.l.s8.bf16 %v729_v49 }
 0x445   :  { %1137 = vmatmul.mubr.bf16.vlgmr.msra.gmra.mrb[4].mxu0 %v3886_v0  ;;  %1219 = vmatmul.mubr.bf16.vlgmr.msra.gmra.mrb[12].mxu1 %v3886_v0 }
 0x446   :  { %1146 = vmatpush1.bf16.msra.mxu0 %v972_v2  ;;  %1228 = vmatpush1.bf16.msra.mxu1 %v974_v3  ;;  %v1046_v2 = vunpack.c.h.s8.bf16 %v814_v50  ;;  %v1053_v3 = vunpack.c.l.s8.bf16 %v821_v58  ;;  %v731_v50 = vld [vmem:[#allocation2 + $0x78] sm:$0xff] }
 0x447   :  { %1147 = vmatprep.subr.bf16.mxu0 %v981_v4  ;;  %1229 = vmatprep.subr.bf16.mxu1 %v983_v37  ;;  %v1055_v4 = vunpack.c.l.s8.bf16 %v823_v60  ;;  %v820_v37 = vld [vmem:[#allocation2 + $0x340] sm:$0xff] }
 0x448   :  { %1177 = vmatprep.mubr.bf16.mxu0 %v3890_v7  ;;  %1259 = vmatprep.mubr.bf16.mxu1 %v3890_v7  ;;  %v1052_v6 = vunpack.c.l.s8.bf16 %v820_v37  ;;  %v1060_v55 = vunpack.c.h.s8.bf16 %v820_v37  ;;  %v739_v37 = vld [vmem:[#allocation2 + $0xb8] sm:$0xff] }
 0x44a   :  { %1148 = vmatpush1.bf16.msra.mxu0 %v980_v12  ;;  %1230 = vmatpush1.bf16.msra.mxu1 %v982_v10  ;;  %v1054_v12 = vunpack.c.l.s8.bf16 %v822_v5  ;;  %v1061_v10 = vunpack.c.h.s8.bf16 %v821_v58  ;;  %v730_v58 = vld [vmem:[#allocation2 + $0x70] sm:$0xff] }
 0x44b   :  { %1149 = vmatprep.subr.bf16.mxu0 %v989_v11  ;;  %1231 = vmatprep.subr.bf16.mxu1 %v991_v13  ;;  %v1063_v11 = vunpack.c.h.s8.bf16 %v823_v60  ;;  %v829_v13 = vld [vmem:[#allocation2 + $0x388] sm:$0xff] }
 0x44e   :  { %1150 = vmatpush1.bf16.msra.mxu0 %v988_v9  ;;  %1232 = vmatpush1.bf16.msra.mxu1 %v990_v16  ;;  %v1062_v9 = vunpack.c.h.s8.bf16 %v822_v5  ;;  %v1069_v16 = vunpack.c.l.s8.bf16 %v829_v13 }
 0x44f   :  { %1151 = vmatprep.subr.bf16.mxu0 %v997_v17  ;;  %1233 = vmatprep.subr.bf16.mxu1 %v999_v18  ;;  %v1071_v17 = vunpack.c.l.s8.bf16 %v831_v15  ;;  %v828_v18 = vld [vmem:[#allocation2 + $0x380] sm:$0xff] }
 0x450   :  { %v1068_v20 = vunpack.c.l.s8.bf16 %v828_v18  ;;  %v1076_v24 = vunpack.c.h.s8.bf16 %v828_v18 }
 0x452   :  { %1152 = vmatpush1.bf16.msra.mxu0 %v996_v21  ;;  %1234 = vmatpush1.bf16.msra.mxu1 %v998_v59  ;;  %v1070_v21 = vunpack.c.l.s8.bf16 %v830_v19  ;;  %v1077_v59 = vunpack.c.h.s8.bf16 %v829_v13 }
 0x453   :  { %1153 = vmatprep.subr.bf16.mxu0 %v1005_v14  ;;  %1235 = vmatprep.subr.bf16.mxu1 %v1007_v22  ;;  %v1079_v14 = vunpack.c.h.s8.bf16 %v831_v15  ;;  %v837_v22 = vld [vmem:[#allocation2 + $0x3c8] sm:$0xff] }
 0x456   :  { %1154 = vmatpush1.bf16.msra.mxu0 %v1004_v25  ;;  %1236 = vmatpush1.bf16.msra.mxu1 %v1006_v26  ;;  %v1078_v25 = vunpack.c.h.s8.bf16 %v830_v19  ;;  %v1085_v26 = vunpack.c.l.s8.bf16 %v837_v22 }
 0x457   :  { %1155 = vmatprep.subr.bf16.mxu0 %v1013_v27  ;;  %1237 = vmatprep.subr.bf16.mxu1 %v1015_v28  ;;  %v1087_v27 = vunpack.c.l.s8.bf16 %v839_v23  ;;  %v836_v28 = vld [vmem:[#allocation2 + $0x3c0] sm:$0xff] }
 0x458   :  { %v1084_v30 = vunpack.c.l.s8.bf16 %v836_v28  ;;  %v1092_v36 = vunpack.c.h.s8.bf16 %v836_v28 }
 0x45a   :  { %1156 = vmatpush1.bf16.msra.mxu0 %v1012_v31  ;;  %1238 = vmatpush1.bf16.msra.mxu1 %v1014_v32  ;;  %v1086_v31 = vunpack.c.l.s8.bf16 %v838_v29  ;;  %v1093_v32 = vunpack.c.h.s8.bf16 %v837_v22 }
 0x45b   :  { %1157 = vmatprep.subr.bf16.mxu0 %v1021_v33  ;;  %1239 = vmatprep.subr.bf16.mxu1 %v1023_v34  ;;  %v1095_v33 = vunpack.c.h.s8.bf16 %v839_v23  ;;  %v721_v34 = vld [vmem:[#allocation2 + $0x28] sm:$0xff] }
 0x45e   :  { %1158 = vmatpush1.bf16.msra.mxu0 %v1020_v39  ;;  %1240 = vmatpush1.bf16.msra.mxu1 %v1022_v40  ;;  %v1094_v39 = vunpack.c.h.s8.bf16 %v838_v29  ;;  %v849_v40 = vunpack.c.l.s8.bf16 %v721_v34 }
 0x45f   :  { %1159 = vmatprep.subr.bf16.mxu0 %v1029_v41  ;;  %1241 = vmatprep.subr.bf16.mxu1 %v1031_v42  ;;  %v851_v41 = vunpack.c.l.s8.bf16 %v723_v35  ;;  %v720_v42 = vld [vmem:[#allocation2 + $0x20] sm:$0xff] }
 0x462   :  { %1160 = vmatpush1.bf16.msra.mxu0 %v1028_v45  ;;  %1242 = vmatpush1.bf16.msra.mxu1 %v1030_v46  ;;  %v848_v45 = vunpack.c.l.s8.bf16 %v720_v42  ;;  %v850_v46 = vunpack.c.l.s8.bf16 %v722_v43 }
 0x463   :  { %1161 = vmatprep.subr.bf16.mxu0 %v1037_v47  ;;  %1243 = vmatprep.subr.bf16.mxu1 %v1039_v48  ;;  %v857_v47 = vunpack.c.h.s8.bf16 %v721_v34  ;;  %v859_v48 = vunpack.c.h.s8.bf16 %v723_v35 }
 0x466   :  { %1162 = vmatpush1.bf16.msra.mxu0 %v1036_v51  ;;  %1244 = vmatpush1.bf16.msra.mxu1 %v1038_v52  ;;  %v856_v51 = vunpack.c.h.s8.bf16 %v720_v42  ;;  %v858_v52 = vunpack.c.h.s8.bf16 %v722_v43 }
 0x467   :  { %1163 = vmatprep.subr.bf16.mxu0 %v1045_v56  ;;  %1245 = vmatprep.subr.bf16.mxu1 %v1047_v57  ;;  %v867_v56 = vunpack.c.l.s8.bf16 %v731_v50  ;;  %v728_v57 = vld [vmem:[#allocation2 + $0x60] sm:$0xff] }
 0x468   :  { %v864_v60 = vunpack.c.l.s8.bf16 %v728_v57  ;;  %v872_v5 = vunpack.c.h.s8.bf16 %v728_v57 }
 0x46a   :  { %1164 = vmatpush1.bf16.msra.mxu0 %v1044_v61  ;;  %1246 = vmatpush1.bf16.msra.mxu1 %v1046_v2  ;;  %v866_v61 = vunpack.c.l.s8.bf16 %v730_v58  ;;  %v873_v2 = vunpack.c.h.s8.bf16 %v729_v49 }
 0x46b   :  { %1165 = vmatprep.subr.bf16.mxu0 %v1053_v3  ;;  %1247 = vmatprep.subr.bf16.mxu1 %v1055_v4  ;;  %v875_v3 = vunpack.c.h.s8.bf16 %v731_v50  ;;  %v737_v4 = vld [vmem:[#allocation2 + $0xa8] sm:$0xff] }
 0x46e   :  { %1166 = vmatpush1.bf16.msra.mxu0 %v1052_v6  ;;  %1248 = vmatpush1.bf16.msra.mxu1 %v1054_v12  ;;  %v874_v6 = vunpack.c.h.s8.bf16 %v730_v58  ;;  %v881_v12 = vunpack.c.l.s8.bf16 %v737_v4 }
 0x46f   :  { %1167 = vmatprep.subr.bf16.mxu0 %v1061_v10  ;;  %1249 = vmatprep.subr.bf16.mxu1 %v1063_v11  ;;  %v883_v10 = vunpack.c.l.s8.bf16 %v739_v37  ;;  %v736_v11 = vld [vmem:[#allocation2 + $0xa0] sm:$0xff] }
 0x470   :  { %v880_v13 = vunpack.c.l.s8.bf16 %v736_v11  ;;  %v888_v18 = vunpack.c.h.s8.bf16 %v736_v11 }
 0x472   :  { %1168 = vmatpush1.bf16.msra.mxu0 %v1060_v55  ;;  %1250 = vmatpush1.bf16.msra.mxu1 %v1062_v9  ;;  %v889_v55 = vunpack.c.h.s8.bf16 %v737_v4  ;;  %v891_v9 = vunpack.c.h.s8.bf16 %v739_v37 }
 0x473   :  { %1169 = vmatprep.subr.bf16.mxu0 %v1069_v16  ;;  %1251 = vmatprep.subr.bf16.mxu1 %v1071_v17  ;;  %v745_v16 = vld [vmem:[#allocation2 + $0xe8] sm:$0xff]  ;;  %v747_v17 = vld [vmem:[#allocation2 + $0xf8] sm:$0xff] }
 0x476   :  { %1170 = vmatpush1.bf16.msra.mxu0 %v1068_v20  ;;  %1252 = vmatpush1.bf16.msra.mxu1 %v1070_v21  ;;  %v897_v20 = vunpack.c.l.s8.bf16 %v745_v16  ;;  %v899_v21 = vunpack.c.l.s8.bf16 %v747_v17 }
 0x477   :  { %1171 = vmatprep.subr.bf16.mxu0 %v1077_v59  ;;  %1253 = vmatprep.subr.bf16.mxu1 %v1079_v14  ;;  %v744_v59 = vld [vmem:[#allocation2 + $0xe0] sm:$0xff]  ;;  %v746_v14 = vld [vmem:[#allocation2 + $0xf0] sm:$0xff] }
 0x478   :  { %v896_v22 = vunpack.c.l.s8.bf16 %v744_v59  ;;  %v898_v23 = vunpack.c.l.s8.bf16 %v746_v14  ;;  %v904_v28 = vunpack.c.h.s8.bf16 %v744_v59  ;;  %v906_v29 = vunpack.c.h.s8.bf16 %v746_v14 }
 0x47a   :  { %1172 = vmatpush1.bf16.msra.mxu0 %v1076_v24  ;;  %1254 = vmatpush1.bf16.msra.mxu1 %v1078_v25  ;;  %v905_v24 = vunpack.c.h.s8.bf16 %v745_v16  ;;  %v907_v25 = vunpack.c.h.s8.bf16 %v747_v17 }
 0x47b   :  { %1173 = vmatprep.subr.bf16.mxu0 %v1085_v26  ;;  %1255 = vmatprep.subr.bf16.mxu1 %v1087_v27  ;;  %v753_v26 = vld [vmem:[#allocation2 + $0x128] sm:$0xff]  ;;  %v755_v27 = vld [vmem:[#allocation2 + $0x138] sm:$0xff] }
 0x47e   :  { %1174 = vmatpush1.bf16.msra.mxu0 %v1084_v30  ;;  %1256 = vmatpush1.bf16.msra.mxu1 %v1086_v31  ;;  %v913_v30 = vunpack.c.l.s8.bf16 %v753_v26  ;;  %v915_v31 = vunpack.c.l.s8.bf16 %v755_v27 }
 0x47f   :  { %1175 = vmatprep.subr.bf16.mxu0 %v1093_v32  ;;  %1257 = vmatprep.subr.bf16.mxu1 %v1095_v33  ;;  %v752_v32 = vld [vmem:[#allocation2 + $0x120] sm:$0xff]  ;;  %v754_v33 = vld [vmem:[#allocation2 + $0x130] sm:$0xff] }
 0x480   :  { %v912_v34 = vunpack.c.l.s8.bf16 %v752_v32  ;;  %v914_v35 = vunpack.c.l.s8.bf16 %v754_v33  ;;  %v920_v42 = vunpack.c.h.s8.bf16 %v752_v32  ;;  %v922_v43 = vunpack.c.h.s8.bf16 %v754_v33 }
 0x482   :  { %1176 = vmatpush1.bf16.msra.mxu0 %v1092_v36  ;;  %1258 = vmatpush1.bf16.msra.mxu1 %v1094_v39  ;;  %v921_v36 = vunpack.c.h.s8.bf16 %v753_v26  ;;  %v923_v39 = vunpack.c.h.s8.bf16 %v755_v27 }
 0x483   :  { %1268 = vmatprep.subr.bf16.mxu0 %v849_v40  ;;  %1350 = vmatprep.subr.bf16.mxu1 %v851_v41  ;;  %v761_v40 = vld [vmem:[#allocation2 + $0x168] sm:$0xff]  ;;  %v763_v41 = vld [vmem:[#allocation2 + $0x178] sm:$0xff] }
 0x485   :  { %1178 = vmatmul.mubr.bf16.vlgmr.msra.gmra.mrb[4].mxu0 %v3898_v44  ;;  %1260 = vmatmul.mubr.bf16.vlgmr.msra.gmra.mrb[12].mxu1 %v3898_v44 }
 0x486   :  { %1269 = vmatpush1.bf16.msra.mxu0 %v848_v45  ;;  %1351 = vmatpush1.bf16.msra.mxu1 %v850_v46  ;;  %v929_v45 = vunpack.c.l.s8.bf16 %v761_v40  ;;  %v931_v46 = vunpack.c.l.s8.bf16 %v763_v41 }
 0x487   :  { %1270 = vmatprep.subr.bf16.mxu0 %v857_v47  ;;  %1352 = vmatprep.subr.bf16.mxu1 %v859_v48  ;;  %v760_v47 = vld [vmem:[#allocation2 + $0x160] sm:$0xff]  ;;  %v762_v48 = vld [vmem:[#allocation2 + $0x170] sm:$0xff] }
 0x488   :  { %1300 = vmatprep.mubr.bf16.mxu0 %v3880_v38  ;;  %1382 = vmatprep.mubr.bf16.mxu1 %v3880_v38  ;;  %v738_v38 = vld [vmem:[#allocation2 + $0xb0] sm:$0xff]  ;;  %v928_v49 = vunpack.c.l.s8.bf16 %v760_v47  ;;  %v930_v50 = vunpack.c.l.s8.bf16 %v762_v48  ;;  %v936_v57 = vunpack.c.h.s8.bf16 %v760_v47  ;;  %v938_v58 = vunpack.c.h.s8.bf16 %v762_v48 }
 0x489   :  { %v882_v15 = vunpack.c.l.s8.bf16 %v738_v38  ;;  %v890_v19 = vunpack.c.h.s8.bf16 %v738_v38 }
 0x48a   :  { %1271 = vmatpush1.bf16.msra.mxu0 %v856_v51  ;;  %1353 = vmatpush1.bf16.msra.mxu1 %v858_v52  ;;  %v937_v51 = vunpack.c.h.s8.bf16 %v761_v40  ;;  %v939_v52 = vunpack.c.h.s8.bf16 %v763_v41 }
 0x48b   :  { %1272 = vmatprep.subr.bf16.mxu0 %v865_v8  ;;  %1354 = vmatprep.subr.bf16.mxu1 %v867_v56  ;;  %v769_v8 = vld [vmem:[#allocation2 + $0x1a8] sm:$0xff]  ;;  %v771_v56 = vld [vmem:[#allocation2 + $0x1b8] sm:$0xff] }
 0x48e   :  { %1273 = vmatpush1.bf16.msra.mxu0 %v864_v60  ;;  %1355 = vmatpush1.bf16.msra.mxu1 %v866_v61  ;;  %v945_v60 = vunpack.c.l.s8.bf16 %v769_v8  ;;  %v947_v61 = vunpack.c.l.s8.bf16 %v771_v56 }
 0x48f   :  { %1274 = vmatprep.subr.bf16.mxu0 %v873_v2  ;;  %1356 = vmatprep.subr.bf16.mxu1 %v875_v3  ;;  %v768_v2 = vld [vmem:[#allocation2 + $0x1a0] sm:$0xff]  ;;  %v770_v3 = vld [vmem:[#allocation2 + $0x1b0] sm:$0xff] }
 0x490   :  { %v944_v4 = vunpack.c.l.s8.bf16 %v768_v2  ;;  %v946_v37 = vunpack.c.l.s8.bf16 %v770_v3  ;;  %v952_v11 = vunpack.c.h.s8.bf16 %v768_v2  ;;  %v954_v38 = vunpack.c.h.s8.bf16 %v770_v3 }
 0x492   :  { %1275 = vmatpush1.bf16.msra.mxu0 %v872_v5  ;;  %1357 = vmatpush1.bf16.msra.mxu1 %v874_v6  ;;  %v953_v5 = vunpack.c.h.s8.bf16 %v769_v8  ;;  %v955_v6 = vunpack.c.h.s8.bf16 %v771_v56 }
 0x493   :  { %1276 = vmatprep.subr.bf16.mxu0 %v881_v12  ;;  %1358 = vmatprep.subr.bf16.mxu1 %v883_v10  ;;  %v777_v12 = vld [vmem:[#allocation2 + $0x1e8] sm:$0xff]  ;;  %v779_v10 = vld [vmem:[#allocation2 + $0x1f8] sm:$0xff] }
 0x496   :  { %1277 = vmatpush1.bf16.msra.mxu0 %v880_v13  ;;  %1359 = vmatpush1.bf16.msra.mxu1 %v882_v15  ;;  %v961_v13 = vunpack.c.l.s8.bf16 %v777_v12  ;;  %v963_v15 = vunpack.c.l.s8.bf16 %v779_v10 }
 0x497   :  { %1278 = vmatprep.subr.bf16.mxu0 %v889_v55  ;;  %1360 = vmatprep.subr.bf16.mxu1 %v891_v9  ;;  %v776_v55 = vld [vmem:[#allocation2 + $0x1e0] sm:$0xff]  ;;  %v778_v9 = vld [vmem:[#allocation2 + $0x1f0] sm:$0xff] }
 0x498   :  { %v960_v16 = vunpack.c.l.s8.bf16 %v776_v55  ;;  %v962_v17 = vunpack.c.l.s8.bf16 %v778_v9  ;;  %v968_v59 = vunpack.c.h.s8.bf16 %v776_v55  ;;  %v970_v14 = vunpack.c.h.s8.bf16 %v778_v9 }
 0x49a   :  { %1279 = vmatpush1.bf16.msra.mxu0 %v888_v18  ;;  %1361 = vmatpush1.bf16.msra.mxu1 %v890_v19  ;;  %v969_v18 = vunpack.c.h.s8.bf16 %v777_v12  ;;  %v971_v19 = vunpack.c.h.s8.bf16 %v779_v10 }
 0x49b   :  { %1280 = vmatprep.subr.bf16.mxu0 %v897_v20  ;;  %1362 = vmatprep.subr.bf16.mxu1 %v899_v21  ;;  %v785_v20 = vld [vmem:[#allocation2 + $0x228] sm:$0xff]  ;;  %v787_v21 = vld [vmem:[#allocation2 + $0x238] sm:$0xff] }
 0x49e   :  { %1281 = vmatpush1.bf16.msra.mxu0 %v896_v22  ;;  %1363 = vmatpush1.bf16.msra.mxu1 %v898_v23  ;;  %v977_v22 = vunpack.c.l.s8.bf16 %v785_v20  ;;  %v979_v23 = vunpack.c.l.s8.bf16 %v787_v21 }
 0x49f   :  { %1282 = vmatprep.subr.bf16.mxu0 %v905_v24  ;;  %1364 = vmatprep.subr.bf16.mxu1 %v907_v25  ;;  %v784_v24 = vld [vmem:[#allocation2 + $0x220] sm:$0xff]  ;;  %v786_v25 = vld [vmem:[#allocation2 + $0x230] sm:$0xff] }
 0x4a0   :  { %v976_v26 = vunpack.c.l.s8.bf16 %v784_v24  ;;  %v978_v27 = vunpack.c.l.s8.bf16 %v786_v25  ;;  %v984_v32 = vunpack.c.h.s8.bf16 %v784_v24  ;;  %v986_v33 = vunpack.c.h.s8.bf16 %v786_v25 }
 0x4a2   :  { %1283 = vmatpush1.bf16.msra.mxu0 %v904_v28  ;;  %1365 = vmatpush1.bf16.msra.mxu1 %v906_v29  ;;  %v985_v28 = vunpack.c.h.s8.bf16 %v785_v20  ;;  %v987_v29 = vunpack.c.h.s8.bf16 %v787_v21 }
 0x4a3   :  { %1284 = vmatprep.subr.bf16.mxu0 %v913_v30  ;;  %1366 = vmatprep.subr.bf16.mxu1 %v915_v31  ;;  %v793_v30 = vld [vmem:[#allocation2 + $0x268] sm:$0xff]  ;;  %v795_v31 = vld [vmem:[#allocation2 + $0x278] sm:$0xff] }
 0x4a6   :  { %1285 = vmatpush1.bf16.msra.mxu0 %v912_v34  ;;  %1367 = vmatpush1.bf16.msra.mxu1 %v914_v35  ;;  %v993_v34 = vunpack.c.l.s8.bf16 %v793_v30  ;;  %v995_v35 = vunpack.c.l.s8.bf16 %v795_v31 }
 0x4a7   :  { %1286 = vmatprep.subr.bf16.mxu0 %v921_v36  ;;  %1368 = vmatprep.subr.bf16.mxu1 %v923_v39  ;;  %v792_v36 = vld [vmem:[#allocation2 + $0x260] sm:$0xff]  ;;  %v794_v39 = vld [vmem:[#allocation2 + $0x270] sm:$0xff] }
 0x4a8   :  { %v992_v40 = vunpack.c.l.s8.bf16 %v792_v36  ;;  %v994_v41 = vunpack.c.l.s8.bf16 %v794_v39  ;;  %v1002_v47 = vunpack.c.h.s8.bf16 %v794_v39 }
 0x4aa   :  { %1287 = vmatpush1.bf16.msra.mxu0 %v920_v42  ;;  %1369 = vmatpush1.bf16.msra.mxu1 %v922_v43  ;;  %v1003_v42 = vunpack.c.h.s8.bf16 %v795_v31  ;;  %v801_v43 = vld [vmem:[#allocation2 + $0x2a8] sm:$0xff] }
 0x4ab   :  { %1288 = vmatprep.subr.bf16.mxu0 %v929_v45  ;;  %1370 = vmatprep.subr.bf16.mxu1 %v931_v46  ;;  %v803_v45 = vld [vmem:[#allocation2 + $0x2b8] sm:$0xff]  ;;  %v1000_v46 = vunpack.c.h.s8.bf16 %v792_v36  ;;  %v1009_v48 = vunpack.c.l.s8.bf16 %v801_v43  ;;  %v1017_v8 = vunpack.c.h.s8.bf16 %v801_v43 }
 0x4ac   :  { %v1019_v56 = vunpack.c.h.s8.bf16 %v803_v45 }
 0x4ae   :  { %1289 = vmatpush1.bf16.msra.mxu0 %v928_v49  ;;  %1371 = vmatpush1.bf16.msra.mxu1 %v930_v50  ;;  %v1011_v49 = vunpack.c.l.s8.bf16 %v803_v45  ;;  %v800_v50 = vld [vmem:[#allocation2 + $0x2a0] sm:$0xff] }
 0x4af   :  { %1290 = vmatprep.subr.bf16.mxu0 %v937_v51  ;;  %1372 = vmatprep.subr.bf16.mxu1 %v939_v52  ;;  %v1008_v51 = vunpack.c.l.s8.bf16 %v800_v50 }
 0x4b2   :  { %1291 = vmatpush1.bf16.msra.mxu0 %v936_v57  ;;  %1373 = vmatpush1.bf16.msra.mxu1 %v938_v58  ;;  %v809_v57 = vld [vmem:[#allocation2 + $0x2e8] sm:$0xff]  ;;  %v811_v58 = vld [vmem:[#allocation2 + $0x2f8] sm:$0xff] }
 0x4b3   :  { %1292 = vmatprep.subr.bf16.mxu0 %v945_v60  ;;  %1374 = vmatprep.subr.bf16.mxu1 %v947_v61  ;;  %v1016_v60 = vunpack.c.h.s8.bf16 %v800_v50  ;;  %v1025_v2 = vunpack.c.l.s8.bf16 %v809_v57  ;;  %v1027_v3 = vunpack.c.l.s8.bf16 %v811_v58  ;;  %v1033_v12 = vunpack.c.h.s8.bf16 %v809_v57 }
 0x4b4   :  { %v1035_v10 = vunpack.c.h.s8.bf16 %v811_v58 }
 0x4b6   :  { %1293 = vmatpush1.bf16.msra.mxu0 %v944_v4  ;;  %1375 = vmatpush1.bf16.msra.mxu1 %v946_v37  ;;  %v808_v4 = vld [vmem:[#allocation2 + $0x2e0] sm:$0xff]  ;;  %v810_v37 = vld [vmem:[#allocation2 + $0x2f0] sm:$0xff] }
 0x4b7   :  { %1294 = vmatprep.subr.bf16.mxu0 %v953_v5  ;;  %1376 = vmatprep.subr.bf16.mxu1 %v955_v6  ;;  %v1024_v5 = vunpack.c.l.s8.bf16 %v808_v4  ;;  %v1026_v6 = vunpack.c.l.s8.bf16 %v810_v37 }
 0x4ba   :  { %1295 = vmatpush1.bf16.msra.mxu0 %v952_v11  ;;  %1377 = vmatpush1.bf16.msra.mxu1 %v954_v38  ;;  %v817_v11 = vld [vmem:[#allocation2 + $0x328] sm:$0xff]  ;;  %v819_v38 = vld [vmem:[#allocation2 + $0x338] sm:$0xff] }
 0x4bb   :  { %1296 = vmatprep.subr.bf16.mxu0 %v961_v13  ;;  %1378 = vmatprep.subr.bf16.mxu1 %v963_v15  ;;  %v1032_v13 = vunpack.c.h.s8.bf16 %v808_v4  ;;  %v1034_v15 = vunpack.c.h.s8.bf16 %v810_v37  ;;  %v1041_v55 = vunpack.c.l.s8.bf16 %v817_v11  ;;  %v1043_v9 = vunpack.c.l.s8.bf16 %v819_v38 }
 0x4bc   :  { %v1049_v20 = vunpack.c.h.s8.bf16 %v817_v11  ;;  %v1051_v21 = vunpack.c.h.s8.bf16 %v819_v38 }
 0x4be   :  { %1297 = vmatpush1.bf16.msra.mxu0 %v960_v16  ;;  %1379 = vmatpush1.bf16.msra.mxu1 %v962_v17  ;;  %v816_v16 = vld [vmem:[#allocation2 + $0x320] sm:$0xff]  ;;  %v818_v17 = vld [vmem:[#allocation2 + $0x330] sm:$0xff] }
 0x4bf   :  { %1298 = vmatprep.subr.bf16.mxu0 %v969_v18  ;;  %1380 = vmatprep.subr.bf16.mxu1 %v971_v19  ;;  %v1040_v18 = vunpack.c.l.s8.bf16 %v816_v16  ;;  %v1042_v19 = vunpack.c.l.s8.bf16 %v818_v17 }
 0x4c2   :  { %1299 = vmatpush1.bf16.msra.mxu0 %v968_v59  ;;  %1381 = vmatpush1.bf16.msra.mxu1 %v970_v14  ;;  %v825_v59 = vld [vmem:[#allocation2 + $0x368] sm:$0xff]  ;;  %v827_v14 = vld [vmem:[#allocation2 + $0x378] sm:$0xff] }
 0x4c3   :  { %1309 = vmatprep.subr.bf16.mxu0 %v977_v22  ;;  %1391 = vmatprep.subr.bf16.mxu1 %v979_v23  ;;  %v1048_v22 = vunpack.c.h.s8.bf16 %v816_v16  ;;  %v1050_v23 = vunpack.c.h.s8.bf16 %v818_v17  ;;  %v1057_v24 = vunpack.c.l.s8.bf16 %v825_v59  ;;  %v1059_v25 = vunpack.c.l.s8.bf16 %v827_v14 }
 0x4c4   :  { %v1067_v31 = vunpack.c.h.s8.bf16 %v827_v14 }
 0x4c5   :  { %1301 = vmatmul.mubr.bf16.vlgmr.msra.gmra.mrb[8].mxu0 %v3886_v0  ;;  %1383 = vmatmul.mubr.bf16.vlgmr.msra.gmra.mrb[16].mxu1 %v3886_v0  ;;  %v1001_v0 = vunpack.c.h.s8.bf16 %v793_v30  ;;  %v1065_v30 = vunpack.c.h.s8.bf16 %v825_v59 }
 0x4c6   :  { %1310 = vmatpush1.bf16.msra.mxu0 %v976_v26  ;;  %1392 = vmatpush1.bf16.msra.mxu1 %v978_v27  ;;  %v824_v26 = vld [vmem:[#allocation2 + $0x360] sm:$0xff]  ;;  %v826_v27 = vld [vmem:[#allocation2 + $0x370] sm:$0xff] }
 0x4c7   :  { %1311 = vmatprep.subr.bf16.mxu0 %v985_v28  ;;  %1393 = vmatprep.subr.bf16.mxu1 %v987_v29  ;;  %v1056_v28 = vunpack.c.l.s8.bf16 %v824_v26  ;;  %v1058_v29 = vunpack.c.l.s8.bf16 %v826_v27 }
 0x4c8   :  { %1341 = vmatprep.mubr.bf16.mxu0 %v3890_v7  ;;  %1423 = vmatprep.mubr.bf16.mxu1 %v3890_v7  ;;  %v802_v7 = vld [vmem:[#allocation2 + $0x2b0] sm:$0xff] }
 0x4c9   :  { %v1010_v52 = vunpack.c.l.s8.bf16 %v802_v7  ;;  %v1018_v61 = vunpack.c.h.s8.bf16 %v802_v7 }
 0x4ca   :  { %1312 = vmatpush1.bf16.msra.mxu0 %v984_v32  ;;  %1394 = vmatpush1.bf16.msra.mxu1 %v986_v33  ;;  %v833_v32 = vld [vmem:[#allocation2 + $0x3a8] sm:$0xff]  ;;  %v835_v33 = vld [vmem:[#allocation2 + $0x3b8] sm:$0xff] }
 0x4cb   :  { %1313 = vmatprep.subr.bf16.mxu0 %v993_v34  ;;  %1395 = vmatprep.subr.bf16.mxu1 %v995_v35  ;;  %v1064_v34 = vunpack.c.h.s8.bf16 %v824_v26  ;;  %v1066_v35 = vunpack.c.h.s8.bf16 %v826_v27  ;;  %v1073_v36 = vunpack.c.l.s8.bf16 %v833_v32  ;;  %v1075_v39 = vunpack.c.l.s8.bf16 %v835_v33 }
 0x4cc   :  { %v1081_v43 = vunpack.c.h.s8.bf16 %v833_v32  ;;  %v1083_v45 = vunpack.c.h.s8.bf16 %v835_v33 }
 0x4ce   :  { %1314 = vmatpush1.bf16.msra.mxu0 %v992_v40  ;;  %1396 = vmatpush1.bf16.msra.mxu1 %v994_v41  ;;  %v832_v40 = vld [vmem:[#allocation2 + $0x3a0] sm:$0xff]  ;;  %v834_v41 = vld [vmem:[#allocation2 + $0x3b0] sm:$0xff] }
 0x4cf   :  { %1315 = vmatprep.subr.bf16.mxu0 %v1001_v0  ;;  %1397 = vmatprep.subr.bf16.mxu1 %v1003_v42  ;;  %v1072_v0 = vunpack.c.l.s8.bf16 %v832_v40  ;;  %v1074_v42 = vunpack.c.l.s8.bf16 %v834_v41 }
 0x4d2   :  { %1316 = vmatpush1.bf16.msra.mxu0 %v1000_v46  ;;  %1398 = vmatpush1.bf16.msra.mxu1 %v1002_v47  ;;  %v841_v46 = vld [vmem:[#allocation2 + $0x3e8] sm:$0xff]  ;;  %v843_v47 = vld [vmem:[#allocation2 + $0x3f8] sm:$0xff] }
 0x4d3   :  { %1317 = vmatprep.subr.bf16.mxu0 %v1009_v48  ;;  %1399 = vmatprep.subr.bf16.mxu1 %v1011_v49  ;;  %v1080_v48 = vunpack.c.h.s8.bf16 %v832_v40  ;;  %v1082_v49 = vunpack.c.h.s8.bf16 %v834_v41  ;;  %v1089_v50 = vunpack.c.l.s8.bf16 %v841_v46  ;;  %v1091_v7 = vunpack.c.l.s8.bf16 %v843_v47 }
 0x4d4   :  { %v1097_v57 = vunpack.c.h.s8.bf16 %v841_v46  ;;  %v1099_v58 = vunpack.c.h.s8.bf16 %v843_v47 }
 0x4d6   :  { %1318 = vmatpush1.bf16.msra.mxu0 %v1008_v51  ;;  %1400 = vmatpush1.bf16.msra.mxu1 %v1010_v52  ;;  %v840_v51 = vld [vmem:[#allocation2 + $0x3e0] sm:$0xff]  ;;  %v842_v52 = vld [vmem:[#allocation2 + $0x3f0] sm:$0xff] }
 0x4d7   :  { %1319 = vmatprep.subr.bf16.mxu0 %v1017_v8  ;;  %1401 = vmatprep.subr.bf16.mxu1 %v1019_v56  ;;  %v1088_v8 = vunpack.c.l.s8.bf16 %v840_v51  ;;  %v1090_v56 = vunpack.c.l.s8.bf16 %v842_v52 }
 0x4da   :  { %1320 = vmatpush1.bf16.msra.mxu0 %v1016_v60  ;;  %1402 = vmatpush1.bf16.msra.mxu1 %v1018_v61  ;;  %v1096_v60 = vunpack.c.h.s8.bf16 %v840_v51  ;;  %v1098_v61 = vunpack.c.h.s8.bf16 %v842_v52 }
 0x4db   :  { %1321 = vmatprep.subr.bf16.mxu0 %v1025_v2  ;;  %1403 = vmatprep.subr.bf16.mxu1 %v1027_v3  ;;  %v3910_v2 = vld [vmem:[#allocation10 + $0x25] sm:$0xff] }
 0x4dc   :  { %v1437_v3 = vrot.slane %v3910_v2, %v3798_v63  ;;  %v1445_v4 = vrot.slane %v3910_v2, %v3857_v53  ;;  %v1441_v37 = vrot.slane %v3910_v2, %v3801_v1 }
 0x4de   :  { %1322 = vmatpush1.bf16.msra.mxu0 %v1024_v5  ;;  %1404 = vmatpush1.bf16.msra.mxu1 %v1026_v6  ;;  %v1449_v5 = vrot.slane %v3910_v2, %v3860_v54 }
 0x4df   :  { %1323 = vmatprep.subr.bf16.mxu0 %v1033_v12  ;;  %1405 = vmatprep.subr.bf16.mxu1 %v1035_v10 }
 0x4e2   :  { %1324 = vmatpush1.bf16.msra.mxu0 %v1032_v13  ;;  %1406 = vmatpush1.bf16.msra.mxu1 %v1034_v15 }
 0x4e3   :  { %1325 = vmatprep.subr.bf16.mxu0 %v1041_v55  ;;  %1407 = vmatprep.subr.bf16.mxu1 %v1043_v9 }
 0x4e6   :  { %1326 = vmatpush1.bf16.msra.mxu0 %v1040_v18  ;;  %1408 = vmatpush1.bf16.msra.mxu1 %v1042_v19 }
 0x4e7   :  { %1327 = vmatprep.subr.bf16.mxu0 %v1049_v20  ;;  %1409 = vmatprep.subr.bf16.mxu1 %v1051_v21 }
 0x4ea   :  { %1328 = vmatpush1.bf16.msra.mxu0 %v1048_v22  ;;  %1410 = vmatpush1.bf16.msra.mxu1 %v1050_v23 }
 0x4eb   :  { %1329 = vmatprep.subr.bf16.mxu0 %v1057_v24  ;;  %1411 = vmatprep.subr.bf16.mxu1 %v1059_v25 }
 0x4ee   :  { %1330 = vmatpush1.bf16.msra.mxu0 %v1056_v28  ;;  %1412 = vmatpush1.bf16.msra.mxu1 %v1058_v29 }
 0x4ef   :  { %1331 = vmatprep.subr.bf16.mxu0 %v1065_v30  ;;  %1413 = vmatprep.subr.bf16.mxu1 %v1067_v31 }
 0x4f2   :  { %1332 = vmatpush1.bf16.msra.mxu0 %v1064_v34  ;;  %1414 = vmatpush1.bf16.msra.mxu1 %v1066_v35 }
 0x4f3   :  { %1333 = vmatprep.subr.bf16.mxu0 %v1073_v36  ;;  %1415 = vmatprep.subr.bf16.mxu1 %v1075_v39 }
 0x4f6   :  { %1334 = vmatpush1.bf16.msra.mxu0 %v1072_v0  ;;  %1416 = vmatpush1.bf16.msra.mxu1 %v1074_v42 }
 0x4f7   :  { %1335 = vmatprep.subr.bf16.mxu0 %v1081_v43  ;;  %1417 = vmatprep.subr.bf16.mxu1 %v1083_v45 }
 0x4fa   :  { %1336 = vmatpush1.bf16.msra.mxu0 %v1080_v48  ;;  %1418 = vmatpush1.bf16.msra.mxu1 %v1082_v49 }
 0x4fb   :  { %1337 = vmatprep.subr.bf16.mxu0 %v1089_v50  ;;  %1419 = vmatprep.subr.bf16.mxu1 %v1091_v7 }
 0x4fe   :  { %1338 = vmatpush1.bf16.msra.mxu0 %v1088_v8  ;;  %1420 = vmatpush1.bf16.msra.mxu1 %v1090_v56 }
 0x4ff   :  { %1339 = vmatprep.subr.bf16.mxu0 %v1097_v57  ;;  %1421 = vmatprep.subr.bf16.mxu1 %v1099_v58 }
 0x502   :  { %1340 = vmatpush1.bf16.msra.mxu0 %v1096_v60  ;;  %1422 = vmatpush1.bf16.msra.mxu1 %v1098_v61 }
 0x505   :  { %1342 = vmatmul.mubr.bf16.vlgmr.msra.gmra.mrb[8].mxu0 %v3898_v44  ;;  %1424 = vmatmul.mubr.bf16.vlgmr.msra.gmra.mrb[16].mxu1 %v3898_v44 }
 0x558   :  { %v1179_v6 = vpop.f32.mrb[4].mxu0  ;;  %v1261_v12 = vpop.f32.mrb[12].mxu1 }
 0x559   :  { %v1474_v10 = vmul.f32 %v1437_v3, %v1179_v6  ;;  %v1476_v11 = vmul.f32 %v1445_v4, %v1261_v12  ;;  %v1181_v38 = vpop.f32.mrb[5].mxu0  ;;  %v1263_v44 = vpop.f32.mrb[13].mxu1 }
 0x55a   :  { %v1475_v13 = vmul.f32 %v1441_v37, %v1181_v38  ;;  %v1477_v15 = vmul.f32 %v1449_v5, %v1263_v44  ;;  %v1183_v55 = vpop.f32.mrb[6].mxu0  ;;  %v1265_v9 = vpop.f32.mrb[14].mxu1 }
 0x55b   :  { %v1484_v16 = vrot.slane %v1474_v10, 4  ;;  %v1496_v17 = vrot.slane %v1476_v11, 4  ;;  %v1184_v18 = vpop.f32.mrb[7].mxu0  ;;  %v1266_v19 = vpop.f32.mrb[15].mxu1 }
 0x55c   :  { %v1490_v20 = vrot.slane %v1475_v13, 4  ;;  %v1502_v21 = vrot.slane %v1477_v15, 4 }
 0x55d   :  { %v1485_v59 = vadd.f32 %v1484_v16, %v1474_v10  ;;  %v1497_v14 = vadd.f32 %v1496_v17, %v1476_v11 }
 0x55e   :  { %v1491_v22 = vadd.f32 %v1490_v20, %v1475_v13  ;;  %v1503_v23 = vadd.f32 %v1502_v21, %v1477_v15 }
 0x55f   :  { %v1486_v24 = vrot.slane %v1485_v59, 2  ;;  %v1498_v25 = vrot.slane %v1497_v14, 2 }
 0x560   :  { %v1492_v26 = vrot.slane %v1491_v22, 2  ;;  %v1504_v27 = vrot.slane %v1503_v23, 2 }
 0x561   :  { %v1487_v28 = vadd.f32 %v1486_v24, %v1485_v59  ;;  %v1499_v29 = vadd.f32 %v1498_v25, %v1497_v14 }
 0x562   :  { %v1493_v30 = vadd.f32 %v1492_v26, %v1491_v22  ;;  %v1505_v31 = vadd.f32 %v1504_v27, %v1503_v23  ;;  %v3920_v26 = vld [vmem:[#allocation10 + $0x15] sm:$0xff]  ;;  %v3922_v27 = vld [vmem:[#allocation10 + $0x1d] sm:$0xff] }
 0x563   :  { %v1488_v32 = vrot.slane %v1487_v28, 1  ;;  %v1500_v33 = vrot.slane %v1499_v29, 1 }
 0x564   :  { %v1494_v34 = vrot.slane %v1493_v30, 1  ;;  %v1506_v35 = vrot.slane %v1505_v31, 1 }
 0x565   :  { %v1489_v36 = vadd.f32 %v1488_v32, %v1487_v28  ;;  %v1501_v39 = vadd.f32 %v1500_v33, %v1499_v29  ;;  %v1640_v28 = vrot.slane %v3920_v26, %v3798_v63  ;;  %v1689_v33 = vrot.slane %v3922_v27, %v3798_v63 }
 0x566   :  { %v1495_v40 = vadd.f32 %v1494_v34, %v1493_v30  ;;  %v1507_v41 = vadd.f32 %v1506_v35, %v1505_v31  ;;  %v1648_v30 = vrot.slane %v3920_v26, %v3857_v53  ;;  %v1644_v34 = vrot.slane %v3920_v26, %v3801_v1 }
 0x567   :  { %v1532_v0 = vmul.f32 0.125, %v1489_v36  ;;  %v1534_v42 = vmul.f32 0.125, %v1501_v39  ;;  %v1697_v39 = vrot.slane %v3922_v27, %v3857_v53 }
 0x568   :  { %v1533_v43 = vmul.f32 0.125, %v1495_v40  ;;  %v1535_v45 = vmul.f32 0.125, %v1507_v41  ;;  %v1652_v40 = vrot.slane %v3920_v26, %v3860_v54 }
 0x569   :  { %v1540_v46 = vsub.f32 %v1474_v10, %v1532_v0  ;;  %v1542_v47 = vsub.f32 %v1476_v11, %v1534_v42 }
 0x56a   :  { %v1541_v48 = vsub.f32 %v1475_v13, %v1533_v43  ;;  %v1543_v49 = vsub.f32 %v1477_v15, %v1535_v45  ;;  %v1693_v43 = vrot.slane %v3922_v27, %v3801_v1 }
 0x56b   :  { %v1548_v50 = vmul.f32 %v1540_v46, %v1540_v46  ;;  %v1550_v7 = vmul.f32 %v1542_v47, %v1542_v47 }
 0x56c   :  { %v1549_v51 = vmul.f32 %v1541_v48, %v1541_v48  ;;  %v1551_v52 = vmul.f32 %v1543_v49, %v1543_v49 }
 0x56d   :  { %v1556_v8 = vrot.slane %v1548_v50, 4  ;;  %v1568_v56 = vrot.slane %v1550_v7, 4 }
 0x56e   :  { %v1562_v57 = vrot.slane %v1549_v51, 4  ;;  %v1574_v58 = vrot.slane %v1551_v52, 4 }
 0x56f   :  { %v1557_v60 = vadd.f32 %v1556_v8, %v1548_v50  ;;  %v1569_v61 = vadd.f32 %v1568_v56, %v1550_v7  ;;  %v1701_v50 = vrot.slane %v3922_v27, %v3860_v54 }
 0x570   :  { %v1563_v3 = vadd.f32 %v1562_v57, %v1549_v51  ;;  %v1575_v4 = vadd.f32 %v1574_v58, %v1551_v52 }
 0x571   :  { %v1558_v37 = vrot.slane %v1557_v60, 2  ;;  %v1570_v5 = vrot.slane %v1569_v61, 2 }
 0x572   :  { %v1564_v6 = vrot.slane %v1563_v3, 2  ;;  %v1576_v12 = vrot.slane %v1575_v4, 2 }
 0x573   :  { %v1559_v10 = vadd.f32 %v1558_v37, %v1557_v60  ;;  %v1571_v11 = vadd.f32 %v1570_v5, %v1569_v61 }
 0x574   :  { %v1565_v38 = vadd.f32 %v1564_v6, %v1563_v3  ;;  %v1577_v44 = vadd.f32 %v1576_v12, %v1575_v4 }
 0x575   :  { %v1560_v13 = vrot.slane %v1559_v10, 1  ;;  %v1572_v15 = vrot.slane %v1571_v11, 1 }
 0x576   :  { %v1566_v55 = vrot.slane %v1565_v38, 1  ;;  %v1578_v9 = vrot.slane %v1577_v44, 1 }
 0x577   :  { %v1561_v16 = vadd.f32 %v1560_v13, %v1559_v10  ;;  %v1573_v17 = vadd.f32 %v1572_v15, %v1571_v11 }
 0x578   :  { %v1567_v18 = vadd.f32 %v1566_v55, %v1565_v38  ;;  %v1579_v19 = vadd.f32 %v1578_v9, %v1577_v44 }
 0x579   :  { %v1604_v20 = vmul.f32 0.125, %v1561_v16  ;;  %v1606_v21 = vmul.f32 0.125, %v1573_v17  ;;  %v3949_v16 = vsub.s32 4, %v3795_v62  ;;  %v3952_v17 = vsub.s32 6, %v3795_v62 }
 0x57a   :  { %v1605_v59 = vmul.f32 0.125, %v1567_v18  ;;  %v1607_v14 = vmul.f32 0.125, %v1579_v19  ;;  %v3955_v18 = vsub.s32 5, %v3795_v62  ;;  %v3958_v19 = vsub.s32 7, %v3795_v62 }
 0x57b   :  { %v1612_v22 = vadd.f32 1e-05, %v1604_v20  ;;  %v1614_v23 = vadd.f32 1e-05, %v1606_v21  ;;  %v1453_v20 = vrot.slane %v3910_v2, %v3949_v16  ;;  %v1461_v21 = vrot.slane %v3910_v2, %v3952_v17 }
 0x57c   :  { %v1613_v24 = vadd.f32 1e-05, %v1605_v59  ;;  %v1615_v25 = vadd.f32 1e-05, %v1607_v14  ;;  %v1457_v59 = vrot.slane %v3910_v2, %v3955_v18  ;;  %v1465_v14 = vrot.slane %v3910_v2, %v3958_v19 }
 0x57d   :  { %3484 = vrsqrt.f32 %v1612_v22 }
 0x57e   :  { %3486 = vrsqrt.f32 %v1614_v23 }
 0x57f   :  { %3488 = vrsqrt.f32 %v1613_v24 }
 0x580   :  { %3490 = vrsqrt.f32 %v1615_v25 }
 0x587   :  { %v3485_v29 = vpop.eup %3484 }
 0x588   :  { %v3487_v31 = vpop.eup %3486  ;;  %v1628_v32 = vmul.f32 %v3485_v29, %v1540_v46 }
 0x589   :  { %v3489_v35 = vpop.eup %3488  ;;  %v1630_v36 = vmul.f32 %v3487_v31, %v1542_v47 }
 0x58a   :  { %v3491_v41 = vpop.eup %3490  ;;  %v1677_v0 = vmul.f32 %v1640_v28, %v1628_v32  ;;  %v1629_v42 = vmul.f32 %v3489_v35, %v1541_v48 }
 0x58b   :  { %v1679_v45 = vmul.f32 %v1648_v30, %v1630_v36  ;;  %v1631_v46 = vmul.f32 %v3491_v41, %v1543_v49 }
 0x58c   :  { %v1726_v7 = vadd.f32 %v1689_v33, %v1677_v0  ;;  %v1678_v51 = vmul.f32 %v1644_v34, %v1629_v42 }
 0x58d   :  { %v1728_v47 = vadd.f32 %v1697_v39, %v1679_v45  ;;  %v1680_v52 = vmul.f32 %v1652_v40, %v1631_v46 }
 0x58e   :  { %v1742_v8 = vmul.f32 0.70710677, %v1726_v7  ;;  %v1727_v56 = vadd.f32 %v1693_v43, %v1678_v51  ;;  %v1734_v49 = vmul.f32 0.5, %v1726_v7 }
 0x58f   :  { %v1744_v57 = vmul.f32 0.70710677, %v1728_v47  ;;  %v1729_v58 = vadd.f32 %v1701_v50, %v1680_v52  ;;  %v1736_v5 = vmul.f32 0.5, %v1728_v47 }
 0x590   :  { %3492 = verf.f32 %v1742_v8  ;;  %v1743_v60 = vmul.f32 0.70710677, %v1727_v56  ;;  %v1735_v11 = vmul.f32 0.5, %v1727_v56 }
 0x591   :  { %3494 = verf.f32 %v1744_v57  ;;  %v1745_v48 = vmul.f32 0.70710677, %v1729_v58  ;;  %v1737_v13 = vmul.f32 0.5, %v1729_v58 }
 0x592   :  { %3496 = verf.f32 %v1743_v60 }
 0x593   :  { %3498 = verf.f32 %v1745_v48 }
 0x59a   :  { %v3493_v61 = vpop.eup %3492 }
 0x59b   :  { %v3495_v3 = vpop.eup %3494  ;;  %v1758_v4 = vadd.f32 1.0, %v3493_v61 }
 0x59c   :  { %v3497_v37 = vpop.eup %3496  ;;  %v1760_v6 = vadd.f32 1.0, %v3495_v3 }
 0x59d   :  { %v3499_v12 = vpop.eup %3498  ;;  %v3940_v10 = vmul.f32 %v1758_v4, %v1734_v49  ;;  %v1759_v38 = vadd.f32 1.0, %v3497_v37 }
 0x59e   :  { %v3942_v44 = vmul.f32 %v1760_v6, %v1736_v5  ;;  %v1761_v15 = vadd.f32 1.0, %v3499_v12 }
 0x59f   :  { %v3944_v55 = vmul.f32 %v1759_v38, %v1735_v11 }
 0x5a0   :  { %v3946_v9 = vmul.f32 %v1761_v15, %v1737_v13 }
 0x5d8   :  { %v1343_v22 = vpop.f32.mrb[8].mxu0  ;;  %v1425_v23 = vpop.f32.mrb[16].mxu1 }
 0x5d9   :  { %v1478_v24 = vmul.f32 %v1453_v20, %v1343_v22  ;;  %v1480_v25 = vmul.f32 %v1461_v21, %v1425_v23  ;;  %v1345_v28 = vpop.f32.mrb[9].mxu0  ;;  %v1427_v29 = vpop.f32.mrb[17].mxu1 }
 0x5da   :  { %v1479_v62 = vmul.f32 %v1457_v59, %v1345_v28  ;;  %v1481_v30 = vmul.f32 %v1465_v14, %v1427_v29  ;;  %v1347_v31 = vpop.f32.mrb[10].mxu0  ;;  %v1429_v32 = vpop.f32.mrb[18].mxu1 }
 0x5db   :  { %v1508_v33 = vrot.slane %v1478_v24, 4  ;;  %v1520_v34 = vrot.slane %v1480_v25, 4  ;;  %v1348_v35 = vpop.f32.mrb[11].mxu0  ;;  %v1430_v36 = vpop.f32.mrb[19].mxu1 }
 0x5dc   :  { %v1514_v39 = vrot.slane %v1479_v62, 4  ;;  %v1526_v40 = vrot.slane %v1481_v30, 4 }
 0x5dd   :  { %v1509_v41 = vadd.f32 %v1508_v33, %v1478_v24  ;;  %v1521_v0 = vadd.f32 %v1520_v34, %v1480_v25 }
 0x5de   :  { %v1515_v42 = vadd.f32 %v1514_v39, %v1479_v62  ;;  %v1527_v2 = vadd.f32 %v1526_v40, %v1481_v30 }
 0x5df   :  { %v1510_v43 = vrot.slane %v1509_v41, 2  ;;  %v1522_v45 = vrot.slane %v1521_v0, 2 }
 0x5e0   :  { %v1516_v46 = vrot.slane %v1515_v42, 2  ;;  %v1528_v50 = vrot.slane %v1527_v2, 2 }
 0x5e1   :  { %v1511_v7 = vadd.f32 %v1510_v43, %v1509_v41  ;;  %v1523_v51 = vadd.f32 %v1522_v45, %v1521_v0 }
 0x5e2   :  { %v1517_v47 = vadd.f32 %v1516_v46, %v1515_v42  ;;  %v1529_v52 = vadd.f32 %v1528_v50, %v1527_v2 }
 0x5e3   :  { %v1512_v8 = vrot.slane %v1511_v7, 1  ;;  %v1524_v56 = vrot.slane %v1523_v51, 1 }
 0x5e4   :  { %v1518_v57 = vrot.slane %v1517_v47, 1  ;;  %v1530_v58 = vrot.slane %v1529_v52, 1 }
 0x5e5   :  { %v1513_v60 = vadd.f32 %v1512_v8, %v1511_v7  ;;  %v1525_v48 = vadd.f32 %v1524_v56, %v1523_v51 }
 0x5e6   :  { %v1519_v61 = vadd.f32 %v1518_v57, %v1517_v47  ;;  %v1531_v3 = vadd.f32 %v1530_v58, %v1529_v52  ;;  %v1656_v57 = vrot.slane %v3920_v26, %v3949_v16 }
 0x5e7   :  { %v1536_v49 = vmul.f32 0.125, %v1513_v60  ;;  %v1538_v4 = vmul.f32 0.125, %v1525_v48  ;;  %v1664_v60 = vrot.slane %v3920_v26, %v3952_v17 }
 0x5e8   :  { %v1537_v37 = vmul.f32 0.125, %v1519_v61  ;;  %v1539_v5 = vmul.f32 0.125, %v1531_v3  ;;  %v1705_v3 = vrot.slane %v3922_v27, %v3949_v16 }
 0x5e9   :  { %v1544_v6 = vsub.f32 %v1478_v24, %v1536_v49  ;;  %v1546_v12 = vsub.f32 %v1480_v25, %v1538_v4  ;;  %v1660_v49 = vrot.slane %v3920_v26, %v3955_v18 }
 0x5ea   :  { %v1545_v11 = vsub.f32 %v1479_v62, %v1537_v37  ;;  %v1547_v38 = vsub.f32 %v1481_v30, %v1539_v5  ;;  %v1713_v5 = vrot.slane %v3922_v27, %v3952_v17 }
 0x5eb   :  { %v1552_v13 = vmul.f32 %v1544_v6, %v1544_v6  ;;  %v1554_v15 = vmul.f32 %v1546_v12, %v1546_v12 }
 0x5ec   :  { %v1553_v20 = vmul.f32 %v1545_v11, %v1545_v11  ;;  %v1555_v21 = vmul.f32 %v1547_v38, %v1547_v38 }
 0x5ed   :  { %v1580_v59 = vrot.slane %v1552_v13, 4  ;;  %v1592_v14 = vrot.slane %v1554_v15, 4 }
 0x5ee   :  { %v1586_v22 = vrot.slane %v1553_v20, 4  ;;  %v1598_v23 = vrot.slane %v1555_v21, 4 }
 0x5ef   :  { %v1581_v28 = vadd.f32 %v1580_v59, %v1552_v13  ;;  %v1593_v29 = vadd.f32 %v1592_v14, %v1554_v15  ;;  %v1668_v13 = vrot.slane %v3920_v26, %v3958_v19 }
 0x5f0   :  { %v1587_v31 = vadd.f32 %v1586_v22, %v1553_v20  ;;  %v1599_v32 = vadd.f32 %v1598_v23, %v1555_v21  ;;  %v1717_v22 = vrot.slane %v3922_v27, %v3958_v19 }
 0x5f1   :  { %v1582_v33 = vrot.slane %v1581_v28, 2  ;;  %v1594_v34 = vrot.slane %v1593_v29, 2 }
 0x5f2   :  { %v1588_v35 = vrot.slane %v1587_v31, 2  ;;  %v1600_v36 = vrot.slane %v1599_v32, 2 }
 0x5f3   :  { %v1583_v24 = vadd.f32 %v1582_v33, %v1581_v28  ;;  %v1595_v25 = vadd.f32 %v1594_v34, %v1593_v29 }
 0x5f4   :  { %v1589_v62 = vadd.f32 %v1588_v35, %v1587_v31  ;;  %v1601_v30 = vadd.f32 %v1600_v36, %v1599_v32 }
 0x5f5   :  { %v1584_v39 = vrot.slane %v1583_v24, 1  ;;  %v1596_v40 = vrot.slane %v1595_v25, 1 }
 0x5f6   :  { %v1590_v41 = vrot.slane %v1589_v62, 1  ;;  %v1602_v0 = vrot.slane %v1601_v30, 1 }
 0x5f7   :  { %v1585_v42 = vadd.f32 %v1584_v39, %v1583_v24  ;;  %v1597_v2 = vadd.f32 %v1596_v40, %v1595_v25 }
 0x5f8   :  { %v1591_v43 = vadd.f32 %v1590_v41, %v1589_v62  ;;  %v1603_v45 = vadd.f32 %v1602_v0, %v1601_v30 }
 0x5f9   :  { %v1608_v46 = vmul.f32 0.125, %v1585_v42  ;;  %v1610_v50 = vmul.f32 0.125, %v1597_v2 }
 0x5fa   :  { %v1609_v7 = vmul.f32 0.125, %v1591_v43  ;;  %v1611_v51 = vmul.f32 0.125, %v1603_v45 }
 0x5fb   :  { %v1616_v47 = vadd.f32 1e-05, %v1608_v46  ;;  %v1618_v52 = vadd.f32 1e-05, %v1610_v50 }
 0x5fc   :  { %v1617_v8 = vadd.f32 1e-05, %v1609_v7  ;;  %v1619_v56 = vadd.f32 1e-05, %v1611_v51 }
 0x5fd   :  { %3500 = vrsqrt.f32 %v1616_v47 }
 0x5fe   :  { %3502 = vrsqrt.f32 %v1618_v52 }
 0x5ff   :  { %3504 = vrsqrt.f32 %v1617_v8 }
 0x600   :  { %3506 = vrsqrt.f32 %v1619_v56 }
 0x607   :  { %v3501_v58 = vpop.eup %3500 }
 0x608   :  { %v3503_v48 = vpop.eup %3502  ;;  %v1632_v61 = vmul.f32 %v3501_v58, %v1544_v6  ;;  %v1709_v6 = vrot.slane %v3922_v27, %v3955_v18 }
 0x609   :  { %v3505_v4 = vpop.eup %3504  ;;  %v1634_v37 = vmul.f32 %v3503_v48, %v1546_v12 }
 0x60a   :  { %v3507_v15 = vpop.eup %3506  ;;  %v1681_v20 = vmul.f32 %v1656_v57, %v1632_v61  ;;  %v1633_v21 = vmul.f32 %v3505_v4, %v1545_v11 }
 0x60b   :  { %v1683_v59 = vmul.f32 %v1664_v60, %v1634_v37  ;;  %v1635_v14 = vmul.f32 %v3507_v15, %v1547_v38 }
 0x60c   :  { %v1730_v23 = vadd.f32 %v1705_v3, %v1681_v20  ;;  %v1682_v28 = vmul.f32 %v1660_v49, %v1633_v21 }
 0x60d   :  { %v1732_v12 = vadd.f32 %v1713_v5, %v1683_v59  ;;  %v1684_v29 = vmul.f32 %v1668_v13, %v1635_v14 }
 0x60e   :  { %v1746_v31 = vmul.f32 0.70710677, %v1730_v23  ;;  %v1731_v32 = vadd.f32 %v1709_v6, %v1682_v28  ;;  %v1738_v38 = vmul.f32 0.5, %v1730_v23 }
 0x60f   :  { %v1748_v33 = vmul.f32 0.70710677, %v1732_v12  ;;  %v1733_v34 = vadd.f32 %v1717_v22, %v1684_v29  ;;  %v1740_v27 = vmul.f32 0.5, %v1732_v12 }
 0x610   :  { %3508 = verf.f32 %v1746_v31  ;;  %v1747_v26 = vmul.f32 0.70710677, %v1731_v32  ;;  %v1739_v39 = vmul.f32 0.5, %v1731_v32 }
 0x611   :  { %3510 = verf.f32 %v1748_v33  ;;  %v1749_v11 = vmul.f32 0.70710677, %v1733_v34  ;;  %v1741_v0 = vmul.f32 0.5, %v1733_v34 }
 0x612   :  { %3512 = verf.f32 %v1747_v26 }
 0x613   :  { %3514 = verf.f32 %v1749_v11 }
 0x61a   :  { %v3509_v35 = vpop.eup %3508 }
 0x61b   :  { %v3511_v36 = vpop.eup %3510  ;;  %v1762_v24 = vadd.f32 1.0, %v3509_v35 }
 0x61c   :  { %v3513_v25 = vpop.eup %3512  ;;  %v1764_v19 = vadd.f32 1.0, %v3511_v36 }
 0x61d   :  { %v3515_v62 = vpop.eup %3514  ;;  %v3984_v30 = vmul.f32 %v1762_v24, %v1738_v38  ;;  %v1763_v40 = vadd.f32 1.0, %v3513_v25 }
 0x61e   :  { %v3986_v41 = vmul.f32 %v1764_v19, %v1740_v27  ;;  %v1765_v42 = vadd.f32 1.0, %v3515_v62 }
 0x61f   :  { %v3988_v2 = vmul.f32 %v1763_v40, %v1739_v39 }
 0x620   :  { %v3990_v43 = vmul.f32 %v1765_v42, %v1741_v0 }
 0x621   :  { %3684 = dma.done.wait [#allocation4 + $0x1], 28672 }
 0x622   :  { %3685 = vsyncadd [#allocation4 + $0x1], 4294938624  ;;  %v3994_v45 = vpack.c.bf16 %v3944_v55, %v3944_v55  ;;  %v1779_v46 = vld [vmem:[#allocation3 + $0x8] sm:$0xff]  ;;  %v1781_v50 = vld [vmem:[#allocation3 + $0x18] sm:$0xff] }
 0x623   :  { %v1778_v7 = vld [vmem:[#allocation3] sm:$0xff]  ;;  %v2003_v51 = vunpack.c.l.s8.bf16 %v1779_v46  ;;  %v2010_v47 = vunpack.c.h.s8.bf16 %v1779_v46  ;;  %v2005_v52 = vunpack.c.l.s8.bf16 %v1781_v50  ;;  %v2012_v8 = vunpack.c.h.s8.bf16 %v1781_v50  ;;  %v1780_v56 = vld [vmem:[#allocation3 + $0x10] sm:$0xff]  ;;  %v1785_v4 = vld [vmem:[#allocation3 + $0x38] sm:$0xff] }
 0x624   :  { %2490 = vmatprep.mubr.bf16.mxu0 %v3994_v45  ;;  %2654 = vmatprep.mubr.bf16.mxu1 %v3994_v45  ;;  %v2002_v57 = vunpack.c.l.s8.bf16 %v1778_v7  ;;  %v2004_v58 = vunpack.c.l.s8.bf16 %v1780_v56  ;;  %v1786_v60 = vld [vmem:[#allocation3 + $0x40] sm:$0xff]  ;;  %v1788_v48 = vld [vmem:[#allocation3 + $0x50] sm:$0xff]  ;;  %v2009_v55 = vunpack.c.h.s8.bf16 %v1778_v7  ;;  %v2011_v61 = vunpack.c.h.s8.bf16 %v1780_v56  ;;  %v1787_v37 = vld [vmem:[#allocation3 + $0x48] sm:$0xff] }
 0x625   :  { %2458 = vmatprep.subr.bf16.mxu0 %v2003_v51  ;;  %2622 = vmatprep.subr.bf16.mxu1 %v2005_v52  ;;  %v2017_v3 = vunpack.c.l.s8.bf16 %v1786_v60  ;;  %v2019_v49 = vunpack.c.l.s8.bf16 %v1788_v48  ;;  %v2016_v5 = vunpack.c.l.s8.bf16 %v1785_v4  ;;  %v2018_v13 = vunpack.c.l.s8.bf16 %v1787_v37  ;;  %v1793_v21 = vld [vmem:[#allocation3 + $0x78] sm:$0xff]  ;;  %v1795_v6 = vld [vmem:[#allocation3 + $0x88] sm:$0xff]  ;;  %v1792_v28 = vld [vmem:[#allocation3 + $0x70] sm:$0xff] }
 0x626   :  { %2459 = vmatpush1.bf16.msra.mxu0 %v2002_v57  ;;  %2623 = vmatpush1.bf16.msra.mxu1 %v2004_v58  ;;  %v2024_v15 = vunpack.c.h.s8.bf16 %v1786_v60  ;;  %v2026_v20 = vunpack.c.h.s8.bf16 %v1788_v48  ;;  %v2023_v59 = vunpack.c.h.s8.bf16 %v1785_v4  ;;  %v2025_v14 = vunpack.c.h.s8.bf16 %v1787_v37  ;;  %v1794_v12 = vld [vmem:[#allocation3 + $0x80] sm:$0xff]  ;;  %v1800_v34 = vld [vmem:[#allocation3 + $0xb0] sm:$0xff]  ;;  %v1799_v24 = vld [vmem:[#allocation3 + $0xa8] sm:$0xff] }
 0x627   :  { %2460 = vmatprep.subr.bf16.mxu0 %v2010_v47  ;;  %2624 = vmatprep.subr.bf16.mxu1 %v2012_v8  ;;  %v2031_v22 = vunpack.c.l.s8.bf16 %v1793_v21  ;;  %v2033_v23 = vunpack.c.l.s8.bf16 %v1795_v6  ;;  %v2030_v29 = vunpack.c.l.s8.bf16 %v1792_v28  ;;  %v2032_v31 = vunpack.c.l.s8.bf16 %v1794_v12  ;;  %v1802_v26 = vld [vmem:[#allocation3 + $0xc0] sm:$0xff]  ;;  %v1801_v25 = vld [vmem:[#allocation3 + $0xb8] sm:$0xff]  ;;  %v1807_v40 = vld [vmem:[#allocation3 + $0xe8] sm:$0xff] }
 0x628   :  { %v2038_v32 = vunpack.c.h.s8.bf16 %v1793_v21  ;;  %v2040_v33 = vunpack.c.h.s8.bf16 %v1795_v6  ;;  %v2037_v11 = vunpack.c.h.s8.bf16 %v1792_v28  ;;  %v2039_v35 = vunpack.c.h.s8.bf16 %v1794_v12  ;;  %v1809_v0 = vld [vmem:[#allocation3 + $0xf8] sm:$0xff]  ;;  %v1806_v51 = vld [vmem:[#allocation3 + $0xe0] sm:$0xff]  ;;  %v1808_v47 = vld [vmem:[#allocation3 + $0xf0] sm:$0xff] }
 0x629   :  { %v2045_v36 = vunpack.c.l.s8.bf16 %v1800_v34  ;;  %v2047_v38 = vunpack.c.l.s8.bf16 %v1802_v26  ;;  %v2044_v27 = vunpack.c.l.s8.bf16 %v1799_v24  ;;  %v2046_v19 = vunpack.c.l.s8.bf16 %v1801_v25  ;;  %v1814_v58 = vld [vmem:[#allocation3 + $0x120] sm:$0xff]  ;;  %v1816_v60 = vld [vmem:[#allocation3 + $0x130] sm:$0xff]  ;;  %v1815_v4 = vld [vmem:[#allocation3 + $0x128] sm:$0xff] }
 0x62a   :  { %2461 = vmatpush1.bf16.msra.mxu0 %v2009_v55  ;;  %2625 = vmatpush1.bf16.msra.mxu1 %v2011_v61  ;;  %v2052_v62 = vunpack.c.h.s8.bf16 %v1800_v34  ;;  %v2054_v39 = vunpack.c.h.s8.bf16 %v1802_v26  ;;  %v2051_v42 = vunpack.c.h.s8.bf16 %v1799_v24  ;;  %v2053_v46 = vunpack.c.h.s8.bf16 %v1801_v25  ;;  %v1823_v21 = vld [vmem:[#allocation3 + $0x168] sm:$0xff]  ;;  %v1822_v28 = vld [vmem:[#allocation3 + $0x160] sm:$0xff]  ;;  %v1829_v24 = vld [vmem:[#allocation3 + $0x198] sm:$0xff] }
 0x62b   :  { %2462 = vmatprep.subr.bf16.mxu0 %v2017_v3  ;;  %2626 = vmatprep.subr.bf16.mxu1 %v2019_v49  ;;  %v2059_v50 = vunpack.c.l.s8.bf16 %v1807_v40  ;;  %v2061_v7 = vunpack.c.l.s8.bf16 %v1809_v0  ;;  %v2058_v52 = vunpack.c.l.s8.bf16 %v1806_v51  ;;  %v2060_v8 = vunpack.c.l.s8.bf16 %v1808_v47  ;;  %v1813_v49 = vld [vmem:[#allocation3 + $0x118] sm:$0xff]  ;;  %v1830_v34 = vld [vmem:[#allocation3 + $0x1a0] sm:$0xff] }
 0x62c   :  { %v2066_v56 = vunpack.c.h.s8.bf16 %v1807_v40  ;;  %v2068_v57 = vunpack.c.h.s8.bf16 %v1809_v0  ;;  %v2065_v48 = vunpack.c.h.s8.bf16 %v1806_v51  ;;  %v2067_v55 = vunpack.c.h.s8.bf16 %v1808_v47  ;;  %v1837_v40 = vld [vmem:[#allocation3 + $0x1d8] sm:$0xff]  ;;  %v1836_v51 = vld [vmem:[#allocation3 + $0x1d0] sm:$0xff] }
 0x62d   :  { %v2073_v61 = vunpack.c.l.s8.bf16 %v1814_v58  ;;  %v2075_v3 = vunpack.c.l.s8.bf16 %v1816_v60  ;;  %v2072_v37 = vunpack.c.l.s8.bf16 %v1813_v49  ;;  %v2079_v6 = vunpack.c.h.s8.bf16 %v1813_v49  ;;  %v1841_v49 = vld [vmem:[#allocation3 + $0x1f8] sm:$0xff] }
 0x62e   :  { %2463 = vmatpush1.bf16.msra.mxu0 %v2016_v5  ;;  %2627 = vmatpush1.bf16.msra.mxu1 %v2018_v13  ;;  %v2074_v5 = vunpack.c.l.s8.bf16 %v1815_v4  ;;  %v2080_v13 = vunpack.c.h.s8.bf16 %v1814_v58  ;;  %v4000_v47 = vpack.c.bf16 %v3940_v10, %v3940_v10  ;;  %v1842_v58 = vld [vmem:[#allocation3 + $0x200] sm:$0xff] }
 0x62f   :  { %2464 = vmatprep.subr.bf16.mxu0 %v2024_v15  ;;  %2628 = vmatprep.subr.bf16.mxu1 %v2026_v20  ;;  %v2082_v15 = vunpack.c.h.s8.bf16 %v1816_v60  ;;  %v1821_v20 = vld [vmem:[#allocation3 + $0x158] sm:$0xff]  ;;  %v1844_v60 = vld [vmem:[#allocation3 + $0x210] sm:$0xff] }
 0x632   :  { %2465 = vmatpush1.bf16.msra.mxu0 %v2023_v59  ;;  %2629 = vmatpush1.bf16.msra.mxu1 %v2025_v14  ;;  %v2081_v59 = vunpack.c.h.s8.bf16 %v1815_v4  ;;  %v2087_v14 = vunpack.c.l.s8.bf16 %v1821_v20  ;;  %v1843_v4 = vld [vmem:[#allocation3 + $0x208] sm:$0xff] }
 0x633   :  { %2466 = vmatprep.subr.bf16.mxu0 %v2031_v22  ;;  %2630 = vmatprep.subr.bf16.mxu1 %v2033_v23  ;;  %v2089_v22 = vunpack.c.l.s8.bf16 %v1823_v21  ;;  %v1820_v23 = vld [vmem:[#allocation3 + $0x150] sm:$0xff] }
 0x634   :  { %v2086_v12 = vunpack.c.l.s8.bf16 %v1820_v23  ;;  %v2093_v26 = vunpack.c.h.s8.bf16 %v1820_v23  ;;  %v1850_v23 = vld [vmem:[#allocation3 + $0x240] sm:$0xff] }
 0x636   :  { %2467 = vmatpush1.bf16.msra.mxu0 %v2030_v29  ;;  %2631 = vmatpush1.bf16.msra.mxu1 %v2032_v31  ;;  %v2088_v29 = vunpack.c.l.s8.bf16 %v1822_v28  ;;  %v2094_v31 = vunpack.c.h.s8.bf16 %v1821_v20  ;;  %v1851_v20 = vld [vmem:[#allocation3 + $0x248] sm:$0xff] }
 0x637   :  { %2468 = vmatprep.subr.bf16.mxu0 %v2038_v32  ;;  %2632 = vmatprep.subr.bf16.mxu1 %v2040_v33  ;;  %v2096_v32 = vunpack.c.h.s8.bf16 %v1823_v21  ;;  %v1828_v33 = vld [vmem:[#allocation3 + $0x190] sm:$0xff]  ;;  %v2135_v21 = vunpack.c.h.s8.bf16 %v1841_v49 }
 0x63a   :  { %2469 = vmatpush1.bf16.msra.mxu0 %v2037_v11  ;;  %2633 = vmatpush1.bf16.msra.mxu1 %v2039_v35  ;;  %v2095_v11 = vunpack.c.h.s8.bf16 %v1822_v28  ;;  %v2101_v35 = vunpack.c.l.s8.bf16 %v1828_v33 }
 0x63b   :  { %2470 = vmatprep.subr.bf16.mxu0 %v2045_v36  ;;  %2634 = vmatprep.subr.bf16.mxu1 %v2047_v38  ;;  %v2103_v36 = vunpack.c.l.s8.bf16 %v1830_v34  ;;  %v1827_v38 = vld [vmem:[#allocation3 + $0x188] sm:$0xff] }
 0x63c   :  { %v2100_v25 = vunpack.c.l.s8.bf16 %v1827_v38  ;;  %v2107_v0 = vunpack.c.h.s8.bf16 %v1827_v38  ;;  %v1857_v38 = vld [vmem:[#allocation3 + $0x278] sm:$0xff] }
 0x63e   :  { %2471 = vmatpush1.bf16.msra.mxu0 %v2044_v27  ;;  %2635 = vmatpush1.bf16.msra.mxu1 %v2046_v19  ;;  %v2102_v27 = vunpack.c.l.s8.bf16 %v1829_v24  ;;  %v2108_v19 = vunpack.c.h.s8.bf16 %v1828_v33  ;;  %v1858_v33 = vld [vmem:[#allocation3 + $0x280] sm:$0xff] }
 0x63f   :  { %2472 = vmatprep.subr.bf16.mxu0 %v2052_v62  ;;  %2636 = vmatprep.subr.bf16.mxu1 %v2054_v39  ;;  %v2110_v62 = vunpack.c.h.s8.bf16 %v1830_v34  ;;  %v1835_v39 = vld [vmem:[#allocation3 + $0x1c8] sm:$0xff] }
 0x642   :  { %2473 = vmatpush1.bf16.msra.mxu0 %v2051_v42  ;;  %2637 = vmatpush1.bf16.msra.mxu1 %v2053_v46  ;;  %v2109_v42 = vunpack.c.h.s8.bf16 %v1829_v24  ;;  %v2115_v46 = vunpack.c.l.s8.bf16 %v1835_v39 }
 0x643   :  { %2474 = vmatprep.subr.bf16.mxu0 %v2059_v50  ;;  %2638 = vmatprep.subr.bf16.mxu1 %v2061_v7  ;;  %v2117_v50 = vunpack.c.l.s8.bf16 %v1837_v40  ;;  %v1834_v7 = vld [vmem:[#allocation3 + $0x1c0] sm:$0xff] }
 0x644   :  { %v2121_v10 = vunpack.c.h.s8.bf16 %v1834_v7 }
 0x646   :  { %2475 = vmatpush1.bf16.msra.mxu0 %v2058_v52  ;;  %2639 = vmatpush1.bf16.msra.mxu1 %v2060_v8  ;;  %v2114_v52 = vunpack.c.l.s8.bf16 %v1834_v7  ;;  %v2116_v8 = vunpack.c.l.s8.bf16 %v1836_v51  ;;  %v1864_v7 = vld [vmem:[#allocation3 + $0x2b0] sm:$0xff] }
 0x647   :  { %2476 = vmatprep.subr.bf16.mxu0 %v2066_v56  ;;  %2640 = vmatprep.subr.bf16.mxu1 %v2068_v57  ;;  %v2122_v56 = vunpack.c.h.s8.bf16 %v1835_v39  ;;  %v2124_v57 = vunpack.c.h.s8.bf16 %v1837_v40  ;;  %v1865_v39 = vld [vmem:[#allocation3 + $0x2b8] sm:$0xff] }
 0x64a   :  { %2477 = vmatpush1.bf16.msra.mxu0 %v2065_v48  ;;  %2641 = vmatpush1.bf16.msra.mxu1 %v2067_v55  ;;  %v4004_v48 = vpack.c.bf16 %v3946_v9, %v3946_v9  ;;  %v2123_v55 = vunpack.c.h.s8.bf16 %v1836_v51  ;;  %v2128_v9 = vunpack.c.l.s8.bf16 %v1841_v49  ;;  %v1871_v49 = vld [vmem:[#allocation3 + $0x2e8] sm:$0xff] }
 0x64b   :  { %2478 = vmatprep.subr.bf16.mxu0 %v2073_v61  ;;  %2642 = vmatprep.subr.bf16.mxu1 %v2075_v3  ;;  %v2129_v61 = vunpack.c.l.s8.bf16 %v1842_v58  ;;  %v2131_v3 = vunpack.c.l.s8.bf16 %v1844_v60 }
 0x64e   :  { %2479 = vmatpush1.bf16.msra.mxu0 %v2072_v37  ;;  %2643 = vmatpush1.bf16.msra.mxu1 %v2074_v5  ;;  %v2130_v37 = vunpack.c.l.s8.bf16 %v1843_v4  ;;  %v2136_v5 = vunpack.c.h.s8.bf16 %v1842_v58  ;;  %v1872_v58 = vld [vmem:[#allocation3 + $0x2f0] sm:$0xff] }
 0x64f   :  { %2480 = vmatprep.subr.bf16.mxu0 %v2080_v13  ;;  %2644 = vmatprep.subr.bf16.mxu1 %v2082_v15  ;;  %v2138_v13 = vunpack.c.h.s8.bf16 %v1844_v60  ;;  %v1849_v15 = vld [vmem:[#allocation3 + $0x238] sm:$0xff] }
 0x652   :  { %2481 = vmatpush1.bf16.msra.mxu0 %v2079_v6  ;;  %2645 = vmatpush1.bf16.msra.mxu1 %v2081_v59  ;;  %v2137_v6 = vunpack.c.h.s8.bf16 %v1843_v4  ;;  %v2143_v59 = vunpack.c.l.s8.bf16 %v1849_v15 }
 0x653   :  { %2482 = vmatprep.subr.bf16.mxu0 %v2087_v14  ;;  %2646 = vmatprep.subr.bf16.mxu1 %v2089_v22  ;;  %v2145_v14 = vunpack.c.l.s8.bf16 %v1851_v20  ;;  %v1848_v22 = vld [vmem:[#allocation3 + $0x230] sm:$0xff] }
 0x654   :  { %v2142_v28 = vunpack.c.l.s8.bf16 %v1848_v22  ;;  %v2149_v34 = vunpack.c.h.s8.bf16 %v1848_v22  ;;  %v1878_v22 = vld [vmem:[#allocation3 + $0x320] sm:$0xff] }
 0x656   :  { %2483 = vmatpush1.bf16.msra.mxu0 %v2086_v12  ;;  %2647 = vmatpush1.bf16.msra.mxu1 %v2088_v29  ;;  %v2144_v12 = vunpack.c.l.s8.bf16 %v1850_v23  ;;  %v2150_v29 = vunpack.c.h.s8.bf16 %v1849_v15  ;;  %v1879_v15 = vld [vmem:[#allocation3 + $0x328] sm:$0xff] }
 0x657   :  { %2484 = vmatprep.subr.bf16.mxu0 %v2094_v31  ;;  %2648 = vmatprep.subr.bf16.mxu1 %v2096_v32  ;;  %v2152_v31 = vunpack.c.h.s8.bf16 %v1851_v20  ;;  %v1856_v32 = vld [vmem:[#allocation3 + $0x270] sm:$0xff] }
 0x65a   :  { %2485 = vmatpush1.bf16.msra.mxu0 %v2093_v26  ;;  %2649 = vmatpush1.bf16.msra.mxu1 %v2095_v11  ;;  %v2151_v26 = vunpack.c.h.s8.bf16 %v1850_v23  ;;  %v2157_v11 = vunpack.c.l.s8.bf16 %v1856_v32 }
 0x65b   :  { %2486 = vmatprep.subr.bf16.mxu0 %v2101_v35  ;;  %2650 = vmatprep.subr.bf16.mxu1 %v2103_v36  ;;  %v2159_v35 = vunpack.c.l.s8.bf16 %v1858_v33  ;;  %v1855_v36 = vld [vmem:[#allocation3 + $0x268] sm:$0xff] }
 0x65c   :  { %v2156_v24 = vunpack.c.l.s8.bf16 %v1855_v36  ;;  %v2163_v40 = vunpack.c.h.s8.bf16 %v1855_v36  ;;  %v1885_v36 = vld [vmem:[#allocation3 + $0x358] sm:$0xff] }
 0x65e   :  { %2487 = vmatpush1.bf16.msra.mxu0 %v2100_v25  ;;  %2651 = vmatpush1.bf16.msra.mxu1 %v2102_v27  ;;  %v2158_v25 = vunpack.c.l.s8.bf16 %v1857_v38  ;;  %v2164_v27 = vunpack.c.h.s8.bf16 %v1856_v32  ;;  %v1886_v32 = vld [vmem:[#allocation3 + $0x360] sm:$0xff] }
 0x65f   :  { %2488 = vmatprep.subr.bf16.mxu0 %v2108_v19  ;;  %2652 = vmatprep.subr.bf16.mxu1 %v2110_v62  ;;  %v2166_v19 = vunpack.c.h.s8.bf16 %v1858_v33  ;;  %v1863_v62 = vld [vmem:[#allocation3 + $0x2a8] sm:$0xff] }
 0x662   :  { %2489 = vmatpush1.bf16.msra.mxu0 %v2107_v0  ;;  %2653 = vmatpush1.bf16.msra.mxu1 %v2109_v42  ;;  %v2165_v0 = vunpack.c.h.s8.bf16 %v1857_v38  ;;  %v2171_v42 = vunpack.c.l.s8.bf16 %v1863_v62 }
 0x663   :  { %2499 = vmatprep.subr.bf16.mxu0 %v2115_v46  ;;  %2663 = vmatprep.subr.bf16.mxu1 %v2117_v50  ;;  %v2173_v46 = vunpack.c.l.s8.bf16 %v1865_v39  ;;  %v1862_v50 = vld [vmem:[#allocation3 + $0x2a0] sm:$0xff] }
 0x664   :  { %v2170_v51 = vunpack.c.l.s8.bf16 %v1862_v50  ;;  %v2177_v60 = vunpack.c.h.s8.bf16 %v1862_v50  ;;  %v1892_v50 = vld [vmem:[#allocation3 + $0x390] sm:$0xff] }
 0x665   :  { %2491 = vmatmul.mubr.bf16.vlgmr.msra.gmra.mrb[12].mxu0 %v4000_v47  ;;  %2655 = vmatmul.mubr.bf16.vlgmr.msra.gmra.mrb[20].mxu1 %v4000_v47 }
 0x666   :  { %2500 = vmatpush1.bf16.msra.mxu0 %v2114_v52  ;;  %2664 = vmatpush1.bf16.msra.mxu1 %v2116_v8  ;;  %v2172_v52 = vunpack.c.l.s8.bf16 %v1864_v7  ;;  %v2178_v8 = vunpack.c.h.s8.bf16 %v1863_v62  ;;  %v1893_v62 = vld [vmem:[#allocation3 + $0x398] sm:$0xff] }
 0x667   :  { %2501 = vmatprep.subr.bf16.mxu0 %v2122_v56  ;;  %2665 = vmatprep.subr.bf16.mxu1 %v2124_v57  ;;  %v2180_v56 = vunpack.c.h.s8.bf16 %v1865_v39  ;;  %v1870_v57 = vld [vmem:[#allocation3 + $0x2e0] sm:$0xff] }
 0x668   :  { %2531 = vmatprep.mubr.bf16.mxu0 %v4004_v48  ;;  %2695 = vmatprep.mubr.bf16.mxu1 %v4004_v48 }
 0x66a   :  { %2502 = vmatpush1.bf16.msra.mxu0 %v2121_v10  ;;  %2666 = vmatpush1.bf16.msra.mxu1 %v2123_v55  ;;  %v2179_v10 = vunpack.c.h.s8.bf16 %v1864_v7  ;;  %v2185_v55 = vunpack.c.l.s8.bf16 %v1870_v57  ;;  %v4012_v7 = vpack.c.bf16 %v3942_v44, %v3942_v44 }
 0x66b   :  { %2503 = vmatprep.subr.bf16.mxu0 %v2129_v61  ;;  %2667 = vmatprep.subr.bf16.mxu1 %v2131_v3  ;;  %v2187_v61 = vunpack.c.l.s8.bf16 %v1872_v58  ;;  %v1869_v3 = vld [vmem:[#allocation3 + $0x2d8] sm:$0xff] }
 0x66c   :  { %v2184_v4 = vunpack.c.l.s8.bf16 %v1869_v3  ;;  %v2191_v20 = vunpack.c.h.s8.bf16 %v1869_v3  ;;  %v1897_v3 = vld [vmem:[#allocation3 + $0x3b8] sm:$0xff] }
 0x66e   :  { %2504 = vmatpush1.bf16.msra.mxu0 %v2128_v9  ;;  %2668 = vmatpush1.bf16.msra.mxu1 %v2130_v37  ;;  %v2186_v9 = vunpack.c.l.s8.bf16 %v1871_v49  ;;  %v2192_v37 = vunpack.c.h.s8.bf16 %v1870_v57  ;;  %v1898_v57 = vld [vmem:[#allocation3 + $0x3c0] sm:$0xff] }
 0x66f   :  { %2505 = vmatprep.subr.bf16.mxu0 %v2136_v5  ;;  %2669 = vmatprep.subr.bf16.mxu1 %v2138_v13  ;;  %v2194_v5 = vunpack.c.h.s8.bf16 %v1872_v58  ;;  %v1877_v13 = vld [vmem:[#allocation3 + $0x318] sm:$0xff]  ;;  %v1900_v58 = vld [vmem:[#allocation3 + $0x3d0] sm:$0xff] }
 0x672   :  { %2506 = vmatpush1.bf16.msra.mxu0 %v2135_v21  ;;  %2670 = vmatpush1.bf16.msra.mxu1 %v2137_v6  ;;  %v2193_v21 = vunpack.c.h.s8.bf16 %v1871_v49  ;;  %v2199_v6 = vunpack.c.l.s8.bf16 %v1877_v13  ;;  %v1899_v49 = vld [vmem:[#allocation3 + $0x3c8] sm:$0xff] }
 0x673   :  { %2507 = vmatprep.subr.bf16.mxu0 %v2143_v59  ;;  %2671 = vmatprep.subr.bf16.mxu1 %v2145_v14  ;;  %v2201_v59 = vunpack.c.l.s8.bf16 %v1879_v15  ;;  %v1876_v14 = vld [vmem:[#allocation3 + $0x310] sm:$0xff] }
 0x674   :  { %v2198_v23 = vunpack.c.l.s8.bf16 %v1876_v14  ;;  %v2205_v33 = vunpack.c.h.s8.bf16 %v1876_v14  ;;  %v1906_v14 = vld [vmem:[#allocation3 + $0x400] sm:$0xff] }
 0x676   :  { %2508 = vmatpush1.bf16.msra.mxu0 %v2142_v28  ;;  %2672 = vmatpush1.bf16.msra.mxu1 %v2144_v12  ;;  %v2200_v28 = vunpack.c.l.s8.bf16 %v1878_v22  ;;  %v2206_v12 = vunpack.c.h.s8.bf16 %v1877_v13  ;;  %v1907_v13 = vld [vmem:[#allocation3 + $0x408] sm:$0xff] }
 0x677   :  { %2509 = vmatprep.subr.bf16.mxu0 %v2150_v29  ;;  %2673 = vmatprep.subr.bf16.mxu1 %v2152_v31  ;;  %v2208_v29 = vunpack.c.h.s8.bf16 %v1879_v15  ;;  %v1884_v31 = vld [vmem:[#allocation3 + $0x350] sm:$0xff]  ;;  %v2247_v15 = vunpack.c.h.s8.bf16 %v1897_v3 }
 0x67a   :  { %2510 = vmatpush1.bf16.msra.mxu0 %v2149_v34  ;;  %2674 = vmatpush1.bf16.msra.mxu1 %v2151_v26  ;;  %v2207_v34 = vunpack.c.h.s8.bf16 %v1878_v22  ;;  %v2213_v26 = vunpack.c.l.s8.bf16 %v1884_v31 }
 0x67b   :  { %2511 = vmatprep.subr.bf16.mxu0 %v2157_v11  ;;  %2675 = vmatprep.subr.bf16.mxu1 %v2159_v35  ;;  %v2215_v11 = vunpack.c.l.s8.bf16 %v1886_v32  ;;  %v1883_v35 = vld [vmem:[#allocation3 + $0x348] sm:$0xff] }
 0x67c   :  { %v2212_v38 = vunpack.c.l.s8.bf16 %v1883_v35  ;;  %v2219_v39 = vunpack.c.h.s8.bf16 %v1883_v35  ;;  %v1913_v35 = vld [vmem:[#allocation3 + $0x438] sm:$0xff] }
 0x67e   :  { %2512 = vmatpush1.bf16.msra.mxu0 %v2156_v24  ;;  %2676 = vmatpush1.bf16.msra.mxu1 %v2158_v25  ;;  %v2214_v24 = vunpack.c.l.s8.bf16 %v1885_v36  ;;  %v2220_v25 = vunpack.c.h.s8.bf16 %v1884_v31  ;;  %v1914_v31 = vld [vmem:[#allocation3 + $0x440] sm:$0xff] }
 0x67f   :  { %2513 = vmatprep.subr.bf16.mxu0 %v2164_v27  ;;  %2677 = vmatprep.subr.bf16.mxu1 %v2166_v19  ;;  %v2222_v27 = vunpack.c.h.s8.bf16 %v1886_v32  ;;  %v1891_v19 = vld [vmem:[#allocation3 + $0x388] sm:$0xff] }
 0x682   :  { %2514 = vmatpush1.bf16.msra.mxu0 %v2163_v40  ;;  %2678 = vmatpush1.bf16.msra.mxu1 %v2165_v0  ;;  %v2221_v40 = vunpack.c.h.s8.bf16 %v1885_v36  ;;  %v2227_v0 = vunpack.c.l.s8.bf16 %v1891_v19 }
 0x683   :  { %2515 = vmatprep.subr.bf16.mxu0 %v2171_v42  ;;  %2679 = vmatprep.subr.bf16.mxu1 %v2173_v46  ;;  %v2229_v42 = vunpack.c.l.s8.bf16 %v1893_v62  ;;  %v1890_v46 = vld [vmem:[#allocation3 + $0x380] sm:$0xff] }
 0x684   :  { %v2233_v44 = vunpack.c.h.s8.bf16 %v1890_v46 }
 0x686   :  { %2516 = vmatpush1.bf16.msra.mxu0 %v2170_v51  ;;  %2680 = vmatpush1.bf16.msra.mxu1 %v2172_v52  ;;  %v2226_v51 = vunpack.c.l.s8.bf16 %v1890_v46  ;;  %v2228_v52 = vunpack.c.l.s8.bf16 %v1892_v50  ;;  %v1920_v46 = vld [vmem:[#allocation3 + $0x470] sm:$0xff] }
 0x687   :  { %2517 = vmatprep.subr.bf16.mxu0 %v2178_v8  ;;  %2681 = vmatprep.subr.bf16.mxu1 %v2180_v56  ;;  %v2234_v8 = vunpack.c.h.s8.bf16 %v1891_v19  ;;  %v2236_v56 = vunpack.c.h.s8.bf16 %v1893_v62  ;;  %v1921_v19 = vld [vmem:[#allocation3 + $0x478] sm:$0xff] }
 0x68a   :  { %2518 = vmatpush1.bf16.msra.mxu0 %v2177_v60  ;;  %2682 = vmatpush1.bf16.msra.mxu1 %v2179_v10  ;;  %v4016_v60 = vpack.c.bf16 %v3988_v2, %v3988_v2  ;;  %v2235_v10 = vunpack.c.h.s8.bf16 %v1892_v50  ;;  %v2240_v2 = vunpack.c.l.s8.bf16 %v1897_v3  ;;  %v1927_v3 = vld [vmem:[#allocation3 + $0x4a8] sm:$0xff] }
 0x68b   :  { %2519 = vmatprep.subr.bf16.mxu0 %v2185_v55  ;;  %2683 = vmatprep.subr.bf16.mxu1 %v2187_v61  ;;  %v2241_v55 = vunpack.c.l.s8.bf16 %v1898_v57  ;;  %v2243_v61 = vunpack.c.l.s8.bf16 %v1900_v58 }
 0x68e   :  { %2520 = vmatpush1.bf16.msra.mxu0 %v2184_v4  ;;  %2684 = vmatpush1.bf16.msra.mxu1 %v2186_v9  ;;  %v2242_v4 = vunpack.c.l.s8.bf16 %v1899_v49  ;;  %v2248_v9 = vunpack.c.h.s8.bf16 %v1898_v57  ;;  %v1928_v57 = vld [vmem:[#allocation3 + $0x4b0] sm:$0xff] }
 0x68f   :  { %2521 = vmatprep.subr.bf16.mxu0 %v2192_v37  ;;  %2685 = vmatprep.subr.bf16.mxu1 %v2194_v5  ;;  %v2250_v37 = vunpack.c.h.s8.bf16 %v1900_v58  ;;  %v1905_v5 = vld [vmem:[#allocation3 + $0x3f8] sm:$0xff] }
 0x692   :  { %2522 = vmatpush1.bf16.msra.mxu0 %v2191_v20  ;;  %2686 = vmatpush1.bf16.msra.mxu1 %v2193_v21  ;;  %v2249_v20 = vunpack.c.h.s8.bf16 %v1899_v49  ;;  %v2255_v21 = vunpack.c.l.s8.bf16 %v1905_v5 }
 0x693   :  { %2523 = vmatprep.subr.bf16.mxu0 %v2199_v6  ;;  %2687 = vmatprep.subr.bf16.mxu1 %v2201_v59  ;;  %v2257_v6 = vunpack.c.l.s8.bf16 %v1907_v13  ;;  %v1904_v59 = vld [vmem:[#allocation3 + $0x3f0] sm:$0xff] }
 0x694   :  { %v2254_v22 = vunpack.c.l.s8.bf16 %v1904_v59  ;;  %v2261_v32 = vunpack.c.h.s8.bf16 %v1904_v59  ;;  %v1934_v59 = vld [vmem:[#allocation3 + $0x4e0] sm:$0xff] }
 0x696   :  { %2524 = vmatpush1.bf16.msra.mxu0 %v2198_v23  ;;  %2688 = vmatpush1.bf16.msra.mxu1 %v2200_v28  ;;  %v2256_v23 = vunpack.c.l.s8.bf16 %v1906_v14  ;;  %v2262_v28 = vunpack.c.h.s8.bf16 %v1905_v5  ;;  %v1935_v5 = vld [vmem:[#allocation3 + $0x4e8] sm:$0xff] }
 0x697   :  { %2525 = vmatprep.subr.bf16.mxu0 %v2206_v12  ;;  %2689 = vmatprep.subr.bf16.mxu1 %v2208_v29  ;;  %v2264_v12 = vunpack.c.h.s8.bf16 %v1907_v13  ;;  %v1912_v29 = vld [vmem:[#allocation3 + $0x430] sm:$0xff] }
 0x69a   :  { %2526 = vmatpush1.bf16.msra.mxu0 %v2205_v33  ;;  %2690 = vmatpush1.bf16.msra.mxu1 %v2207_v34  ;;  %v2263_v33 = vunpack.c.h.s8.bf16 %v1906_v14  ;;  %v2269_v34 = vunpack.c.l.s8.bf16 %v1912_v29 }
 0x69b   :  { %2527 = vmatprep.subr.bf16.mxu0 %v2213_v26  ;;  %2691 = vmatprep.subr.bf16.mxu1 %v2215_v11  ;;  %v2271_v26 = vunpack.c.l.s8.bf16 %v1914_v31  ;;  %v1911_v11 = vld [vmem:[#allocation3 + $0x428] sm:$0xff] }
 0x69c   :  { %v2268_v36 = vunpack.c.l.s8.bf16 %v1911_v11  ;;  %v2275_v62 = vunpack.c.h.s8.bf16 %v1911_v11  ;;  %v1941_v11 = vld [vmem:[#allocation3 + $0x518] sm:$0xff] }
 0x69e   :  { %2528 = vmatpush1.bf16.msra.mxu0 %v2212_v38  ;;  %2692 = vmatpush1.bf16.msra.mxu1 %v2214_v24  ;;  %v2270_v38 = vunpack.c.l.s8.bf16 %v1913_v35  ;;  %v2276_v24 = vunpack.c.h.s8.bf16 %v1912_v29  ;;  %v1942_v29 = vld [vmem:[#allocation3 + $0x520] sm:$0xff] }
 0x69f   :  { %2529 = vmatprep.subr.bf16.mxu0 %v2220_v25  ;;  %2693 = vmatprep.subr.bf16.mxu1 %v2222_v27  ;;  %v2278_v25 = vunpack.c.h.s8.bf16 %v1914_v31  ;;  %v1919_v27 = vld [vmem:[#allocation3 + $0x468] sm:$0xff] }
 0x6a2   :  { %2530 = vmatpush1.bf16.msra.mxu0 %v2219_v39  ;;  %2694 = vmatpush1.bf16.msra.mxu1 %v2221_v40  ;;  %v2277_v39 = vunpack.c.h.s8.bf16 %v1913_v35  ;;  %v2283_v40 = vunpack.c.l.s8.bf16 %v1919_v27 }
 0x6a3   :  { %2540 = vmatprep.subr.bf16.mxu0 %v2227_v0  ;;  %2704 = vmatprep.subr.bf16.mxu1 %v2229_v42  ;;  %v2285_v0 = vunpack.c.l.s8.bf16 %v1921_v19  ;;  %v1918_v42 = vld [vmem:[#allocation3 + $0x460] sm:$0xff] }
 0x6a4   :  { %v2282_v50 = vunpack.c.l.s8.bf16 %v1918_v42  ;;  %v2289_v58 = vunpack.c.h.s8.bf16 %v1918_v42  ;;  %v1948_v42 = vld [vmem:[#allocation3 + $0x550] sm:$0xff] }
 0x6a5   :  { %2532 = vmatmul.mubr.bf16.vlgmr.msra.gmra.mrb[12].mxu0 %v4012_v7  ;;  %2696 = vmatmul.mubr.bf16.vlgmr.msra.gmra.mrb[20].mxu1 %v4012_v7 }
 0x6a6   :  { %2541 = vmatpush1.bf16.msra.mxu0 %v2226_v51  ;;  %2705 = vmatpush1.bf16.msra.mxu1 %v2228_v52  ;;  %v2284_v51 = vunpack.c.l.s8.bf16 %v1920_v46  ;;  %v2290_v52 = vunpack.c.h.s8.bf16 %v1919_v27  ;;  %v1949_v27 = vld [vmem:[#allocation3 + $0x558] sm:$0xff] }
 0x6a7   :  { %2542 = vmatprep.subr.bf16.mxu0 %v2234_v8  ;;  %2706 = vmatprep.subr.bf16.mxu1 %v2236_v56  ;;  %v2292_v8 = vunpack.c.h.s8.bf16 %v1921_v19  ;;  %v1926_v56 = vld [vmem:[#allocation3 + $0x4a0] sm:$0xff] }
 0x6a8   :  { %2572 = vmatprep.mubr.bf16.mxu0 %v4016_v60  ;;  %2736 = vmatprep.mubr.bf16.mxu1 %v4016_v60 }
 0x6aa   :  { %2543 = vmatpush1.bf16.msra.mxu0 %v2233_v44  ;;  %2707 = vmatpush1.bf16.msra.mxu1 %v2235_v10  ;;  %v2291_v44 = vunpack.c.h.s8.bf16 %v1920_v46  ;;  %v2297_v10 = vunpack.c.l.s8.bf16 %v1926_v56  ;;  %v4024_v46 = vpack.c.bf16 %v3984_v30, %v3984_v30 }
 0x6ab   :  { %2544 = vmatprep.subr.bf16.mxu0 %v2241_v55  ;;  %2708 = vmatprep.subr.bf16.mxu1 %v2243_v61  ;;  %v2299_v55 = vunpack.c.l.s8.bf16 %v1928_v57  ;;  %v1925_v61 = vld [vmem:[#allocation3 + $0x498] sm:$0xff] }
 0x6ac   :  { %v2296_v49 = vunpack.c.l.s8.bf16 %v1925_v61  ;;  %v2303_v13 = vunpack.c.h.s8.bf16 %v1925_v61  ;;  %v1953_v61 = vld [vmem:[#allocation3 + $0x578] sm:$0xff] }
 0x6ae   :  { %2545 = vmatpush1.bf16.msra.mxu0 %v2240_v2  ;;  %2709 = vmatpush1.bf16.msra.mxu1 %v2242_v4  ;;  %v2298_v2 = vunpack.c.l.s8.bf16 %v1927_v3  ;;  %v2304_v4 = vunpack.c.h.s8.bf16 %v1926_v56  ;;  %v1954_v56 = vld [vmem:[#allocation3 + $0x580] sm:$0xff] }
 0x6af   :  { %2546 = vmatprep.subr.bf16.mxu0 %v2248_v9  ;;  %2710 = vmatprep.subr.bf16.mxu1 %v2250_v37  ;;  %v2306_v9 = vunpack.c.h.s8.bf16 %v1928_v57  ;;  %v1933_v37 = vld [vmem:[#allocation3 + $0x4d8] sm:$0xff]  ;;  %v1956_v57 = vld [vmem:[#allocation3 + $0x590] sm:$0xff] }
 0x6b2   :  { %2547 = vmatpush1.bf16.msra.mxu0 %v2247_v15  ;;  %2711 = vmatpush1.bf16.msra.mxu1 %v2249_v20  ;;  %v2305_v15 = vunpack.c.h.s8.bf16 %v1927_v3  ;;  %v2311_v20 = vunpack.c.l.s8.bf16 %v1933_v37  ;;  %v1955_v3 = vld [vmem:[#allocation3 + $0x588] sm:$0xff] }
 0x6b3   :  { %2548 = vmatprep.subr.bf16.mxu0 %v2255_v21  ;;  %2712 = vmatprep.subr.bf16.mxu1 %v2257_v6  ;;  %v2313_v21 = vunpack.c.l.s8.bf16 %v1935_v5  ;;  %v1932_v6 = vld [vmem:[#allocation3 + $0x4d0] sm:$0xff] }
 0x6b4   :  { %v2310_v14 = vunpack.c.l.s8.bf16 %v1932_v6  ;;  %v2317_v31 = vunpack.c.h.s8.bf16 %v1932_v6  ;;  %v1962_v6 = vld [vmem:[#allocation3 + $0x5c0] sm:$0xff] }
 0x6b6   :  { %2549 = vmatpush1.bf16.msra.mxu0 %v2254_v22  ;;  %2713 = vmatpush1.bf16.msra.mxu1 %v2256_v23  ;;  %v2312_v22 = vunpack.c.l.s8.bf16 %v1934_v59  ;;  %v2318_v23 = vunpack.c.h.s8.bf16 %v1933_v37  ;;  %v1963_v37 = vld [vmem:[#allocation3 + $0x5c8] sm:$0xff] }
 0x6b7   :  { %2550 = vmatprep.subr.bf16.mxu0 %v2262_v28  ;;  %2714 = vmatprep.subr.bf16.mxu1 %v2264_v12  ;;  %v2320_v28 = vunpack.c.h.s8.bf16 %v1935_v5  ;;  %v1940_v12 = vld [vmem:[#allocation3 + $0x510] sm:$0xff]  ;;  %v2359_v5 = vunpack.c.h.s8.bf16 %v1953_v61 }
 0x6ba   :  { %2551 = vmatpush1.bf16.msra.mxu0 %v2261_v32  ;;  %2715 = vmatpush1.bf16.msra.mxu1 %v2263_v33  ;;  %v2319_v32 = vunpack.c.h.s8.bf16 %v1934_v59  ;;  %v2325_v33 = vunpack.c.l.s8.bf16 %v1940_v12 }
 0x6bb   :  { %2552 = vmatprep.subr.bf16.mxu0 %v2269_v34  ;;  %2716 = vmatprep.subr.bf16.mxu1 %v2271_v26  ;;  %v2327_v34 = vunpack.c.l.s8.bf16 %v1942_v29  ;;  %v1939_v26 = vld [vmem:[#allocation3 + $0x508] sm:$0xff] }
 0x6bc   :  { %v2324_v35 = vunpack.c.l.s8.bf16 %v1939_v26  ;;  %v2331_v19 = vunpack.c.h.s8.bf16 %v1939_v26  ;;  %v1969_v26 = vld [vmem:[#allocation3 + $0x5f8] sm:$0xff] }
 0x6be   :  { %2553 = vmatpush1.bf16.msra.mxu0 %v2268_v36  ;;  %2717 = vmatpush1.bf16.msra.mxu1 %v2270_v38  ;;  %v2326_v36 = vunpack.c.l.s8.bf16 %v1941_v11  ;;  %v2332_v38 = vunpack.c.h.s8.bf16 %v1940_v12  ;;  %v1970_v12 = vld [vmem:[#allocation3 + $0x600] sm:$0xff] }
 0x6bf   :  { %2554 = vmatprep.subr.bf16.mxu0 %v2276_v24  ;;  %2718 = vmatprep.subr.bf16.mxu1 %v2278_v25  ;;  %v2334_v24 = vunpack.c.h.s8.bf16 %v1942_v29  ;;  %v1947_v25 = vld [vmem:[#allocation3 + $0x548] sm:$0xff] }
 0x6c2   :  { %2555 = vmatpush1.bf16.msra.mxu0 %v2275_v62  ;;  %2719 = vmatpush1.bf16.msra.mxu1 %v2277_v39  ;;  %v2333_v62 = vunpack.c.h.s8.bf16 %v1941_v11  ;;  %v2339_v39 = vunpack.c.l.s8.bf16 %v1947_v25 }
 0x6c3   :  { %2556 = vmatprep.subr.bf16.mxu0 %v2283_v40  ;;  %2720 = vmatprep.subr.bf16.mxu1 %v2285_v0  ;;  %v2341_v40 = vunpack.c.l.s8.bf16 %v1949_v27  ;;  %v1946_v0 = vld [vmem:[#allocation3 + $0x540] sm:$0xff] }
 0x6c4   :  { %v2345_v30 = vunpack.c.h.s8.bf16 %v1946_v0 }
 0x6c6   :  { %2557 = vmatpush1.bf16.msra.mxu0 %v2282_v50  ;;  %2721 = vmatpush1.bf16.msra.mxu1 %v2284_v51  ;;  %v2338_v50 = vunpack.c.l.s8.bf16 %v1946_v0  ;;  %v2340_v51 = vunpack.c.l.s8.bf16 %v1948_v42  ;;  %v1976_v0 = vld [vmem:[#allocation3 + $0x630] sm:$0xff] }
 0x6c7   :  { %2558 = vmatprep.subr.bf16.mxu0 %v2290_v52  ;;  %2722 = vmatprep.subr.bf16.mxu1 %v2292_v8  ;;  %v2346_v52 = vunpack.c.h.s8.bf16 %v1947_v25  ;;  %v2348_v8 = vunpack.c.h.s8.bf16 %v1949_v27  ;;  %v1977_v25 = vld [vmem:[#allocation3 + $0x638] sm:$0xff] }
 0x6ca   :  { %2559 = vmatpush1.bf16.msra.mxu0 %v2289_v58  ;;  %2723 = vmatpush1.bf16.msra.mxu1 %v2291_v44  ;;  %v4028_v58 = vpack.c.bf16 %v3990_v43, %v3990_v43  ;;  %v2347_v44 = vunpack.c.h.s8.bf16 %v1948_v42  ;;  %v2352_v43 = vunpack.c.l.s8.bf16 %v1953_v61  ;;  %v1983_v61 = vld [vmem:[#allocation3 + $0x668] sm:$0xff] }
 0x6cb   :  { %2560 = vmatprep.subr.bf16.mxu0 %v2297_v10  ;;  %2724 = vmatprep.subr.bf16.mxu1 %v2299_v55  ;;  %v2353_v10 = vunpack.c.l.s8.bf16 %v1954_v56  ;;  %v2355_v55 = vunpack.c.l.s8.bf16 %v1956_v57 }
 0x6ce   :  { %2561 = vmatpush1.bf16.msra.mxu0 %v2296_v49  ;;  %2725 = vmatpush1.bf16.msra.mxu1 %v2298_v2  ;;  %v2354_v49 = vunpack.c.l.s8.bf16 %v1955_v3  ;;  %v2360_v2 = vunpack.c.h.s8.bf16 %v1954_v56  ;;  %v1984_v56 = vld [vmem:[#allocation3 + $0x670] sm:$0xff] }
 0x6cf   :  { %2562 = vmatprep.subr.bf16.mxu0 %v2304_v4  ;;  %2726 = vmatprep.subr.bf16.mxu1 %v2306_v9  ;;  %v2362_v4 = vunpack.c.h.s8.bf16 %v1956_v57  ;;  %v1961_v9 = vld [vmem:[#allocation3 + $0x5b8] sm:$0xff] }
 0x6d2   :  { %2563 = vmatpush1.bf16.msra.mxu0 %v2303_v13  ;;  %2727 = vmatpush1.bf16.msra.mxu1 %v2305_v15  ;;  %v2361_v13 = vunpack.c.h.s8.bf16 %v1955_v3  ;;  %v2367_v15 = vunpack.c.l.s8.bf16 %v1961_v9 }
 0x6d3   :  { %2564 = vmatprep.subr.bf16.mxu0 %v2311_v20  ;;  %2728 = vmatprep.subr.bf16.mxu1 %v2313_v21  ;;  %v2369_v20 = vunpack.c.l.s8.bf16 %v1963_v37  ;;  %v1960_v21 = vld [vmem:[#allocation3 + $0x5b0] sm:$0xff] }
 0x6d4   :  { %v2366_v59 = vunpack.c.l.s8.bf16 %v1960_v21  ;;  %v2373_v29 = vunpack.c.h.s8.bf16 %v1960_v21  ;;  %v1990_v21 = vld [vmem:[#allocation3 + $0x6a0] sm:$0xff] }
 0x6d6   :  { %2565 = vmatpush1.bf16.msra.mxu0 %v2310_v14  ;;  %2729 = vmatpush1.bf16.msra.mxu1 %v2312_v22  ;;  %v2368_v14 = vunpack.c.l.s8.bf16 %v1962_v6  ;;  %v2374_v22 = vunpack.c.h.s8.bf16 %v1961_v9  ;;  %v1991_v9 = vld [vmem:[#allocation3 + $0x6a8] sm:$0xff] }
 0x6d7   :  { %2566 = vmatprep.subr.bf16.mxu0 %v2318_v23  ;;  %2730 = vmatprep.subr.bf16.mxu1 %v2320_v28  ;;  %v2376_v23 = vunpack.c.h.s8.bf16 %v1963_v37  ;;  %v1968_v28 = vld [vmem:[#allocation3 + $0x5f0] sm:$0xff] }
 0x6da   :  { %2567 = vmatpush1.bf16.msra.mxu0 %v2317_v31  ;;  %2731 = vmatpush1.bf16.msra.mxu1 %v2319_v32  ;;  %v2375_v31 = vunpack.c.h.s8.bf16 %v1962_v6  ;;  %v2381_v32 = vunpack.c.l.s8.bf16 %v1968_v28 }
 0x6db   :  { %2568 = vmatprep.subr.bf16.mxu0 %v2325_v33  ;;  %2732 = vmatprep.subr.bf16.mxu1 %v2327_v34  ;;  %v2383_v33 = vunpack.c.l.s8.bf16 %v1970_v12  ;;  %v1967_v34 = vld [vmem:[#allocation3 + $0x5e8] sm:$0xff] }
 0x6dc   :  { %v2380_v11 = vunpack.c.l.s8.bf16 %v1967_v34  ;;  %v2387_v27 = vunpack.c.h.s8.bf16 %v1967_v34  ;;  %v1997_v34 = vld [vmem:[#allocation3 + $0x6d8] sm:$0xff] }
 0x6de   :  { %2569 = vmatpush1.bf16.msra.mxu0 %v2324_v35  ;;  %2733 = vmatpush1.bf16.msra.mxu1 %v2326_v36  ;;  %v2382_v35 = vunpack.c.l.s8.bf16 %v1969_v26  ;;  %v2388_v36 = vunpack.c.h.s8.bf16 %v1968_v28  ;;  %v1998_v28 = vld [vmem:[#allocation3 + $0x6e0] sm:$0xff] }
 0x6df   :  { %2570 = vmatprep.subr.bf16.mxu0 %v2332_v38  ;;  %2734 = vmatprep.subr.bf16.mxu1 %v2334_v24  ;;  %v2390_v38 = vunpack.c.h.s8.bf16 %v1970_v12  ;;  %v1975_v24 = vld [vmem:[#allocation3 + $0x628] sm:$0xff] }
 0x6e2   :  { %2571 = vmatpush1.bf16.msra.mxu0 %v2331_v19  ;;  %2735 = vmatpush1.bf16.msra.mxu1 %v2333_v62  ;;  %v2389_v19 = vunpack.c.h.s8.bf16 %v1969_v26  ;;  %v2395_v62 = vunpack.c.l.s8.bf16 %v1975_v24 }
 0x6e3   :  { %2581 = vmatprep.subr.bf16.mxu0 %v2339_v39  ;;  %2745 = vmatprep.subr.bf16.mxu1 %v2341_v40  ;;  %v2397_v39 = vunpack.c.l.s8.bf16 %v1977_v25  ;;  %v1974_v40 = vld [vmem:[#allocation3 + $0x620] sm:$0xff] }
 0x6e4   :  { %v2394_v42 = vunpack.c.l.s8.bf16 %v1974_v40  ;;  %v2401_v57 = vunpack.c.h.s8.bf16 %v1974_v40  ;;  %v1784_v40 = vld [vmem:[#allocation3 + $0x30] sm:$0xff] }
 0x6e5   :  { %2573 = vmatmul.mubr.bf16.vlgmr.msra.gmra.mrb[12].mxu0 %v4024_v46  ;;  %2737 = vmatmul.mubr.bf16.vlgmr.msra.gmra.mrb[20].mxu1 %v4024_v46 }
 0x6e6   :  { %2582 = vmatpush1.bf16.msra.mxu0 %v2338_v50  ;;  %2746 = vmatpush1.bf16.msra.mxu1 %v2340_v51  ;;  %v2396_v50 = vunpack.c.l.s8.bf16 %v1976_v0  ;;  %v2402_v51 = vunpack.c.h.s8.bf16 %v1975_v24  ;;  %v1812_v24 = vld [vmem:[#allocation3 + $0x110] sm:$0xff] }
 0x6e7   :  { %2583 = vmatprep.subr.bf16.mxu0 %v2346_v52  ;;  %2747 = vmatprep.subr.bf16.mxu1 %v2348_v8  ;;  %v2404_v52 = vunpack.c.h.s8.bf16 %v1977_v25  ;;  %v1982_v8 = vld [vmem:[#allocation3 + $0x660] sm:$0xff] }
 0x6e8   :  { %2613 = vmatprep.mubr.bf16.mxu0 %v4028_v58  ;;  %2777 = vmatprep.mubr.bf16.mxu1 %v4028_v58 }
 0x6ea   :  { %2584 = vmatpush1.bf16.msra.mxu0 %v2345_v30  ;;  %2748 = vmatpush1.bf16.msra.mxu1 %v2347_v44  ;;  %v2403_v30 = vunpack.c.h.s8.bf16 %v1976_v0  ;;  %v2409_v44 = vunpack.c.l.s8.bf16 %v1982_v8  ;;  %v4036_v0 = vpack.c.bf16 %v3986_v41, %v3986_v41 }
 0x6eb   :  { %2585 = vmatprep.subr.bf16.mxu0 %v2353_v10  ;;  %2749 = vmatprep.subr.bf16.mxu1 %v2355_v55  ;;  %v2411_v10 = vunpack.c.l.s8.bf16 %v1984_v56  ;;  %v1981_v55 = vld [vmem:[#allocation3 + $0x658] sm:$0xff] }
 0x6ec   :  { %v2408_v3 = vunpack.c.l.s8.bf16 %v1981_v55  ;;  %v2415_v37 = vunpack.c.h.s8.bf16 %v1981_v55  ;;  %v1791_v55 = vld [vmem:[#allocation3 + $0x68] sm:$0xff] }
 0x6ee   :  { %2586 = vmatpush1.bf16.msra.mxu0 %v2352_v43  ;;  %2750 = vmatpush1.bf16.msra.mxu1 %v2354_v49  ;;  %v2410_v43 = vunpack.c.l.s8.bf16 %v1983_v61  ;;  %v2416_v49 = vunpack.c.h.s8.bf16 %v1982_v8  ;;  %v1790_v8 = vld [vmem:[#allocation3 + $0x60] sm:$0xff] }
 0x6ef   :  { %2587 = vmatprep.subr.bf16.mxu0 %v2360_v2  ;;  %2751 = vmatprep.subr.bf16.mxu1 %v2362_v4  ;;  %v2418_v2 = vunpack.c.h.s8.bf16 %v1984_v56  ;;  %v1989_v4 = vld [vmem:[#allocation3 + $0x698] sm:$0xff]  ;;  %v1819_v56 = vld [vmem:[#allocation3 + $0x148] sm:$0xff]  ;;  %v2021_v41 = vunpack.c.l.s8.bf16 %v1790_v8 }
 0x6f2   :  { %2588 = vmatpush1.bf16.msra.mxu0 %v2359_v5  ;;  %2752 = vmatpush1.bf16.msra.mxu1 %v2361_v13  ;;  %v2417_v5 = vunpack.c.h.s8.bf16 %v1983_v61  ;;  %v2423_v13 = vunpack.c.l.s8.bf16 %v1989_v4 }
 0x6f3   :  { %2589 = vmatprep.subr.bf16.mxu0 %v2367_v15  ;;  %2753 = vmatprep.subr.bf16.mxu1 %v2369_v20  ;;  %v2425_v15 = vunpack.c.l.s8.bf16 %v1991_v9  ;;  %v1988_v20 = vld [vmem:[#allocation3 + $0x690] sm:$0xff] }
 0x6f4   :  { %v2422_v6 = vunpack.c.l.s8.bf16 %v1988_v20  ;;  %v2429_v12 = vunpack.c.h.s8.bf16 %v1988_v20 }
 0x6f6   :  { %2590 = vmatpush1.bf16.msra.mxu0 %v2366_v59  ;;  %2754 = vmatpush1.bf16.msra.mxu1 %v2368_v14  ;;  %v2424_v59 = vunpack.c.l.s8.bf16 %v1990_v21  ;;  %v2430_v14 = vunpack.c.h.s8.bf16 %v1989_v4  ;;  %v1826_v4 = vld [vmem:[#allocation3 + $0x180] sm:$0xff] }
 0x6f7   :  { %2591 = vmatprep.subr.bf16.mxu0 %v2374_v22  ;;  %2755 = vmatprep.subr.bf16.mxu1 %v2376_v23  ;;  %v2432_v22 = vunpack.c.h.s8.bf16 %v1991_v9  ;;  %v1996_v23 = vld [vmem:[#allocation3 + $0x6d0] sm:$0xff] }
 0x6fa   :  { %2592 = vmatpush1.bf16.msra.mxu0 %v2373_v29  ;;  %2756 = vmatpush1.bf16.msra.mxu1 %v2375_v31  ;;  %v2431_v29 = vunpack.c.h.s8.bf16 %v1990_v21  ;;  %v2437_v31 = vunpack.c.l.s8.bf16 %v1996_v23 }
 0x6fb   :  { %2593 = vmatprep.subr.bf16.mxu0 %v2381_v32  ;;  %2757 = vmatprep.subr.bf16.mxu1 %v2383_v33  ;;  %v2439_v32 = vunpack.c.l.s8.bf16 %v1998_v28  ;;  %v1995_v33 = vld [vmem:[#allocation3 + $0x6c8] sm:$0xff] }
 0x6fc   :  { %v2436_v26 = vunpack.c.l.s8.bf16 %v1995_v33  ;;  %v2443_v25 = vunpack.c.h.s8.bf16 %v1995_v33 }
 0x6fe   :  { %2594 = vmatpush1.bf16.msra.mxu0 %v2380_v11  ;;  %2758 = vmatpush1.bf16.msra.mxu1 %v2382_v35  ;;  %v2438_v11 = vunpack.c.l.s8.bf16 %v1997_v34  ;;  %v2444_v35 = vunpack.c.h.s8.bf16 %v1996_v23 }
 0x6ff   :  { %2595 = vmatprep.subr.bf16.mxu0 %v2388_v36  ;;  %2759 = vmatprep.subr.bf16.mxu1 %v2390_v38  ;;  %v2446_v36 = vunpack.c.h.s8.bf16 %v1998_v28  ;;  %v1783_v38 = vld [vmem:[#allocation3 + $0x28] sm:$0xff] }
 0x702   :  { %2596 = vmatpush1.bf16.msra.mxu0 %v2387_v27  ;;  %2760 = vmatpush1.bf16.msra.mxu1 %v2389_v19  ;;  %v2445_v27 = vunpack.c.h.s8.bf16 %v1997_v34  ;;  %v2007_v19 = vunpack.c.l.s8.bf16 %v1783_v38 }
 0x703   :  { %2597 = vmatprep.subr.bf16.mxu0 %v2395_v62  ;;  %2761 = vmatprep.subr.bf16.mxu1 %v2397_v39  ;;  %v1782_v62 = vld [vmem:[#allocation3 + $0x20] sm:$0xff]  ;;  %v2064_v39 = vunpack.c.l.s8.bf16 %v1812_v24 }
 0x706   :  { %2598 = vmatpush1.bf16.msra.mxu0 %v2394_v42  ;;  %2762 = vmatpush1.bf16.msra.mxu1 %v2396_v50  ;;  %v2006_v42 = vunpack.c.l.s8.bf16 %v1782_v62  ;;  %v2008_v50 = vunpack.c.l.s8.bf16 %v1784_v40 }
 0x707   :  { %2599 = vmatprep.subr.bf16.mxu0 %v2402_v51  ;;  %2763 = vmatprep.subr.bf16.mxu1 %v2404_v52  ;;  %v2014_v51 = vunpack.c.h.s8.bf16 %v1783_v38  ;;  %v2071_v52 = vunpack.c.h.s8.bf16 %v1812_v24 }
 0x70a   :  { %2600 = vmatpush1.bf16.msra.mxu0 %v2401_v57  ;;  %2764 = vmatpush1.bf16.msra.mxu1 %v2403_v30  ;;  %v2013_v57 = vunpack.c.h.s8.bf16 %v1782_v62  ;;  %v2015_v30 = vunpack.c.h.s8.bf16 %v1784_v40  ;;  %v1840_v62 = vld [vmem:[#allocation3 + $0x1f0] sm:$0xff] }
 0x70b   :  { %2601 = vmatprep.subr.bf16.mxu0 %v2409_v44  ;;  %2765 = vmatprep.subr.bf16.mxu1 %v2411_v10  ;;  %v1789_v44 = vld [vmem:[#allocation3 + $0x58] sm:$0xff]  ;;  %v2078_v10 = vunpack.c.l.s8.bf16 %v1819_v56  ;;  %v2120_v40 = vunpack.c.l.s8.bf16 %v1840_v62 }
 0x70c   :  { %v2020_v61 = vunpack.c.l.s8.bf16 %v1789_v44  ;;  %v2027_v9 = vunpack.c.h.s8.bf16 %v1789_v44  ;;  %v1847_v44 = vld [vmem:[#allocation3 + $0x228] sm:$0xff] }
 0x70e   :  { %2602 = vmatpush1.bf16.msra.mxu0 %v2408_v3  ;;  %2766 = vmatpush1.bf16.msra.mxu1 %v2410_v43  ;;  %v2022_v3 = vunpack.c.l.s8.bf16 %v1791_v55  ;;  %v2028_v43 = vunpack.c.h.s8.bf16 %v1790_v8 }
 0x70f   :  { %2603 = vmatprep.subr.bf16.mxu0 %v2416_v49  ;;  %2767 = vmatprep.subr.bf16.mxu1 %v2418_v2  ;;  %v2085_v49 = vunpack.c.h.s8.bf16 %v1819_v56  ;;  %v1797_v2 = vld [vmem:[#allocation3 + $0x98] sm:$0xff]  ;;  %v2127_v56 = vunpack.c.h.s8.bf16 %v1840_v62 }
 0x712   :  { %2604 = vmatpush1.bf16.msra.mxu0 %v2415_v37  ;;  %2768 = vmatpush1.bf16.msra.mxu1 %v2417_v5  ;;  %v2029_v37 = vunpack.c.h.s8.bf16 %v1791_v55  ;;  %v2035_v5 = vunpack.c.l.s8.bf16 %v1797_v2  ;;  %v2134_v55 = vunpack.c.l.s8.bf16 %v1847_v44 }
 0x713   :  { %2605 = vmatprep.subr.bf16.mxu0 %v2423_v13  ;;  %2769 = vmatprep.subr.bf16.mxu1 %v2425_v15  ;;  %v1796_v13 = vld [vmem:[#allocation3 + $0x90] sm:$0xff]  ;;  %v2092_v15 = vunpack.c.l.s8.bf16 %v1826_v4 }
 0x714   :  { %v2034_v20 = vunpack.c.l.s8.bf16 %v1796_v13  ;;  %v2041_v23 = vunpack.c.h.s8.bf16 %v1796_v13  ;;  %v1854_v13 = vld [vmem:[#allocation3 + $0x260] sm:$0xff] }
 0x716   :  { %2606 = vmatpush1.bf16.msra.mxu0 %v2422_v6  ;;  %2770 = vmatpush1.bf16.msra.mxu1 %v2424_v59  ;;  %v2042_v6 = vunpack.c.h.s8.bf16 %v1797_v2  ;;  %v2099_v59 = vunpack.c.h.s8.bf16 %v1826_v4  ;;  %v2141_v4 = vunpack.c.h.s8.bf16 %v1847_v44 }
 0x717   :  { %2607 = vmatprep.subr.bf16.mxu0 %v2430_v14  ;;  %2771 = vmatprep.subr.bf16.mxu1 %v2432_v22  ;;  %v1804_v14 = vld [vmem:[#allocation3 + $0xd0] sm:$0xff]  ;;  %v1833_v22 = vld [vmem:[#allocation3 + $0x1b8] sm:$0xff] }
 0x71a   :  { %2608 = vmatpush1.bf16.msra.mxu0 %v2429_v12  ;;  %2772 = vmatpush1.bf16.msra.mxu1 %v2431_v29  ;;  %v2049_v12 = vunpack.c.l.s8.bf16 %v1804_v14  ;;  %v1803_v29 = vld [vmem:[#allocation3 + $0xc8] sm:$0xff] }
 0x71b   :  { %2609 = vmatprep.subr.bf16.mxu0 %v2437_v31  ;;  %2773 = vmatprep.subr.bf16.mxu1 %v2439_v32  ;;  %v2106_v31 = vunpack.c.l.s8.bf16 %v1833_v22  ;;  %v1805_v32 = vld [vmem:[#allocation3 + $0xd8] sm:$0xff]  ;;  %v2048_v33 = vunpack.c.l.s8.bf16 %v1803_v29  ;;  %v2055_v38 = vunpack.c.h.s8.bf16 %v1803_v29 }
 0x71c   :  { %v2050_v34 = vunpack.c.l.s8.bf16 %v1805_v32  ;;  %v2057_v24 = vunpack.c.h.s8.bf16 %v1805_v32  ;;  %v1861_v29 = vld [vmem:[#allocation3 + $0x298] sm:$0xff] }
 0x71d   :  { %v2162_v32 = vunpack.c.l.s8.bf16 %v1861_v29 }
 0x71e   :  { %2610 = vmatpush1.bf16.msra.mxu0 %v2436_v26  ;;  %2774 = vmatpush1.bf16.msra.mxu1 %v2438_v11  ;;  %v2056_v26 = vunpack.c.h.s8.bf16 %v1804_v14  ;;  %v2113_v11 = vunpack.c.h.s8.bf16 %v1833_v22  ;;  %v2155_v22 = vunpack.c.h.s8.bf16 %v1854_v13 }
 0x71f   :  { %2611 = vmatprep.subr.bf16.mxu0 %v2444_v35  ;;  %2775 = vmatprep.subr.bf16.mxu1 %v2446_v36  ;;  %v1811_v35 = vld [vmem:[#allocation3 + $0x108] sm:$0xff]  ;;  %v1868_v36 = vld [vmem:[#allocation3 + $0x2d0] sm:$0xff] }
 0x722   :  { %2612 = vmatpush1.bf16.msra.mxu0 %v2443_v25  ;;  %2776 = vmatpush1.bf16.msra.mxu1 %v2445_v27  ;;  %v2063_v25 = vunpack.c.l.s8.bf16 %v1811_v35  ;;  %v1810_v27 = vld [vmem:[#allocation3 + $0x100] sm:$0xff] }
 0x723   :  { %2786 = vmatprep.subr.bf16.mxu0 %v2007_v19  ;;  %3281 = vmatprep.subr.bf16.mxu1 %v2064_v39  ;;  %v2176_v19 = vunpack.c.l.s8.bf16 %v1868_v36  ;;  %v2062_v39 = vunpack.c.l.s8.bf16 %v1810_v27  ;;  %v2069_v8 = vunpack.c.h.s8.bf16 %v1810_v27  ;;  %v1896_v27 = vld [vmem:[#allocation3 + $0x3b0] sm:$0xff] }
 0x724   :  { %v2232_v62 = vunpack.c.l.s8.bf16 %v1896_v27 }
 0x725   :  { %2614 = vmatmul.mubr.bf16.vlgmr.msra.gmra.mrb[12].mxu0 %v4036_v0  ;;  %2778 = vmatmul.mubr.bf16.vlgmr.msra.gmra.mrb[20].mxu1 %v4036_v0 }
 0x726   :  { %2787 = vmatpush1.bf16.msra.mxu0 %v2006_v42  ;;  %3282 = vmatpush3.bf16.msra.mxu1 %v2008_v50  ;;  %v2070_v42 = vunpack.c.h.s8.bf16 %v1811_v35  ;;  %v2183_v50 = vunpack.c.h.s8.bf16 %v1868_v36  ;;  %v2169_v36 = vunpack.c.h.s8.bf16 %v1861_v29 }
 0x727   :  { %2788 = vmatprep.subr.bf16.mxu0 %v2014_v51  ;;  %3283 = vmatprep.subr.bf16.mxu1 %v2071_v52  ;;  %v1818_v51 = vld [vmem:[#allocation3 + $0x140] sm:$0xff]  ;;  %v1875_v52 = vld [vmem:[#allocation3 + $0x308] sm:$0xff] }
 0x728   :  { %2818 = vmatprep.mubr.bf16.mxu0 %v3994_v45  ;;  %2982 = vmatprep.mubr.bf16.mxu1 %v3994_v45  ;;  %v1798_v45 = vld [vmem:[#allocation3 + $0xa0] sm:$0xff] }
 0x729   :  { %v2036_v21 = vunpack.c.l.s8.bf16 %v1798_v45  ;;  %v2043_v28 = vunpack.c.h.s8.bf16 %v1798_v45  ;;  %v2148_v45 = vunpack.c.l.s8.bf16 %v1854_v13 }
 0x72a   :  { %2789 = vmatpush1.bf16.msra.mxu0 %v2013_v57  ;;  %3284 = vmatpush3.bf16.msra.mxu1 %v2015_v30  ;;  %v2077_v57 = vunpack.c.l.s8.bf16 %v1818_v51  ;;  %v1817_v30 = vld [vmem:[#allocation3 + $0x138] sm:$0xff] }
 0x72b   :  { %2790 = vmatprep.subr.bf16.mxu0 %v2021_v41  ;;  %3285 = vmatprep.subr.bf16.mxu1 %v2078_v10  ;;  %v2190_v41 = vunpack.c.l.s8.bf16 %v1875_v52  ;;  %v2076_v10 = vunpack.c.l.s8.bf16 %v1817_v30  ;;  %v2083_v2 = vunpack.c.h.s8.bf16 %v1817_v30  ;;  %v1903_v30 = vld [vmem:[#allocation3 + $0x3e8] sm:$0xff] }
 0x72e   :  { %2791 = vmatpush1.bf16.msra.mxu0 %v2020_v61  ;;  %3286 = vmatpush3.bf16.msra.mxu1 %v2022_v3  ;;  %v2084_v61 = vunpack.c.h.s8.bf16 %v1818_v51  ;;  %v2197_v3 = vunpack.c.h.s8.bf16 %v1875_v52  ;;  %v2239_v52 = vunpack.c.h.s8.bf16 %v1896_v27 }
 0x72f   :  { %2792 = vmatprep.subr.bf16.mxu0 %v2028_v43  ;;  %3287 = vmatprep.subr.bf16.mxu1 %v2085_v49  ;;  %v1825_v43 = vld [vmem:[#allocation3 + $0x178] sm:$0xff]  ;;  %v1882_v49 = vld [vmem:[#allocation3 + $0x340] sm:$0xff] }
 0x732   :  { %2793 = vmatpush1.bf16.msra.mxu0 %v2027_v9  ;;  %3288 = vmatpush3.bf16.msra.mxu1 %v2029_v37  ;;  %v2091_v9 = vunpack.c.l.s8.bf16 %v1825_v43  ;;  %v1824_v37 = vld [vmem:[#allocation3 + $0x170] sm:$0xff] }
 0x733   :  { %2794 = vmatprep.subr.bf16.mxu0 %v2035_v5  ;;  %3289 = vmatprep.subr.bf16.mxu1 %v2092_v15  ;;  %v2204_v5 = vunpack.c.l.s8.bf16 %v1882_v49  ;;  %v2090_v15 = vunpack.c.l.s8.bf16 %v1824_v37  ;;  %v2097_v14 = vunpack.c.h.s8.bf16 %v1824_v37 }
 0x736   :  { %2795 = vmatpush1.bf16.msra.mxu0 %v2034_v20  ;;  %3290 = vmatpush3.bf16.msra.mxu1 %v2036_v21  ;;  %v2098_v20 = vunpack.c.h.s8.bf16 %v1825_v43  ;;  %v2211_v21 = vunpack.c.h.s8.bf16 %v1882_v49  ;;  %v2253_v43 = vunpack.c.h.s8.bf16 %v1903_v30 }
 0x737   :  { %2796 = vmatprep.subr.bf16.mxu0 %v2042_v6  ;;  %3291 = vmatprep.subr.bf16.mxu1 %v2099_v59  ;;  %v1832_v6 = vld [vmem:[#allocation3 + $0x1b0] sm:$0xff]  ;;  %v1889_v59 = vld [vmem:[#allocation3 + $0x378] sm:$0xff] }
 0x73a   :  { %2797 = vmatpush1.bf16.msra.mxu0 %v2041_v23  ;;  %3292 = vmatpush3.bf16.msra.mxu1 %v2043_v28  ;;  %v2105_v23 = vunpack.c.l.s8.bf16 %v1832_v6  ;;  %v1831_v28 = vld [vmem:[#allocation3 + $0x1a8] sm:$0xff] }
 0x73b   :  { %2798 = vmatprep.subr.bf16.mxu0 %v2049_v12  ;;  %3293 = vmatprep.subr.bf16.mxu1 %v2106_v31  ;;  %v2218_v12 = vunpack.c.l.s8.bf16 %v1889_v59  ;;  %v2104_v31 = vunpack.c.l.s8.bf16 %v1831_v28  ;;  %v2111_v35 = vunpack.c.h.s8.bf16 %v1831_v28 }
 0x73e   :  { %2799 = vmatpush1.bf16.msra.mxu0 %v2048_v33  ;;  %3294 = vmatpush3.bf16.msra.mxu1 %v2050_v34  ;;  %v2112_v33 = vunpack.c.h.s8.bf16 %v1832_v6  ;;  %v2225_v34 = vunpack.c.h.s8.bf16 %v1889_v59  ;;  %v1859_v59 = vld [vmem:[#allocation3 + $0x288] sm:$0xff] }
 0x73f   :  { %2800 = vmatprep.subr.bf16.mxu0 %v2056_v26  ;;  %3295 = vmatprep.subr.bf16.mxu1 %v2113_v11  ;;  %v1839_v26 = vld [vmem:[#allocation3 + $0x1e8] sm:$0xff]  ;;  %v1924_v11 = vld [vmem:[#allocation3 + $0x490] sm:$0xff] }
 0x742   :  { %2801 = vmatpush1.bf16.msra.mxu0 %v2055_v38  ;;  %3296 = vmatpush3.bf16.msra.mxu1 %v2057_v24  ;;  %v2119_v38 = vunpack.c.l.s8.bf16 %v1839_v26  ;;  %v1838_v24 = vld [vmem:[#allocation3 + $0x1e0] sm:$0xff] }
 0x743   :  { %2802 = vmatprep.subr.bf16.mxu0 %v2063_v25  ;;  %3303 = vmatprep.subr.bf16.mxu1 %v2176_v19  ;;  %v2288_v25 = vunpack.c.l.s8.bf16 %v1924_v11  ;;  %v2118_v19 = vunpack.c.l.s8.bf16 %v1838_v24  ;;  %v2125_v51 = vunpack.c.h.s8.bf16 %v1838_v24 }
 0x745   :  { %2983 = vmatmul.mubr.bf16.vlgmr.msra.gmra.mrb[24].mxu1 %v4000_v47 }
 0x746   :  { %2803 = vmatpush1.bf16.msra.mxu0 %v2062_v39  ;;  %3304 = vmatpush3.bf16.msra.mxu1 %v2120_v40  ;;  %v2126_v39 = vunpack.c.h.s8.bf16 %v1839_v26  ;;  %v2295_v40 = vunpack.c.h.s8.bf16 %v1924_v11  ;;  %v1866_v11 = vld [vmem:[#allocation3 + $0x2c0] sm:$0xff] }
 0x747   :  { %2804 = vmatprep.subr.bf16.mxu0 %v2070_v42  ;;  %3305 = vmatprep.subr.bf16.mxu1 %v2183_v50  ;;  %v1846_v42 = vld [vmem:[#allocation3 + $0x220] sm:$0xff]  ;;  %v1931_v50 = vld [vmem:[#allocation3 + $0x4c8] sm:$0xff] }
 0x748   :  { %3022 = vmatprep.mubr.bf16.mxu1 %v4004_v48  ;;  %v2140_v44 = vunpack.c.h.s8.bf16 %v1846_v42 }
 0x74a   :  { %2805 = vmatpush1.bf16.msra.mxu0 %v2069_v8  ;;  %3306 = vmatpush3.bf16.msra.mxu1 %v2127_v56  ;;  %v2133_v8 = vunpack.c.l.s8.bf16 %v1846_v42  ;;  %v1845_v56 = vld [vmem:[#allocation3 + $0x218] sm:$0xff] }
 0x74b   :  { %2806 = vmatprep.subr.bf16.mxu0 %v2077_v57  ;;  %3307 = vmatprep.subr.bf16.mxu1 %v2190_v41  ;;  %v2302_v57 = vunpack.c.l.s8.bf16 %v1931_v50  ;;  %v2132_v41 = vunpack.c.l.s8.bf16 %v1845_v56 }
 0x74e   :  { %2807 = vmatpush1.bf16.msra.mxu0 %v2076_v10  ;;  %3308 = vmatpush3.bf16.msra.mxu1 %v2134_v55  ;;  %v2309_v10 = vunpack.c.h.s8.bf16 %v1931_v50  ;;  %v1853_v55 = vld [vmem:[#allocation3 + $0x258] sm:$0xff] }
 0x74f   :  { %2808 = vmatprep.subr.bf16.mxu0 %v2084_v61  ;;  %3309 = vmatprep.subr.bf16.mxu1 %v2197_v3  ;;  %v1938_v61 = vld [vmem:[#allocation3 + $0x500] sm:$0xff]  ;;  %v2139_v3 = vunpack.c.h.s8.bf16 %v1845_v56  ;;  %v2147_v49 = vunpack.c.l.s8.bf16 %v1853_v55  ;;  %v1873_v50 = vld [vmem:[#allocation3 + $0x2f8] sm:$0xff] }
 0x750   :  { %v2323_v13 = vunpack.c.h.s8.bf16 %v1938_v61 }
 0x752   :  { %2809 = vmatpush1.bf16.msra.mxu0 %v2083_v2  ;;  %3310 = vmatpush3.bf16.msra.mxu1 %v2141_v4  ;;  %v1852_v2 = vld [vmem:[#allocation3 + $0x250] sm:$0xff]  ;;  %v1910_v4 = vld [vmem:[#allocation3 + $0x420] sm:$0xff] }
 0x753   :  { %2810 = vmatprep.subr.bf16.mxu0 %v2091_v9  ;;  %3311 = vmatprep.subr.bf16.mxu1 %v2204_v5  ;;  %v2146_v9 = vunpack.c.l.s8.bf16 %v1852_v2  ;;  %v2260_v37 = vunpack.c.l.s8.bf16 %v1910_v4  ;;  %v2154_v5 = vunpack.c.h.s8.bf16 %v1853_v55 }
 0x756   :  { %2811 = vmatpush1.bf16.msra.mxu0 %v2090_v15  ;;  %3312 = vmatpush3.bf16.msra.mxu1 %v2148_v45  ;;  %v1860_v15 = vld [vmem:[#allocation3 + $0x290] sm:$0xff]  ;;  %v1945_v45 = vld [vmem:[#allocation3 + $0x538] sm:$0xff] }
 0x757   :  { %2812 = vmatprep.subr.bf16.mxu0 %v2098_v20  ;;  %3313 = vmatprep.subr.bf16.mxu1 %v2211_v21  ;;  %v2153_v20 = vunpack.c.h.s8.bf16 %v1852_v2  ;;  %v2267_v21 = vunpack.c.h.s8.bf16 %v1910_v4  ;;  %v2161_v6 = vunpack.c.l.s8.bf16 %v1860_v15  ;;  %v2337_v29 = vunpack.c.h.s8.bf16 %v1945_v45 }
 0x75a   :  { %2813 = vmatpush1.bf16.msra.mxu0 %v2097_v14  ;;  %3314 = vmatpush3.bf16.msra.mxu1 %v2155_v22  ;;  %v2330_v14 = vunpack.c.l.s8.bf16 %v1945_v45  ;;  %v1917_v22 = vld [vmem:[#allocation3 + $0x458] sm:$0xff]  ;;  %v1887_v45 = vld [vmem:[#allocation3 + $0x368] sm:$0xff] }
 0x75b   :  { %2814 = vmatprep.subr.bf16.mxu0 %v2105_v23  ;;  %3315 = vmatprep.subr.bf16.mxu1 %v2218_v12  ;;  %v2160_v23 = vunpack.c.l.s8.bf16 %v1859_v59  ;;  %v2274_v28 = vunpack.c.l.s8.bf16 %v1917_v22  ;;  %v2168_v12 = vunpack.c.h.s8.bf16 %v1860_v15 }
 0x75e   :  { %2815 = vmatpush1.bf16.msra.mxu0 %v2104_v31  ;;  %3316 = vmatpush3.bf16.msra.mxu1 %v2162_v32  ;;  %v1867_v31 = vld [vmem:[#allocation3 + $0x2c8] sm:$0xff]  ;;  %v1980_v32 = vld [vmem:[#allocation3 + $0x650] sm:$0xff] }
 0x75f   :  { %2816 = vmatprep.subr.bf16.mxu0 %v2112_v33  ;;  %3317 = vmatprep.subr.bf16.mxu1 %v2225_v34  ;;  %v2167_v33 = vunpack.c.h.s8.bf16 %v1859_v59  ;;  %v2281_v34 = vunpack.c.h.s8.bf16 %v1917_v22  ;;  %v2175_v26 = vunpack.c.l.s8.bf16 %v1867_v31  ;;  %v2407_v27 = vunpack.c.h.s8.bf16 %v1980_v32 }
 0x762   :  { %2817 = vmatpush1.bf16.msra.mxu0 %v2111_v35  ;;  %3318 = vmatpush3.bf16.msra.mxu1 %v2169_v36  ;;  %v2400_v35 = vunpack.c.l.s8.bf16 %v1980_v32  ;;  %v1952_v36 = vld [vmem:[#allocation3 + $0x570] sm:$0xff] }
 0x763   :  { %2827 = vmatprep.subr.bf16.mxu0 %v2119_v38  ;;  %3325 = vmatprep.subr.bf16.mxu1 %v2288_v25  ;;  %v2174_v38 = vunpack.c.l.s8.bf16 %v1866_v11  ;;  %v2344_v24 = vunpack.c.l.s8.bf16 %v1952_v36  ;;  %v2182_v25 = vunpack.c.h.s8.bf16 %v1867_v31  ;;  %v1894_v31 = vld [vmem:[#allocation3 + $0x3a0] sm:$0xff] }
 0x764   :  { %v2230_v32 = vunpack.c.l.s8.bf16 %v1894_v31 }
 0x765   :  { %2819 = vmatmul.mubr.bf16.vlgmr.msra.gmra.mrb[16].mxu0 %v4000_v47  ;;  %3023 = vmatmul.mubr.bf16.vlgmr.msra.gmra.mrb[28].mxu1 %v4012_v7  ;;  %v2246_v47 = vunpack.c.l.s8.bf16 %v1903_v30 }
 0x766   :  { %2828 = vmatpush1.bf16.msra.mxu0 %v2118_v19  ;;  %3326 = vmatpush3.bf16.msra.mxu1 %v2232_v62  ;;  %v1874_v19 = vld [vmem:[#allocation3 + $0x300] sm:$0xff]  ;;  %v1987_v62 = vld [vmem:[#allocation3 + $0x688] sm:$0xff] }
 0x767   :  { %2829 = vmatprep.subr.bf16.mxu0 %v2126_v39  ;;  %3327 = vmatprep.subr.bf16.mxu1 %v2295_v40  ;;  %v2181_v39 = vunpack.c.h.s8.bf16 %v1866_v11  ;;  %v2351_v40 = vunpack.c.h.s8.bf16 %v1952_v36  ;;  %v2189_v42 = vunpack.c.l.s8.bf16 %v1874_v19  ;;  %v2421_v30 = vunpack.c.h.s8.bf16 %v1987_v62 }
 0x768   :  { %2859 = vmatprep.mubr.bf16.mxu0 %v4004_v48  ;;  %3062 = vmatprep.mubr.bf16.mxu1 %v4016_v60  ;;  %v2316_v48 = vunpack.c.l.s8.bf16 %v1938_v61  ;;  %v1880_v61 = vld [vmem:[#allocation3 + $0x330] sm:$0xff] }
 0x76a   :  { %2830 = vmatpush1.bf16.msra.mxu0 %v2125_v51  ;;  %3328 = vmatpush3.bf16.msra.mxu1 %v2239_v52  ;;  %v2414_v51 = vunpack.c.l.s8.bf16 %v1987_v62  ;;  %v1959_v52 = vld [vmem:[#allocation3 + $0x5a8] sm:$0xff] }
 0x76b   :  { %2831 = vmatprep.subr.bf16.mxu0 %v2133_v8  ;;  %3329 = vmatprep.subr.bf16.mxu1 %v2302_v57  ;;  %v2188_v8 = vunpack.c.l.s8.bf16 %v1873_v50  ;;  %v2358_v56 = vunpack.c.l.s8.bf16 %v1959_v52  ;;  %v2196_v57 = vunpack.c.h.s8.bf16 %v1874_v19  ;;  %v1908_v19 = vld [vmem:[#allocation3 + $0x410] sm:$0xff] }
 0x76e   :  { %2832 = vmatpush1.bf16.msra.mxu0 %v2132_v41  ;;  %3330 = vmatpush3.bf16.msra.mxu1 %v2246_v47  ;;  %v1881_v41 = vld [vmem:[#allocation3 + $0x338] sm:$0xff]  ;;  %v1994_v47 = vld [vmem:[#allocation3 + $0x6c0] sm:$0xff] }
 0x76f   :  { %2833 = vmatprep.subr.bf16.mxu0 %v2140_v44  ;;  %3331 = vmatprep.subr.bf16.mxu1 %v2309_v10  ;;  %v2195_v44 = vunpack.c.h.s8.bf16 %v1873_v50  ;;  %v2365_v10 = vunpack.c.h.s8.bf16 %v1959_v52  ;;  %v2203_v55 = vunpack.c.l.s8.bf16 %v1881_v41  ;;  %v2435_v4 = vunpack.c.h.s8.bf16 %v1994_v47  ;;  %v1923_v52 = vld [vmem:[#allocation3 + $0x488] sm:$0xff] }
 0x772   :  { %2834 = vmatpush1.bf16.msra.mxu0 %v2139_v3  ;;  %3332 = vmatpush3.bf16.msra.mxu1 %v2253_v43  ;;  %v2428_v3 = vunpack.c.l.s8.bf16 %v1994_v47  ;;  %v1966_v43 = vld [vmem:[#allocation3 + $0x5e0] sm:$0xff] }
 0x773   :  { %2835 = vmatprep.subr.bf16.mxu0 %v2147_v49  ;;  %3333 = vmatprep.subr.bf16.mxu1 %v2316_v48  ;;  %v2202_v49 = vunpack.c.l.s8.bf16 %v1880_v61  ;;  %v2372_v2 = vunpack.c.l.s8.bf16 %v1966_v43  ;;  %v2210_v48 = vunpack.c.h.s8.bf16 %v1881_v41  ;;  %v2294_v41 = vunpack.c.h.s8.bf16 %v1923_v52  ;;  %v1930_v47 = vld [vmem:[#allocation3 + $0x4c0] sm:$0xff] }
 0x776   :  { %2836 = vmatpush1.bf16.msra.mxu0 %v2146_v9  ;;  %3334 = vmatpush3.bf16.msra.mxu1 %v2260_v37  ;;  %v1888_v9 = vld [vmem:[#allocation3 + $0x370] sm:$0xff]  ;;  %v2001_v37 = vld [vmem:[#allocation3 + $0x6f8] sm:$0xff] }
 0x777   :  { %2837 = vmatprep.subr.bf16.mxu0 %v2154_v5  ;;  %3335 = vmatprep.subr.bf16.mxu1 %v2323_v13  ;;  %v2209_v5 = vunpack.c.h.s8.bf16 %v1880_v61  ;;  %v2379_v13 = vunpack.c.h.s8.bf16 %v1966_v43  ;;  %v2217_v15 = vunpack.c.l.s8.bf16 %v1888_v9  ;;  %v2449_v22 = vunpack.c.h.s8.bf16 %v2001_v37  ;;  %v1937_v43 = vld [vmem:[#allocation3 + $0x4f8] sm:$0xff] }
 0x77a   :  { %2838 = vmatpush1.bf16.msra.mxu0 %v2153_v20  ;;  %3336 = vmatpush3.bf16.msra.mxu1 %v2267_v21  ;;  %v2442_v20 = vunpack.c.l.s8.bf16 %v2001_v37  ;;  %v1973_v21 = vld [vmem:[#allocation3 + $0x618] sm:$0xff]  ;;  %v1944_v37 = vld [vmem:[#allocation3 + $0x530] sm:$0xff] }
 0x77b   :  { %2839 = vmatprep.subr.bf16.mxu0 %v2161_v6  ;;  %3337 = vmatprep.subr.bf16.mxu1 %v2330_v14  ;;  %v2216_v6 = vunpack.c.l.s8.bf16 %v1887_v45  ;;  %v2386_v59 = vunpack.c.l.s8.bf16 %v1973_v21  ;;  %v2224_v14 = vunpack.c.h.s8.bf16 %v1888_v9  ;;  %v2322_v9 = vunpack.c.h.s8.bf16 %v1937_v43 }
 0x77e   :  { %2840 = vmatpush1.bf16.msra.mxu0 %v2160_v23  ;;  %3338 = vmatpush3.bf16.msra.mxu1 %v2274_v28  ;;  %v1895_v23 = vld [vmem:[#allocation3 + $0x3a8] sm:$0xff]  ;;  %v2223_v28 = vunpack.c.h.s8.bf16 %v1887_v45 }
 0x77f   :  { %2841 = vmatprep.subr.bf16.mxu0 %v2168_v12  ;;  %3339 = vmatprep.subr.bf16.mxu1 %v2337_v29  ;;  %v2393_v12 = vunpack.c.h.s8.bf16 %v1973_v21  ;;  %v2231_v29 = vunpack.c.l.s8.bf16 %v1895_v23  ;;  %v1951_v21 = vld [vmem:[#allocation3 + $0x568] sm:$0xff] }
 0x782   :  { %2842 = vmatpush1.bf16.msra.mxu0 %v2167_v33  ;;  %3340 = vmatpush3.bf16.msra.mxu1 %v2281_v34  ;;  %v2238_v33 = vunpack.c.h.s8.bf16 %v1895_v23  ;;  %v1902_v34 = vld [vmem:[#allocation3 + $0x3e0] sm:$0xff]  ;;  %v2350_v23 = vunpack.c.h.s8.bf16 %v1951_v21 }
 0x783   :  { %2843 = vmatprep.subr.bf16.mxu0 %v2175_v26  ;;  %3347 = vmatprep.subr.bf16.mxu1 %v2400_v35  ;;  %v2237_v26 = vunpack.c.h.s8.bf16 %v1894_v31  ;;  %v2245_v11 = vunpack.c.l.s8.bf16 %v1902_v34  ;;  %v1901_v35 = vld [vmem:[#allocation3 + $0x3d8] sm:$0xff] }
 0x784   :  { %v2244_v36 = vunpack.c.l.s8.bf16 %v1901_v35  ;;  %v1957_v31 = vld [vmem:[#allocation3 + $0x598] sm:$0xff] }
 0x785   :  { %3063 = vmatmul.mubr.bf16.vlgmr.msra.gmra.mrb[32].mxu1 %v4024_v46 }
 0x786   :  { %2844 = vmatpush1.bf16.msra.mxu0 %v2174_v38  ;;  %3348 = vmatpush3.bf16.msra.mxu1 %v2344_v24  ;;  %v2252_v38 = vunpack.c.h.s8.bf16 %v1902_v34  ;;  %v1909_v24 = vld [vmem:[#allocation3 + $0x418] sm:$0xff] }
 0x787   :  { %2845 = vmatprep.subr.bf16.mxu0 %v2182_v25  ;;  %3349 = vmatprep.subr.bf16.mxu1 %v2407_v27  ;;  %v2251_v25 = vunpack.c.h.s8.bf16 %v1901_v35  ;;  %v2259_v27 = vunpack.c.l.s8.bf16 %v1909_v24  ;;  %v2266_v62 = vunpack.c.h.s8.bf16 %v1909_v24  ;;  %v1965_v34 = vld [vmem:[#allocation3 + $0x5d8] sm:$0xff]  ;;  %v1964_v35 = vld [vmem:[#allocation3 + $0x5d0] sm:$0xff] }
 0x788   :  { %3102 = vmatprep.mubr.bf16.mxu1 %v4028_v58  ;;  %v1972_v24 = vld [vmem:[#allocation3 + $0x610] sm:$0xff] }
 0x78a   :  { %2846 = vmatpush1.bf16.msra.mxu0 %v2181_v39  ;;  %3350 = vmatpush3.bf16.msra.mxu1 %v2351_v40  ;;  %v1916_v39 = vld [vmem:[#allocation3 + $0x450] sm:$0xff] }
 0x78b   :  { %2847 = vmatprep.subr.bf16.mxu0 %v2189_v42  ;;  %3351 = vmatprep.subr.bf16.mxu1 %v2414_v51  ;;  %v2273_v40 = vunpack.c.l.s8.bf16 %v1916_v39  ;;  %v1915_v42 = vld [vmem:[#allocation3 + $0x448] sm:$0xff]  ;;  %v2280_v51 = vunpack.c.h.s8.bf16 %v1916_v39 }
 0x78c   :  { %v2272_v50 = vunpack.c.l.s8.bf16 %v1915_v42 }
 0x78e   :  { %2848 = vmatpush1.bf16.msra.mxu0 %v2188_v8  ;;  %3352 = vmatpush3.bf16.msra.mxu1 %v2358_v56  ;;  %v2279_v8 = vunpack.c.h.s8.bf16 %v1915_v42  ;;  %v2287_v56 = vunpack.c.l.s8.bf16 %v1923_v52  ;;  %v1971_v42 = vld [vmem:[#allocation3 + $0x608] sm:$0xff] }
 0x78f   :  { %2849 = vmatprep.subr.bf16.mxu0 %v2196_v57  ;;  %3353 = vmatprep.subr.bf16.mxu1 %v2421_v30  ;;  %v1922_v57 = vld [vmem:[#allocation3 + $0x480] sm:$0xff] }
 0x790   :  { %v2286_v30 = vunpack.c.l.s8.bf16 %v1922_v57 }
 0x792   :  { %2850 = vmatpush1.bf16.msra.mxu0 %v2195_v44  ;;  %3354 = vmatpush3.bf16.msra.mxu1 %v2365_v10  ;;  %v2293_v44 = vunpack.c.h.s8.bf16 %v1922_v57  ;;  %v2301_v10 = vunpack.c.l.s8.bf16 %v1930_v47 }
 0x793   :  { %2851 = vmatprep.subr.bf16.mxu0 %v2203_v55  ;;  %3355 = vmatprep.subr.bf16.mxu1 %v2428_v3  ;;  %v1929_v55 = vld [vmem:[#allocation3 + $0x4b8] sm:$0xff]  ;;  %v2308_v3 = vunpack.c.h.s8.bf16 %v1930_v47 }
 0x794   :  { %v2300_v61 = vunpack.c.l.s8.bf16 %v1929_v55 }
 0x796   :  { %2852 = vmatpush1.bf16.msra.mxu0 %v2202_v49  ;;  %3356 = vmatpush3.bf16.msra.mxu1 %v2372_v2  ;;  %v2307_v49 = vunpack.c.h.s8.bf16 %v1929_v55  ;;  %v2315_v2 = vunpack.c.l.s8.bf16 %v1937_v43 }
 0x797   :  { %2853 = vmatprep.subr.bf16.mxu0 %v2210_v48  ;;  %3357 = vmatprep.subr.bf16.mxu1 %v2435_v4  ;;  %v1936_v48 = vld [vmem:[#allocation3 + $0x4f0] sm:$0xff] }
 0x798   :  { %v2314_v4 = vunpack.c.l.s8.bf16 %v1936_v48 }
 0x79a   :  { %2854 = vmatpush1.bf16.msra.mxu0 %v2209_v5  ;;  %3358 = vmatpush3.bf16.msra.mxu1 %v2379_v13  ;;  %v2321_v5 = vunpack.c.h.s8.bf16 %v1936_v48  ;;  %v2329_v13 = vunpack.c.l.s8.bf16 %v1944_v37  ;;  %v1979_v48 = vld [vmem:[#allocation3 + $0x648] sm:$0xff] }
 0x79b   :  { %2855 = vmatprep.subr.bf16.mxu0 %v2217_v15  ;;  %3359 = vmatprep.subr.bf16.mxu1 %v2442_v20  ;;  %v1943_v15 = vld [vmem:[#allocation3 + $0x528] sm:$0xff]  ;;  %v2336_v20 = vunpack.c.h.s8.bf16 %v1944_v37 }
 0x79c   :  { %v2328_v45 = vunpack.c.l.s8.bf16 %v1943_v15 }
 0x79e   :  { %2856 = vmatpush1.bf16.msra.mxu0 %v2216_v6  ;;  %3360 = vmatpush3.bf16.msra.mxu1 %v2386_v59  ;;  %v2335_v6 = vunpack.c.h.s8.bf16 %v1943_v15  ;;  %v2343_v59 = vunpack.c.l.s8.bf16 %v1951_v21 }
 0x79f   :  { %2857 = vmatprep.subr.bf16.mxu0 %v2224_v14  ;;  %3361 = vmatprep.subr.bf16.mxu1 %v2449_v22  ;;  %v1950_v14 = vld [vmem:[#allocation3 + $0x560] sm:$0xff] }
 0x7a0   :  { %v2342_v22 = vunpack.c.l.s8.bf16 %v1950_v14 }
 0x7a2   :  { %2858 = vmatpush1.bf16.msra.mxu0 %v2223_v28  ;;  %3362 = vmatpush3.bf16.msra.mxu1 %v2393_v12  ;;  %v1958_v28 = vld [vmem:[#allocation3 + $0x5a0] sm:$0xff]  ;;  %v2349_v12 = vunpack.c.h.s8.bf16 %v1950_v14  ;;  %v2406_v14 = vunpack.c.h.s8.bf16 %v1979_v48 }
 0x7a3   :  { %2868 = vmatprep.subr.bf16.mxu0 %v2231_v29  ;;  %v2357_v29 = vunpack.c.l.s8.bf16 %v1958_v28 }
 0x7a5   :  { %2860 = vmatmul.mubr.bf16.vlgmr.msra.gmra.mrb[16].mxu0 %v4012_v7  ;;  %3103 = vmatmul.mubr.bf16.vlgmr.msra.gmra.mrb[36].mxu1 %v4036_v0  ;;  %v2258_v7 = vunpack.c.l.s8.bf16 %v1908_v19 }
 0x7a6   :  { %2869 = vmatpush1.bf16.msra.mxu0 %v2230_v32  ;;  %2900 = vmatprep.mubr.bf16.mxu0 %v4016_v60  ;;  %v2265_v60 = vunpack.c.h.s8.bf16 %v1908_v19  ;;  %v2356_v32 = vunpack.c.l.s8.bf16 %v1957_v31 }
 0x7a7   :  { %2870 = vmatprep.subr.bf16.mxu0 %v2238_v33  ;;  %v2364_v33 = vunpack.c.h.s8.bf16 %v1958_v28 }
 0x7aa   :  { %2871 = vmatpush1.bf16.msra.mxu0 %v2237_v26  ;;  %v2363_v26 = vunpack.c.h.s8.bf16 %v1957_v31 }
 0x7ab   :  { %2872 = vmatprep.subr.bf16.mxu0 %v2245_v11  ;;  %v2371_v11 = vunpack.c.l.s8.bf16 %v1965_v34 }
 0x7ae   :  { %2873 = vmatpush1.bf16.msra.mxu0 %v2244_v36  ;;  %v2370_v36 = vunpack.c.l.s8.bf16 %v1964_v35 }
 0x7af   :  { %2874 = vmatprep.subr.bf16.mxu0 %v2252_v38  ;;  %v2378_v38 = vunpack.c.h.s8.bf16 %v1965_v34 }
 0x7b2   :  { %2875 = vmatpush1.bf16.msra.mxu0 %v2251_v25 }
 0x7b3   :  { %2876 = vmatprep.subr.bf16.mxu0 %v2259_v27 }
 0x7b6   :  { %2877 = vmatpush1.bf16.msra.mxu0 %v2258_v7 }
 0x7b7   :  { %2878 = vmatprep.subr.bf16.mxu0 %v2266_v62  ;;  %v2377_v62 = vunpack.c.h.s8.bf16 %v1964_v35 }
 0x7ba   :  { %2879 = vmatpush1.bf16.msra.mxu0 %v2265_v60 }
 0x7bb   :  { %2880 = vmatprep.subr.bf16.mxu0 %v2273_v40  ;;  %v2385_v40 = vunpack.c.l.s8.bf16 %v1972_v24 }
 0x7be   :  { %2881 = vmatpush1.bf16.msra.mxu0 %v2272_v50 }
 0x7bf   :  { %2882 = vmatprep.subr.bf16.mxu0 %v2280_v51 }
 0x7c2   :  { %2883 = vmatpush1.bf16.msra.mxu0 %v2279_v8 }
 0x7c3   :  { %2884 = vmatprep.subr.bf16.mxu0 %v2287_v56 }
 0x7c6   :  { %2885 = vmatpush1.bf16.msra.mxu0 %v2286_v30 }
 0x7c7   :  { %2886 = vmatprep.subr.bf16.mxu0 %v2294_v41 }
 0x7ca   :  { %2887 = vmatpush1.bf16.msra.mxu0 %v2293_v44 }
 0x7cb   :  { %2888 = vmatprep.subr.bf16.mxu0 %v2301_v10 }
 0x7ce   :  { %2889 = vmatpush1.bf16.msra.mxu0 %v2300_v61 }
 0x7cf   :  { %2890 = vmatprep.subr.bf16.mxu0 %v2308_v3 }
 0x7d2   :  { %2891 = vmatpush1.bf16.msra.mxu0 %v2307_v49  ;;  %v2392_v49 = vunpack.c.h.s8.bf16 %v1972_v24 }
 0x7d3   :  { %2892 = vmatprep.subr.bf16.mxu0 %v2315_v2 }
 0x7d6   :  { %2893 = vmatpush1.bf16.msra.mxu0 %v2314_v4 }
 0x7d7   :  { %2894 = vmatprep.subr.bf16.mxu0 %v2322_v9 }
 0x7da   :  { %2895 = vmatpush1.bf16.msra.mxu0 %v2321_v5  ;;  %v2391_v5 = vunpack.c.h.s8.bf16 %v1971_v42 }
 0x7db   :  { %2896 = vmatprep.subr.bf16.mxu0 %v2329_v13 }
 0x7de   :  { %2897 = vmatpush1.bf16.msra.mxu0 %v2328_v45  ;;  %v2399_v45 = vunpack.c.l.s8.bf16 %v1979_v48 }
 0x7df   :  { %2898 = vmatprep.subr.bf16.mxu0 %v2336_v20  ;;  %v1978_v20 = vld [vmem:[#allocation3 + $0x640] sm:$0xff] }
 0x7e2   :  { %2899 = vmatpush1.bf16.msra.mxu0 %v2335_v6 }
 0x7e3   :  { %2909 = vmatprep.subr.bf16.mxu0 %v2343_v59  ;;  %v2398_v59 = vunpack.c.l.s8.bf16 %v1978_v20 }
 0x7e5   :  { %2901 = vmatmul.mubr.bf16.vlgmr.msra.gmra.mrb[16].mxu0 %v4024_v46  ;;  %v4055_v46 = vld [vmem:[#allocation10 + $0x34] sm:$0xff] }
 0x7e6   :  { %2910 = vmatpush1.bf16.msra.mxu0 %v2342_v22  ;;  %2941 = vmatprep.mubr.bf16.mxu0 %v4028_v58  ;;  %v4057_v58 = vld [vmem:[#allocation10 + $0x2d] sm:$0xff]  ;;  %v3115_v25 = vrot.slane %v4055_v46, %v3798_v63  ;;  %v3123_v27 = vrot.slane %v4055_v46, %v3857_v53  ;;  %v3119_v19 = vrot.slane %v4055_v46, %v3801_v1  ;;  %v1986_v22 = vld [vmem:[#allocation3 + $0x680] sm:$0xff] }
 0x7e7   :  { %2911 = vmatprep.subr.bf16.mxu0 %v2350_v23  ;;  %v3127_v7 = vrot.slane %v4055_v46, %v3860_v54  ;;  %v3159_v39 = vrot.slane %v4057_v58, %v3798_v63  ;;  %v3167_v60 = vrot.slane %v4057_v58, %v3857_v53  ;;  %v3163_v52 = vrot.slane %v4057_v58, %v3801_v1 }
 0x7e8   :  { %v3171_v8 = vrot.slane %v4057_v58, %v3860_v54  ;;  %v2384_v53 = vunpack.c.l.s8.bf16 %v1971_v42  ;;  %v2405_v23 = vunpack.c.h.s8.bf16 %v1978_v20  ;;  %v2413_v28 = vunpack.c.l.s8.bf16 %v1986_v22  ;;  %v1999_v42 = vld [vmem:[#allocation3 + $0x6e8] sm:$0xff] }
 0x7ea   :  { %2912 = vmatpush1.bf16.msra.mxu0 %v2349_v12  ;;  %v1985_v12 = vld [vmem:[#allocation3 + $0x678] sm:$0xff] }
 0x7eb   :  { %2913 = vmatprep.subr.bf16.mxu0 %v2357_v29  ;;  %v2412_v29 = vunpack.c.l.s8.bf16 %v1985_v12  ;;  %v2419_v24 = vunpack.c.h.s8.bf16 %v1985_v12 }
 0x7ee   :  { %2914 = vmatpush1.bf16.msra.mxu0 %v2356_v32  ;;  %v2420_v32 = vunpack.c.h.s8.bf16 %v1986_v22 }
 0x7ef   :  { %2915 = vmatprep.subr.bf16.mxu0 %v2364_v33 }
 0x7f2   :  { %2916 = vmatpush1.bf16.msra.mxu0 %v2363_v26  ;;  %v1993_v26 = vld [vmem:[#allocation3 + $0x6b8] sm:$0xff] }
 0x7f3   :  { %2917 = vmatprep.subr.bf16.mxu0 %v2371_v11 }
 0x7f6   :  { %2918 = vmatpush1.bf16.msra.mxu0 %v2370_v36 }
 0x7f7   :  { %2919 = vmatprep.subr.bf16.mxu0 %v2378_v38 }
 0x7f8   :  { %v2615_v50 = vpop.f32.mrb[12].mxu0  ;;  %v2779_v51 = vpop.f32.mrb[20].mxu1 }
 0x7f9   :  { %v3147_v56 = vmul.f32 %v3115_v25, %v2615_v50  ;;  %v3149_v57 = vmul.f32 %v3123_v27, %v2779_v51  ;;  %v2617_v30 = vpop.f32.mrb[13].mxu0  ;;  %v2781_v41 = vpop.f32.mrb[21].mxu1  ;;  %v2427_v27 = vunpack.c.l.s8.bf16 %v1993_v26 }
 0x7fa   :  { %v3148_v47 = vmul.f32 %v3119_v19, %v2617_v30  ;;  %v3150_v63 = vmul.f32 %v3127_v7, %v2781_v41  ;;  %v2619_v44 = vpop.f32.mrb[14].mxu0  ;;  %v2783_v10 = vpop.f32.mrb[22].mxu1  ;;  %2920 = vmatpush1.bf16.msra.mxu0 %v2377_v62  ;;  %v1992_v19 = vld [vmem:[#allocation3 + $0x6b0] sm:$0xff]  ;;  %v2434_v62 = vunpack.c.h.s8.bf16 %v1993_v26 }
 0x7fb   :  { %v3191_v55 = vadd.f32 %v3159_v39, %v3147_v56  ;;  %v3193_v61 = vadd.f32 %v3167_v60, %v3149_v57  ;;  %v2620_v3 = vpop.f32.mrb[15].mxu0  ;;  %v2784_v43 = vpop.f32.mrb[23].mxu1  ;;  %2921 = vmatprep.subr.bf16.mxu0 %v2385_v40  ;;  %v2426_v7 = vunpack.c.l.s8.bf16 %v1992_v19  ;;  %v2000_v39 = vld [vmem:[#allocation3 + $0x6f0] sm:$0xff]  ;;  %v2433_v60 = vunpack.c.h.s8.bf16 %v1992_v19 }
 0x7fc   :  { %v3192_v1 = vadd.f32 %v3163_v52, %v3148_v47  ;;  %v3194_v2 = vadd.f32 %v3171_v8, %v3150_v63  ;;  %v2441_v40 = vunpack.c.l.s8.bf16 %v2000_v39  ;;  %v2440_v57 = vunpack.c.l.s8.bf16 %v1999_v42 }
 0x7fd   :  { %v3198_v54 = vsub.f32 0.0, %v3191_v55  ;;  %v3200_v4 = vsub.f32 0.0, %v3193_v61  ;;  %v2448_v63 = vunpack.c.h.s8.bf16 %v2000_v39  ;;  %v2447_v10 = vunpack.c.h.s8.bf16 %v1999_v42 }
 0x7fe   :  { %v3199_v9 = vsub.f32 0.0, %v3192_v1  ;;  %v3201_v37 = vsub.f32 0.0, %v3194_v2  ;;  %2922 = vmatpush1.bf16.msra.mxu0 %v2384_v53 }
 0x7ff   :  { %v3205_v13 = vmul.f32 1.442695, %v3198_v54  ;;  %v3209_v15 = vmul.f32 1.442695, %v3200_v4  ;;  %2923 = vmatprep.subr.bf16.mxu0 %v2392_v49 }
 0x800   :  { %v3207_v21 = vmul.f32 1.442695, %v3199_v9  ;;  %v3211_v6 = vmul.f32 1.442695, %v3201_v37 }
 0x801   :  { %3516 = vpow2.f32 %v3205_v13 }
 0x802   :  { %3518 = vpow2.f32 %v3209_v15  ;;  %2924 = vmatpush1.bf16.msra.mxu0 %v2391_v5  ;;  %v3139_v15 = vrot.slane %v4055_v46, %v3952_v17 }
 0x803   :  { %3520 = vpow2.f32 %v3207_v21  ;;  %2925 = vmatprep.subr.bf16.mxu0 %v2399_v45  ;;  %v3183_v21 = vrot.slane %v4057_v58, %v3952_v17  ;;  %v3175_v17 = vrot.slane %v4057_v58, %v3949_v16 }
 0x804   :  { %3522 = vpow2.f32 %v3211_v6 }
 0x806   :  { %2926 = vmatpush1.bf16.msra.mxu0 %v2398_v59 }
 0x807   :  { %2927 = vmatprep.subr.bf16.mxu0 %v2406_v14 }
 0x80a   :  { %2928 = vmatpush1.bf16.msra.mxu0 %v2405_v23 }
 0x80b   :  { %v3517_v31 = vpop.eup %3516  ;;  %2929 = vmatprep.subr.bf16.mxu0 %v2413_v28 }
 0x80c   :  { %v3519_v33 = vpop.eup %3518  ;;  %v3219_v34 = vadd.f32 1.0, %v3517_v31  ;;  %v3135_v31 = vrot.slane %v4055_v46, %v3955_v18 }
 0x80d   :  { %v3521_v11 = vpop.eup %3520  ;;  %v3221_v35 = vadd.f32 1.0, %v3519_v33  ;;  %v3179_v33 = vrot.slane %v4057_v58, %v3955_v18 }
 0x80e   :  { %v3523_v36 = vpop.eup %3522  ;;  %3524 = vrcp.f32 %v3219_v34  ;;  %v3220_v38 = vadd.f32 1.0, %v3521_v11  ;;  %2930 = vmatpush1.bf16.msra.mxu0 %v2412_v29  ;;  %v3131_v29 = vrot.slane %v4055_v46, %v3949_v16 }
 0x80f   :  { %3526 = vrcp.f32 %v3221_v35  ;;  %v3222_v25 = vadd.f32 1.0, %v3523_v36  ;;  %2931 = vmatprep.subr.bf16.mxu0 %v2420_v32 }
 0x810   :  { %3528 = vrcp.f32 %v3220_v38 }
 0x811   :  { %3530 = vrcp.f32 %v3222_v25 }
 0x812   :  { %2932 = vmatpush1.bf16.msra.mxu0 %v2419_v24 }
 0x813   :  { %2933 = vmatprep.subr.bf16.mxu0 %v2427_v27 }
 0x816   :  { %2934 = vmatpush1.bf16.msra.mxu0 %v2426_v7 }
 0x817   :  { %2935 = vmatprep.subr.bf16.mxu0 %v2434_v62 }
 0x818   :  { %v3525_v50 = vpop.eup %3524  ;;  %v3297_v51 = vpop.f32.mrb[24].mxu1 }
 0x819   :  { %v3527_v52 = vpop.eup %3526  ;;  %3240 = vst [vmem:[%s4116_s7] sm:$0xff] %v3525_v50  ;;  %v3298_v8 = vpop.f32.mrb[25].mxu1 }
 0x81a   :  { %v3529_v56 = vpop.eup %3528  ;;  %3242 = vst [vmem:[%s4116_s7 + $0x10] sm:$0xff] %v3527_v52  ;;  %2936 = vmatpush1.bf16.msra.mxu0 %v2433_v60  ;;  %v3299_v30 = vadd.f32 %v3298_v8, %v3297_v51  ;;  %v3300_v41 = vpop.f32.mrb[26].mxu1 }
 0x81b   :  { %v3531_v47 = vpop.eup %3530  ;;  %3241 = vst [vmem:[%s4116_s7 + $0x8] sm:$0xff] %v3529_v56  ;;  %2937 = vmatprep.subr.bf16.mxu0 %v2441_v40  ;;  %v3301_v44 = vpop.f32.mrb[27].mxu1 }
 0x81c   :  { %3243 = vst [vmem:[%s4116_s7 + $0x18] sm:$0xff] %v3531_v47 }
 0x81e   :  { %2938 = vmatpush1.bf16.msra.mxu0 %v2440_v57 }
 0x81f   :  { %2939 = vmatprep.subr.bf16.mxu0 %v2448_v63 }
 0x822   :  { %2940 = vmatpush1.bf16.msra.mxu0 %v2447_v10 }
 0x825   :  { %2942 = vmatmul.mubr.bf16.vlgmr.msra.gmra.mrb[16].mxu0 %v4036_v0 }
 0x838   :  { %v3319_v53 = vpop.f32.mrb[28].mxu1 }
 0x839   :  { %v3320_v55 = vpop.f32.mrb[29].mxu1 }
 0x83a   :  { %v3321_v61 = vadd.f32 %v3320_v55, %v3319_v53  ;;  %v3322_v3 = vpop.f32.mrb[30].mxu1 }
 0x83b   :  { %v3323_v43 = vpop.f32.mrb[31].mxu1 }
 0x83c   :  { %v3025_v49 = vadd.f32 %v3321_v61, %v3299_v30 }
 0x858   :  { %v3341_v1 = vpop.f32.mrb[32].mxu1 }
 0x859   :  { %v3342_v2 = vpop.f32.mrb[33].mxu1 }
 0x85a   :  { %v3343_v48 = vadd.f32 %v3342_v2, %v3341_v1  ;;  %v3344_v54 = vpop.f32.mrb[34].mxu1 }
 0x85b   :  { %v3345_v4 = vpop.f32.mrb[35].mxu1 }
 0x85c   :  { %v3065_v9 = vadd.f32 %v3343_v48, %v3025_v49 }
 0x878   :  { %v3363_v37 = vpop.f32.mrb[36].mxu1 }
 0x879   :  { %v3364_v5 = vpop.f32.mrb[37].mxu1 }
 0x87a   :  { %v3365_v13 = vadd.f32 %v3364_v5, %v3363_v37  ;;  %v3366_v45 = vpop.f32.mrb[38].mxu1 }
 0x87b   :  { %v3367_v0 = vpop.f32.mrb[39].mxu1 }
 0x87c   :  { %v3105_v20 = vadd.f32 %v3365_v13, %v3065_v9 }
 0x87e   :  { %v3153_v6 = vmul.f32 %v3139_v15, %v3105_v20 }
 0x880   :  { %v3197_v59 = vadd.f32 %v3183_v21, %v3153_v6 }
 0x882   :  { %v3204_v14 = vsub.f32 0.0, %v3197_v59 }
 0x884   :  { %v3217_v22 = vmul.f32 1.442695, %v3204_v14 }
 0x886   :  { %3532 = vpow2.f32 %v3217_v22 }
 0x890   :  { %v3533_v23 = vpop.eup %3532 }
 0x891   :  { %v3225_v28 = vadd.f32 1.0, %v3533_v23 }
 0x893   :  { %3534 = vrcp.f32 %v3225_v28 }
 0x89d   :  { %v3535_v12 = vpop.eup %3534 }
 0x89e   :  { %3246 = vst [vmem:[%s4116_s7 + $0x30] sm:$0xff] %v3535_v12 }
 0x8f8   :  { %v2943_v32 = vpop.f32.mrb[16].mxu0 }
 0x8f9   :  { %v3151_v34 = vmul.f32 %v3131_v29, %v2943_v32  ;;  %v2945_v26 = vpop.f32.mrb[17].mxu0 }
 0x8fa   :  { %v3152_v11 = vmul.f32 %v3135_v31, %v2945_v26  ;;  %v2947_v35 = vpop.f32.mrb[18].mxu0 }
 0x8fb   :  { %v3195_v36 = vadd.f32 %v3175_v17, %v3151_v34  ;;  %v2948_v38 = vpop.f32.mrb[19].mxu0 }
 0x8fc   :  { %v3196_v24 = vadd.f32 %v3179_v33, %v3152_v11 }
 0x8fd   :  { %v3202_v25 = vsub.f32 0.0, %v3195_v36 }
 0x8fe   :  { %v3203_v27 = vsub.f32 0.0, %v3196_v24 }
 0x8ff   :  { %v3213_v19 = vmul.f32 1.442695, %v3202_v25 }
 0x900   :  { %v3215_v7 = vmul.f32 1.442695, %v3203_v27 }
 0x901   :  { %3536 = vpow2.f32 %v3213_v19 }
 0x902   :  { %3538 = vpow2.f32 %v3215_v7 }
 0x90b   :  { %v3537_v46 = vpop.eup %3536 }
 0x90c   :  { %v3539_v62 = vpop.eup %3538  ;;  %v3223_v16 = vadd.f32 1.0, %v3537_v46 }
 0x90d   :  { %v3224_v39 = vadd.f32 1.0, %v3539_v62 }
 0x90e   :  { %3540 = vrcp.f32 %v3223_v16 }
 0x90f   :  { %3542 = vrcp.f32 %v3224_v39 }
 0x918   :  { %v3541_v18 = vpop.eup %3540 }
 0x919   :  { %v3543_v58 = vpop.eup %3542  ;;  %3244 = vst [vmem:[%s4116_s7 + $0x20] sm:$0xff] %v3541_v18 }
 0x91a   :  { %3245 = vst [vmem:[%s4116_s7 + $0x28] sm:$0xff] %v3543_v58 }
 0x91b   :  { %3251 = vsyncpa [#allocation6], 1 }
 0x91c   :  { %3252 = vsyncpa [#allocation8], 1 }
 0x91d   :  { %3253 = vsyncpa [#allocation11], 1 }
 0x91e   :  { %3254 = vsyncmov [#allocation4] }
 0x921   :  { %s3255_s14 = vpop.sfrf %3254 }
 0x922   :  { %p3270_p6 = scmp.ne.s32.totalorder %s3255_s14, 0 }
 0x924   :  { %3259 = shalt.err (%p3270_p6)  }
 0x925   :  { %3261 = vsyncmov [#allocation4 + $0x1] }
 0x928   :  { %s3262_s1 = vpop.sfrf %3261 }
 0x929   :  { %p3271_p7 = scmp.ne.s32.totalorder %s3262_s1, 0 }
 0x92b   :  { %3266 = shalt.err (%p3271_p7)  }

</bundles_post_ra>
